<compile_context>
chip_gen: v5e
topology: v5e:2x2
jax: 0.10.0
libtpu: 0.0.40
codegen_flags: <defaults>
</compile_context>

<pallas_src>
import jax
import jax.numpy as jnp
from jax import lax
from jax.experimental import pallas as pl
from jax.experimental.pallas import tpu as pltpu


def _make_fused_kernel(H, W, C, K):
    """Fused (conv KxK + BN-shift + PReLU) x2 + residual + ReLU for one batch element."""
    pad = K // 2
    HW = H * W

    def kernel(x_ref, w1_ref, b1_ref, a1_ref, w2_ref, b2_ref, a2_ref,
               out_ref, pad_ref):
        cdt = w1_ref.dtype                      # MXU input dtype (f32 or bf16)

        def im2col():
            # (H*W, K*K*C) patch matrix.  Column order (kh, kw, cin) matches the
            # HWIO -> (K*K*Cin, Cout) weight reshape done in the wrapper.
            cols = []
            for kh in range(K):
                for kw in range(K):
                    cols.append(
                        pad_ref[kh:kh + H, kw:kw + W, :].reshape(HW, C))
            return jnp.concatenate(cols, axis=1)

        def conv_bn_prelu(w_ref, b_ref, a_ref):
            patches = im2col().astype(cdt)
            y = jnp.dot(patches, w_ref[...],
                        preferred_element_type=jnp.float32)     # (HW, C) f32
            y = y + b_ref[0][None, :]                           # folded BN shift
            return jnp.where(y > 0, y, a_ref[0][None, :] * y)   # PReLU

        # Load the input tile into the zero-padded VMEM scratch (halo = 0).
        pad_ref[...] = jnp.zeros_like(pad_ref)
        pad_ref[pad:pad + H, pad:pad + W, :] = x_ref[0].astype(pad_ref.dtype)

        h1 = conv_bn_prelu(w1_ref, b1_ref, a1_ref)               # block1

        # block2 reads the intermediate straight from VMEM: only the interior is
        # overwritten, the zero halo is reused.
        pad_ref[pad:pad + H, pad:pad + W, :] = h1.reshape(H, W, C).astype(
            pad_ref.dtype)

        h2 = conv_bn_prelu(w2_ref, b2_ref, a2_ref)               # block2

        res = x_ref[0].astype(jnp.float32).reshape(HW, C)        # identity
        out_ref[0] = jnp.maximum(h2 + res, 0.0).astype(out_ref.dtype)

    return kernel


def _fold_bn_into_conv(w_hwio, gamma, beta, running_mean, running_var, eps=1e-5):
    """Fold eval-mode BatchNorm into (scaled conv weights, per-channel shift)."""
    scale = gamma / jnp.sqrt(running_var + eps)
    w = w_hwio * scale[None, None, None, :]
    shift = beta - running_mean * scale
    return w, shift


def basic_block_forward(x_nchw, params, compute_dtype=jnp.float32):
    """Pallas implementation of BasicBlock.forward.  Input/output are NCHW f32."""
    N, C, H, W = x_nchw.shape
    K = params["w1"].shape[0]
    pad = K // 2
    Hp, Wp = H + 2 * pad, W + 2 * pad

    # NCHW -> NHWC; optionally cast activations to bf16 at the kernel boundary.
    x = jnp.transpose(x_nchw, (0, 2, 3, 1)).astype(compute_dtype)

    # One-time wrapper-side weight transform: fold BN scale into the conv
    # weights, flatten HWIO -> (K*K*Cin, Cout) slab for the im2col matmul.
    w1, b1 = _fold_bn_into_conv(params["w1"], *params["bn1"])
    w2, b2 = _fold_bn_into_conv(params["w2"], *params["bn2"])
    w1 = w1.reshape(K * K * C, C).astype(compute_dtype)
    w2 = w2.reshape(K * K * C, C).astype(compute_dtype)

    args = (x,
            w1, b1[None, :], params["alpha1"][None, :],
            w2, b2[None, :], params["alpha2"][None, :])

    kernel = _make_fused_kernel(H, W, C, K)

    out = pl.pallas_call(
        kernel,
        out_shape=jax.ShapeDtypeStruct((N, H * W, C), jnp.float32),
        grid_spec=pltpu.PrefetchScalarGridSpec(
            num_scalar_prefetch=0,
            grid=(N,),
            in_specs=[
                pl.BlockSpec((1, H, W, C), lambda n: (n, 0, 0, 0)),   # x
                pl.BlockSpec((K * K * C, C), lambda n: (0, 0)),       # w1 slab
                pl.BlockSpec((1, C), lambda n: (0, 0)),               # shift1
                pl.BlockSpec((1, C), lambda n: (0, 0)),               # alpha1
                pl.BlockSpec((K * K * C, C), lambda n: (0, 0)),       # w2 slab
                pl.BlockSpec((1, C), lambda n: (0, 0)),               # shift2
                pl.BlockSpec((1, C), lambda n: (0, 0)),               # alpha2
            ],
            out_specs=pl.BlockSpec((1, H * W, C), lambda n: (n, 0, 0)),
            scratch_shapes=[pltpu.VMEM((Hp, Wp, C), jnp.float32)],
        ),
        compiler_params=pltpu.CompilerParams(
            dimension_semantics=("parallel",)),
    )(*args)

    out = out.reshape(N, H, W, C)
    return jnp.transpose(out, (0, 3, 1, 2))                       # NHWC -> NCHW


def _reference_forward(x_nchw, params):
    """Pure-JAX reference (lax.conv) for correctness checking."""
    x = jnp.transpose(x_nchw, (0, 2, 3, 1))
    identity = x
    dn = ("NHWC", "HWIO", "NHWC")

    def _fold_bn(gamma, beta, running_mean, running_var, eps=1e-5):
        scale = gamma / jnp.sqrt(running_var + eps)
        shift = beta - running_mean * scale
        return scale, shift

    def block(inp, w, bn, alpha):
        y = lax.conv_general_dilated(inp, w, (1, 1), "SAME", dimension_numbers=dn)
        s, b = _fold_bn(*bn)
        y = y * s[None, None, None, :] + b[None, None, None, :]
        return jnp.where(y > 0, y, alpha[None, None, None, :] * y)

    out = block(x, params["w1"], params["bn1"], params["alpha1"])
    out = block(out, params["w2"], params["bn2"], params["alpha2"])
    out = jnp.maximum(out + identity, 0.0)
    return jnp.transpose(out, (0, 3, 1, 2))


def init_params(key, inplanes, kernel_size=3):
    k1, k2, k3, k4 = jax.random.split(key, 4)
    C, K = inplanes, kernel_size

    def conv_w(k):
        # PyTorch layout (Cout, Cin, KH, KW) -> HWIO
        w = 0.1 * jax.random.normal(k, (C, C, K, K), jnp.float32)
        return jnp.transpose(w, (2, 3, 1, 0))

    def bn(k):
        gamma = 1.0 + 0.05 * jax.random.normal(k, (C,), jnp.float32)
        beta = 0.02 * jnp.arange(C, dtype=jnp.float32)
        running_mean = 0.01 * jnp.arange(C, dtype=jnp.float32)
        running_var = jnp.ones((C,), jnp.float32)
        return (gamma, beta, running_mean, running_var)

    return {
        "w1": conv_w(k1),
        "w2": conv_w(k2),
        "bn1": bn(k3),
        "bn2": bn(k4),
        "alpha1": jnp.full((C,), 0.25, jnp.float32),   # PReLU default init
        "alpha2": jnp.full((C,), 0.25, jnp.float32),
    }


if __name__ == "__main__":
    key = jax.random.PRNGKey(0)
    kx, kp = jax.random.split(key)

    N, C, H, W = 2, 4, 16, 16                      # NCHW, matches nn.Conv2d input
    x = jax.random.normal(kx, (N, C, H, W), jnp.float32)
    params = init_params(kp, inplanes=C, kernel_size=3)

    ref = jax.block_until_ready(_reference_forward(x, params))

    # f32 path: tight check against the pure-JAX reference.
    out_f32 = jax.block_until_ready(basic_block_forward(x, params))
    assert out_f32.shape == (N, C, H, W)
    assert jnp.max(jnp.abs(out_f32 - ref)) < 2e-4, "f32 mismatch vs. reference"

    # bf16 MXU-input path (v6e/v7x recommendation); f32 accumulation + epilogue,
    # so only input-quantization error remains -> loose tolerance.
    out_bf16 = jax.block_until_ready(
        basic_block_forward(x, params, compute_dtype=jnp.bfloat16))
    assert jnp.max(jnp.abs(out_bf16 - ref)) < 1.5e-1, "bf16 mismatch vs. reference"

    print("KERNEL_OK")
</pallas_src>

<mosaic_0001>
module attributes {stable_mosaic.version = 11 : i64} {
  func.func @kernel(%arg0: i32, %arg1: memref<1x16x16x4xf32, #tpu.memory_space<vmem>>, %arg2: memref<36x4xf32, #tpu.memory_space<vmem>>, %arg3: memref<1x4xf32, #tpu.memory_space<vmem>>, %arg4: memref<1x4xf32, #tpu.memory_space<vmem>>, %arg5: memref<36x4xf32, #tpu.memory_space<vmem>>, %arg6: memref<1x4xf32, #tpu.memory_space<vmem>>, %arg7: memref<1x4xf32, #tpu.memory_space<vmem>>, %arg8: memref<1x256x4xf32, #tpu.memory_space<vmem>>, %arg9: memref<18x18x4xf32, #tpu.memory_space<vmem>>) attributes {dimension_semantics = [#tpu.dimension_semantics<parallel>], iteration_bounds = array<i64: 2>, scalar_prefetch = 0 : i64, scratch_operands = 1 : i64, tpu.core_type = #tpu.core_type<tc>, window_params = [{transform_indices = @transform_0, window_bounds = array<i64: 1, 16, 16, 4>}, {pipeline_mode = #tpu.pipeline_mode<synchronous>, transform_indices = @transform_1, window_bounds = array<i64: 36, 4>}, {pipeline_mode = #tpu.pipeline_mode<synchronous>, transform_indices = @transform_2, window_bounds = array<i64: 1, 4>}, {pipeline_mode = #tpu.pipeline_mode<synchronous>, transform_indices = @transform_3, window_bounds = array<i64: 1, 4>}, {pipeline_mode = #tpu.pipeline_mode<synchronous>, transform_indices = @transform_4, window_bounds = array<i64: 36, 4>}, {pipeline_mode = #tpu.pipeline_mode<synchronous>, transform_indices = @transform_5, window_bounds = array<i64: 1, 4>}, {pipeline_mode = #tpu.pipeline_mode<synchronous>, transform_indices = @transform_6, window_bounds = array<i64: 1, 4>}, {transform_indices = @transform_7, window_bounds = array<i64: 1, 256, 4>}]} {
    %cst = arith.constant 0.000000e+00 : f32
    %0 = vector.broadcast %cst : f32 to vector<18x18x4xf32>
    %c0 = arith.constant 0 : index
    %c0_0 = arith.constant 0 : index
    %c0_1 = arith.constant 0 : index
    %1 = vector.load %arg9[%c0, %c0_0, %c0_1] : memref<18x18x4xf32, #tpu.memory_space<vmem>>, vector<18x18x4xf32>
    tpu.vector_store %arg9[%c0, %c0_0, %c0_1], %0 {strides = array<i32>} : memref<18x18x4xf32, #tpu.memory_space<vmem>>, vector<18x18x4xf32>,
    %c0_2 = arith.constant 0 : index
    %c0_3 = arith.constant 0 : index
    %c0_4 = arith.constant 0 : index
    %c0_5 = arith.constant 0 : index
    %2 = vector.load %arg1[%c0_2, %c0_3, %c0_4, %c0_5] : memref<1x16x16x4xf32, #tpu.memory_space<vmem>>, vector<1x16x16x4xf32>
    %3 = vector.shape_cast %2 : vector<1x16x16x4xf32> to vector<16x16x4xf32>
    %c1 = arith.constant 1 : index
    %c1_6 = arith.constant 1 : index
    %c0_7 = arith.constant 0 : index
    %4 = vector.load %arg9[%c1, %c1_6, %c0_7] : memref<18x18x4xf32, #tpu.memory_space<vmem>>, vector<16x16x4xf32>
    tpu.vector_store %arg9[%c1, %c1_6, %c0_7], %3 {strides = array<i32>} : memref<18x18x4xf32, #tpu.memory_space<vmem>>, vector<16x16x4xf32>,
    %c0_8 = arith.constant 0 : index
    %c0_9 = arith.constant 0 : index
    %c0_10 = arith.constant 0 : index
    %5 = vector.load %arg9[%c0_8, %c0_9, %c0_10] : memref<18x18x4xf32, #tpu.memory_space<vmem>>, vector<16x16x4xf32>
    %6 = vector.shape_cast %5 : vector<16x16x4xf32> to vector<256x4xf32>
    %c0_11 = arith.constant 0 : index
    %c1_12 = arith.constant 1 : index
    %c0_13 = arith.constant 0 : index
    %7 = vector.load %arg9[%c0_11, %c1_12, %c0_13] : memref<18x18x4xf32, #tpu.memory_space<vmem>>, vector<16x16x4xf32>
    %8 = vector.shape_cast %7 : vector<16x16x4xf32> to vector<256x4xf32>
    %c0_14 = arith.constant 0 : index
    %c2 = arith.constant 2 : index
    %c0_15 = arith.constant 0 : index
    %9 = vector.load %arg9[%c0_14, %c2, %c0_15] : memref<18x18x4xf32, #tpu.memory_space<vmem>>, vector<16x16x4xf32>
    %10 = vector.shape_cast %9 : vector<16x16x4xf32> to vector<256x4xf32>
    %c1_16 = arith.constant 1 : index
    %c0_17 = arith.constant 0 : index
    %c0_18 = arith.constant 0 : index
    %11 = vector.load %arg9[%c1_16, %c0_17, %c0_18] : memref<18x18x4xf32, #tpu.memory_space<vmem>>, vector<16x16x4xf32>
    %12 = vector.shape_cast %11 : vector<16x16x4xf32> to vector<256x4xf32>
    %c1_19 = arith.constant 1 : index
    %c1_20 = arith.constant 1 : index
    %c0_21 = arith.constant 0 : index
    %13 = vector.load %arg9[%c1_19, %c1_20, %c0_21] : memref<18x18x4xf32, #tpu.memory_space<vmem>>, vector<16x16x4xf32>
    %14 = vector.shape_cast %13 : vector<16x16x4xf32> to vector<256x4xf32>
    %c1_22 = arith.constant 1 : index
    %c2_23 = arith.constant 2 : index
    %c0_24 = arith.constant 0 : index
    %15 = vector.load %arg9[%c1_22, %c2_23, %c0_24] : memref<18x18x4xf32, #tpu.memory_space<vmem>>, vector<16x16x4xf32>
    %16 = vector.shape_cast %15 : vector<16x16x4xf32> to vector<256x4xf32>
    %c2_25 = arith.constant 2 : index
    %c0_26 = arith.constant 0 : index
    %c0_27 = arith.constant 0 : index
    %17 = vector.load %arg9[%c2_25, %c0_26, %c0_27] : memref<18x18x4xf32, #tpu.memory_space<vmem>>, vector<16x16x4xf32>
    %18 = vector.shape_cast %17 : vector<16x16x4xf32> to vector<256x4xf32>
    %c2_28 = arith.constant 2 : index
    %c1_29 = arith.constant 1 : index
    %c0_30 = arith.constant 0 : index
    %19 = vector.load %arg9[%c2_28, %c1_29, %c0_30] : memref<18x18x4xf32, #tpu.memory_space<vmem>>, vector<16x16x4xf32>
    %20 = vector.shape_cast %19 : vector<16x16x4xf32> to vector<256x4xf32>
    %c2_31 = arith.constant 2 : index
    %c2_32 = arith.constant 2 : index
    %c0_33 = arith.constant 0 : index
    %21 = vector.load %arg9[%c2_31, %c2_32, %c0_33] : memref<18x18x4xf32, #tpu.memory_space<vmem>>, vector<16x16x4xf32>
    %22 = vector.shape_cast %21 : vector<16x16x4xf32> to vector<256x4xf32>
    %23 = tpu.concatenate %6, %8, %10, %12, %14, %16, %18, %20, %22 in 1 : vector<256x4xf32>, vector<256x4xf32>, vector<256x4xf32>, vector<256x4xf32>, vector<256x4xf32>, vector<256x4xf32>, vector<256x4xf32>, vector<256x4xf32>, vector<256x4xf32> -> vector<256x36xf32>
    %c0_34 = arith.constant 0 : index
    %c0_35 = arith.constant 0 : index
    %24 = vector.load %arg2[%c0_34, %c0_35] : memref<36x4xf32, #tpu.memory_space<vmem>>, vector<36x4xf32>
    %cst_36 = arith.constant dense<0.000000e+00> : vector<256x4xf32>
    %25 = tpu.matmul %23, %24, %cst_36 {dimension_numbers = #tpu.dot_dimension_numbers<[1], [0], [0], [1], [0, 0, 1, 1], [], []>} : vector<256x36xf32>, vector<36x4xf32>, vector<256x4xf32> -> vector<256x4xf32>
    %c0_37 = arith.constant 0 : index
    %c0_38 = arith.constant 0 : index
    %26 = vector.load %arg3[%c0_37, %c0_38] : memref<1x4xf32, #tpu.memory_space<vmem>>, vector<1x4xf32>
    %27 = vector.shape_cast %26 : vector<1x4xf32> to vector<4xf32>
    %28 = vector.shape_cast %27 : vector<4xf32> to vector<1x4xf32>
    %29 = vector.broadcast %28 : vector<1x4xf32> to vector<256x4xf32>
    %30 = arith.addf %25, %29 : vector<256x4xf32>
    %cst_39 = arith.constant 0.000000e+00 : f32
    %31 = vector.broadcast %cst_39 : f32 to vector<256x4xf32>
    %32 = arith.cmpf ogt, %30, %31 : vector<256x4xf32>
    %c0_40 = arith.constant 0 : index
    %c0_41 = arith.constant 0 : index
    %33 = vector.load %arg4[%c0_40, %c0_41] : memref<1x4xf32, #tpu.memory_space<vmem>>, vector<1x4xf32>
    %34 = vector.shape_cast %33 : vector<1x4xf32> to vector<4xf32>
    %35 = vector.shape_cast %34 : vector<4xf32> to vector<1x4xf32>
    %36 = vector.broadcast %35 : vector<1x4xf32> to vector<256x4xf32>
    %37 = arith.mulf %36, %30 : vector<256x4xf32>
    %38 = arith.select %32, %30, %37 : vector<256x4xi1>, vector<256x4xf32>
    %39 = vector.shape_cast %38 : vector<256x4xf32> to vector<16x16x4xf32>
    %c1_42 = arith.constant 1 : index
    %c1_43 = arith.constant 1 : index
    %c0_44 = arith.constant 0 : index
    %40 = vector.load %arg9[%c1_42, %c1_43, %c0_44] : memref<18x18x4xf32, #tpu.memory_space<vmem>>, vector<16x16x4xf32>
    tpu.vector_store %arg9[%c1_42, %c1_43, %c0_44], %39 {strides = array<i32>} : memref<18x18x4xf32, #tpu.memory_space<vmem>>, vector<16x16x4xf32>,
    %c0_45 = arith.constant 0 : index
    %c0_46 = arith.constant 0 : index
    %c0_47 = arith.constant 0 : index
    %41 = vector.load %arg9[%c0_45, %c0_46, %c0_47] : memref<18x18x4xf32, #tpu.memory_space<vmem>>, vector<16x16x4xf32>
    %42 = vector.shape_cast %41 : vector<16x16x4xf32> to vector<256x4xf32>
    %c0_48 = arith.constant 0 : index
    %c1_49 = arith.constant 1 : index
    %c0_50 = arith.constant 0 : index
    %43 = vector.load %arg9[%c0_48, %c1_49, %c0_50] : memref<18x18x4xf32, #tpu.memory_space<vmem>>, vector<16x16x4xf32>
    %44 = vector.shape_cast %43 : vector<16x16x4xf32> to vector<256x4xf32>
    %c0_51 = arith.constant 0 : index
    %c2_52 = arith.constant 2 : index
    %c0_53 = arith.constant 0 : index
    %45 = vector.load %arg9[%c0_51, %c2_52, %c0_53] : memref<18x18x4xf32, #tpu.memory_space<vmem>>, vector<16x16x4xf32>
    %46 = vector.shape_cast %45 : vector<16x16x4xf32> to vector<256x4xf32>
    %c1_54 = arith.constant 1 : index
    %c0_55 = arith.constant 0 : index
    %c0_56 = arith.constant 0 : index
    %47 = vector.load %arg9[%c1_54, %c0_55, %c0_56] : memref<18x18x4xf32, #tpu.memory_space<vmem>>, vector<16x16x4xf32>
    %48 = vector.shape_cast %47 : vector<16x16x4xf32> to vector<256x4xf32>
    %c1_57 = arith.constant 1 : index
    %c1_58 = arith.constant 1 : index
    %c0_59 = arith.constant 0 : index
    %49 = vector.load %arg9[%c1_57, %c1_58, %c0_59] : memref<18x18x4xf32, #tpu.memory_space<vmem>>, vector<16x16x4xf32>
    %50 = vector.shape_cast %49 : vector<16x16x4xf32> to vector<256x4xf32>
    %c1_60 = arith.constant 1 : index
    %c2_61 = arith.constant 2 : index
    %c0_62 = arith.constant 0 : index
    %51 = vector.load %arg9[%c1_60, %c2_61, %c0_62] : memref<18x18x4xf32, #tpu.memory_space<vmem>>, vector<16x16x4xf32>
    %52 = vector.shape_cast %51 : vector<16x16x4xf32> to vector<256x4xf32>
    %c2_63 = arith.constant 2 : index
    %c0_64 = arith.constant 0 : index
    %c0_65 = arith.constant 0 : index
    %53 = vector.load %arg9[%c2_63, %c0_64, %c0_65] : memref<18x18x4xf32, #tpu.memory_space<vmem>>, vector<16x16x4xf32>
    %54 = vector.shape_cast %53 : vector<16x16x4xf32> to vector<256x4xf32>
    %c2_66 = arith.constant 2 : index
    %c1_67 = arith.constant 1 : index
    %c0_68 = arith.constant 0 : index
    %55 = vector.load %arg9[%c2_66, %c1_67, %c0_68] : memref<18x18x4xf32, #tpu.memory_space<vmem>>, vector<16x16x4xf32>
    %56 = vector.shape_cast %55 : vector<16x16x4xf32> to vector<256x4xf32>
    %c2_69 = arith.constant 2 : index
    %c2_70 = arith.constant 2 : index
    %c0_71 = arith.constant 0 : index
    %57 = vector.load %arg9[%c2_69, %c2_70, %c0_71] : memref<18x18x4xf32, #tpu.memory_space<vmem>>, vector<16x16x4xf32>
    %58 = vector.shape_cast %57 : vector<16x16x4xf32> to vector<256x4xf32>
    %59 = tpu.concatenate %42, %44, %46, %48, %50, %52, %54, %56, %58 in 1 : vector<256x4xf32>, vector<256x4xf32>, vector<256x4xf32>, vector<256x4xf32>, vector<256x4xf32>, vector<256x4xf32>, vector<256x4xf32>, vector<256x4xf32>, vector<256x4xf32> -> vector<256x36xf32>
    %c0_72 = arith.constant 0 : index
    %c0_73 = arith.constant 0 : index
    %60 = vector.load %arg5[%c0_72, %c0_73] : memref<36x4xf32, #tpu.memory_space<vmem>>, vector<36x4xf32>
    %cst_74 = arith.constant dense<0.000000e+00> : vector<256x4xf32>
    %61 = tpu.matmul %59, %60, %cst_74 {dimension_numbers = #tpu.dot_dimension_numbers<[1], [0], [0], [1], [0, 0, 1, 1], [], []>} : vector<256x36xf32>, vector<36x4xf32>, vector<256x4xf32> -> vector<256x4xf32>
    %c0_75 = arith.constant 0 : index
    %c0_76 = arith.constant 0 : index
    %62 = vector.load %arg6[%c0_75, %c0_76] : memref<1x4xf32, #tpu.memory_space<vmem>>, vector<1x4xf32>
    %63 = vector.shape_cast %62 : vector<1x4xf32> to vector<4xf32>
    %64 = vector.shape_cast %63 : vector<4xf32> to vector<1x4xf32>
    %65 = vector.broadcast %64 : vector<1x4xf32> to vector<256x4xf32>
    %66 = arith.addf %61, %65 : vector<256x4xf32>
    %cst_77 = arith.constant 0.000000e+00 : f32
    %67 = vector.broadcast %cst_77 : f32 to vector<256x4xf32>
    %68 = arith.cmpf ogt, %66, %67 : vector<256x4xf32>
    %c0_78 = arith.constant 0 : index
    %c0_79 = arith.constant 0 : index
    %69 = vector.load %arg7[%c0_78, %c0_79] : memref<1x4xf32, #tpu.memory_space<vmem>>, vector<1x4xf32>
    %70 = vector.shape_cast %69 : vector<1x4xf32> to vector<4xf32>
    %71 = vector.shape_cast %70 : vector<4xf32> to vector<1x4xf32>
    %72 = vector.broadcast %71 : vector<1x4xf32> to vector<256x4xf32>
    %73 = arith.mulf %72, %66 : vector<256x4xf32>
    %74 = arith.select %68, %66, %73 : vector<256x4xi1>, vector<256x4xf32>
    %c0_80 = arith.constant 0 : index
    %c0_81 = arith.constant 0 : index
    %c0_82 = arith.constant 0 : index
    %c0_83 = arith.constant 0 : index
    %75 = vector.load %arg1[%c0_80, %c0_81, %c0_82, %c0_83] : memref<1x16x16x4xf32, #tpu.memory_space<vmem>>, vector<1x16x16x4xf32>
    %76 = vector.shape_cast %75 : vector<1x16x16x4xf32> to vector<16x16x4xf32>
    %77 = vector.shape_cast %76 : vector<16x16x4xf32> to vector<256x4xf32>
    %78 = arith.addf %74, %77 : vector<256x4xf32>
    %cst_84 = arith.constant 0.000000e+00 : f32
    %79 = vector.broadcast %cst_84 : f32 to vector<256x4xf32>
    %80 = arith.maximumf %78, %79 : vector<256x4xf32>
    %c0_85 = arith.constant 0 : index
    %c0_86 = arith.constant 0 : index
    %c0_87 = arith.constant 0 : index
    %81 = vector.load %arg8[%c0_85, %c0_86, %c0_87] : memref<1x256x4xf32, #tpu.memory_space<vmem>>, vector<1x256x4xf32>
    %82 = vector.shape_cast %81 : vector<1x256x4xf32> to vector<256x4xf32>
    %83 = vector.shape_cast %80 : vector<256x4xf32> to vector<1x256x4xf32>
    tpu.vector_store %arg8[%c0_85, %c0_86, %c0_87], %83 {strides = array<i32>} : memref<1x256x4xf32, #tpu.memory_space<vmem>>, vector<1x256x4xf32>,
    return
  }
  func.func @transform_0(%arg0: i32) -> (i32, i32, i32, i32) {
    %c0_i32 = arith.constant 0 : i32
    %c0_i32_0 = arith.constant 0 : i32
    %c0_i32_1 = arith.constant 0 : i32
    %c0_i32_2 = arith.constant 0 : i32
    return %arg0, %c0_i32, %c0_i32_0, %c0_i32_1 : i32, i32, i32, i32
  }
  func.func @transform_1(%arg0: i32) -> (i32, i32) {
    %c0_i32 = arith.constant 0 : i32
    %c0_i32_0 = arith.constant 0 : i32
    %c0_i32_1 = arith.constant 0 : i32
    return %c0_i32, %c0_i32_0 : i32, i32
  }
  func.func @transform_2(%arg0: i32) -> (i32, i32) {
    %c0_i32 = arith.constant 0 : i32
    %c0_i32_0 = arith.constant 0 : i32
    %c0_i32_1 = arith.constant 0 : i32
    return %c0_i32, %c0_i32_0 : i32, i32
  }
  func.func @transform_3(%arg0: i32) -> (i32, i32) {
    %c0_i32 = arith.constant 0 : i32
    %c0_i32_0 = arith.constant 0 : i32
    %c0_i32_1 = arith.constant 0 : i32
    return %c0_i32, %c0_i32_0 : i32, i32
  }
  func.func @transform_4(%arg0: i32) -> (i32, i32) {
    %c0_i32 = arith.constant 0 : i32
    %c0_i32_0 = arith.constant 0 : i32
    %c0_i32_1 = arith.constant 0 : i32
    return %c0_i32, %c0_i32_0 : i32, i32
  }
  func.func @transform_5(%arg0: i32) -> (i32, i32) {
    %c0_i32 = arith.constant 0 : i32
    %c0_i32_0 = arith.constant 0 : i32
    %c0_i32_1 = arith.constant 0 : i32
    return %c0_i32, %c0_i32_0 : i32, i32
  }
  func.func @transform_6(%arg0: i32) -> (i32, i32) {
    %c0_i32 = arith.constant 0 : i32
    %c0_i32_0 = arith.constant 0 : i32
    %c0_i32_1 = arith.constant 0 : i32
    return %c0_i32, %c0_i32_0 : i32, i32
  }
  func.func @transform_7(%arg0: i32) -> (i32, i32, i32) {
    %c0_i32 = arith.constant 0 : i32
    %c0_i32_0 = arith.constant 0 : i32
    %c0_i32_1 = arith.constant 0 : i32
    return %arg0, %c0_i32, %c0_i32_0 : i32, i32, i32
  }
}

</mosaic_0001>

<bundles_post_ra>
// kernel: tpu_custom_call.1
= control target key start
LH: loop header
LB: loop body
LE: loop exit
PB: predicated region body
PF: predicated region fallthrough
CT: control target
= control target key end

     0   :  { %s4612_s24 = smov 0   ;;  %s8040_s0 = inlined_call_operand.vmem [shape: f32[2,16,16,4], index: 0, kind: input, shape index: {}]   ;;  %s8041_s1 = inlined_call_operand.vmem [shape: f32[36,4], index: 1, kind: input, shape index: {}]   ;;  %s8042_s2 = inlined_call_operand.vmem [shape: f32[1,4], index: 2, kind: input, shape index: {}]   ;;  %s8043_s3 = inlined_call_operand.vmem [shape: f32[1,4], index: 3, kind: input, shape index: {}]   ;;  %s8044_s4 = inlined_call_operand.vmem [shape: f32[36,4], index: 4, kind: input, shape index: {}]   ;;  %s8045_s5 = inlined_call_operand.vmem [shape: f32[1,4], index: 5, kind: input, shape index: {}]   ;;  %s8046_s6 = inlined_call_operand.vmem [shape: f32[1,4], index: 6, kind: input, shape index: {}]   ;;  %s8047_s7 = inlined_call_operand.vmem [shape: f32[2,256,4], index: 7, kind: output, shape index: {}]  }
   0x1 LB: > { %s4403_s25 = sadd.s32 4294967295, %s4561_s24   ;;  %p4407_p0 = scmp.ge.s32.totalorder %s4561_s24, 1  ;;  %s4561_s24 = sphi %s4612_s24, %s17_s24  }
   0x2   : > { %p237_p1 = scmp.lt.s32.totalorder %s4561_s24, 3 }
   0x4   : > { %p238_p2 = pnand %p4407_p0, %p237_p1 }
   0x6   : > { %241 = sbr.rel (%p238_p2) target bundleno = 1914 (0x77a), region = 48 }
   0xb   : > { %vm279_vm0 = vcmask 31744   ;;  %v4563_v0 = vmov 0.0   ;;  %s4564_s26 = smov 4   ;;  %p269_p3 = scmp.lt.s32.totalorder %s4403_s25, 1  ;;  %vm282_vm1 = vcmask 25600   ;;  %vm2082_vm2 = vcmask 1043456  }
   0xc   : > { %280 = vst.msk [vmem:[#allocation2] sm:$0xff] %vm279_vm0, %v4563_v0  ;;  %s4565_s8 = smov 8   ;;  %s4566_s9 = smov 12   ;;  %vm1745_vm3 = vcmask 64512   ;;  %vm1778_vm4 = vcmask 97280   ;;  %vm1844_vm5 = vcmask 162816  }
   0xd   : > { %281 = vst.msk [vmem:[#allocation2 + $0x8] sm:$0xff] %vm279_vm0, %v4563_v0  ;;  %s8680_s25 = smov (!%p269_p3, %s4403_s25), 1  ;;  %s4567_s10 = smov 16   ;;  %vm1811_vm6 = vcmask 130048   ;;  %vm1877_vm7 = vcmask 195584   ;;  %vm1943_vm8 = vcmask 261120  }
   0xe   : > { %284 = vst.msk [vmem:[#allocation2 + $0x18] sm:$0xff] %vm279_vm0, %v4563_v0  ;;  %s4480_s27 = sshll.u32 %s8680_s25, 8  ;;  %s4568_s11 = smov 20   ;;  %vm1910_vm9 = vcmask 228352   ;;  %vm1985_vm10 = vcmask 293888  }
   0xf   : > { %285 = vst.msk [vmem:[#allocation2 + $0x20] sm:$0xff] %vm279_vm0, %v4563_v0  ;;  %s4695_s30 = scalar_lea.vmem %s8040_s0, %s4480_s27  ;;  %s4569_s12 = smov 24  }
  0x10   : > { %287 = vst.msk [vmem:[#allocation2 + $0x30] sm:$0xff] %vm279_vm0, %v4563_v0  ;;  %v337_v2 = vld [vmem:[%s4695_s30 + $0x10] sm:$0xff]  ;;  %v335_v3 = vld [vmem:[%s4695_s30] sm:$0xff]  ;;  %v338_v7 = vld [vmem:[%s4695_s30 + $0x18] sm:$0xff]  ;;  %s4570_s13 = smov 28   ;;  %s4571_s14 = smov 32  }
  0x11   : > { %288 = vst.msk [vmem:[#allocation2 + $0x38] sm:$0xff] %vm279_vm0, %v4563_v0  ;;  %v336_v8 = vld [vmem:[%s4695_s30 + $0x8] sm:$0xff]  ;;  %v339_v9 = vld [vmem:[%s4695_s30 + $0x20] sm:$0xff]  ;;  %v341_v10 = vld [vmem:[%s4695_s30 + $0x30] sm:$0xff] }
  0x12   : > { %290 = vst.msk [vmem:[#allocation2 + $0x48] sm:$0xff] %vm279_vm0, %v4563_v0  ;;  %v340_v11 = vld [vmem:[%s4695_s30 + $0x28] sm:$0xff]  ;;  %v342_v12 = vld [vmem:[%s4695_s30 + $0x38] sm:$0xff]  ;;  %v343_v14 = vld [vmem:[%s4695_s30 + $0x40] sm:$0xff] }
  0x13   : > { %291 = vst.msk [vmem:[#allocation2 + $0x50] sm:$0xff] %vm279_vm0, %v4563_v0  ;;  %v344_v13 = vld [vmem:[%s4695_s30 + $0x48] sm:$0xff]  ;;  %v345_v15 = vld [vmem:[%s4695_s30 + $0x50] sm:$0xff]  ;;  %v347_v16 = vld [vmem:[%s4695_s30 + $0x60] sm:$0xff] }
  0x14   : > { %v432_v1 = vld [vmem:[#allocation2 + $0x1] sm:$0xff]  ;;  %293 = vst.msk [vmem:[#allocation2 + $0x60] sm:$0xff] %vm279_vm0, %v4563_v0  ;;  %v346_v18 = vld [vmem:[%s4695_s30 + $0x58] sm:$0xff]  ;;  %v349_v23 = vld [vmem:[%s4695_s30 + $0x70] sm:$0xff] }
  0x15   : > { %721 = vrot.lane.b32.xlu0 %v432_v1, %s4564_s26  ;;  %294 = vst.msk [vmem:[#allocation2 + $0x68] sm:$0xff] %vm279_vm0, %v4563_v0  ;;  %v348_v20 = vld [vmem:[%s4695_s30 + $0x68] sm:$0xff]  ;;  %v350_v22 = vld [vmem:[%s4695_s30 + $0x78] sm:$0xff]  ;;  %v351_v24 = vld [vmem:[%s4695_s30 + $0x80] sm:$0xff] }
  0x16   : > { %296 = vst.msk [vmem:[#allocation2 + $0x78] sm:$0xff] %vm279_vm0, %v4563_v0  ;;  %v353_v25 = vld [vmem:[%s4695_s30 + $0x90] sm:$0xff]  ;;  %v352_v27 = vld [vmem:[%s4695_s30 + $0x88] sm:$0xff]  ;;  %v354_v29 = vld [vmem:[%s4695_s30 + $0x98] sm:$0xff] }
  0x17   : > { %297 = vst.msk [vmem:[#allocation2 + $0x80] sm:$0xff] %vm279_vm0, %v4563_v0  ;;  %v356_v31 = vld [vmem:[%s4695_s30 + $0xa8] sm:$0xff]  ;;  %v355_v32 = vld [vmem:[%s4695_s30 + $0xa0] sm:$0xff]  ;;  %v357_v33 = vld [vmem:[%s4695_s30 + $0xb0] sm:$0xff] }
  0x18   : > { %299 = vst.msk [vmem:[#allocation2 + $0x90] sm:$0xff] %vm279_vm0, %v4563_v0  ;;  %v359_v37 = vld [vmem:[%s4695_s30 + $0xc0] sm:$0xff]  ;;  %v358_v38 = vld [vmem:[%s4695_s30 + $0xb8] sm:$0xff]  ;;  %v360_v39 = vld [vmem:[%s4695_s30 + $0xc8] sm:$0xff] }
  0x19   : > { %300 = vst.msk [vmem:[#allocation2 + $0x98] sm:$0xff] %vm279_vm0, %v4563_v0  ;;  %v362_v43 = vld [vmem:[%s4695_s30 + $0xd8] sm:$0xff]  ;;  %v361_v44 = vld [vmem:[%s4695_s30 + $0xd0] sm:$0xff]  ;;  %v363_v45 = vld [vmem:[%s4695_s30 + $0xe0] sm:$0xff] }
  0x1a   : > { %302 = vst.msk [vmem:[#allocation2 + $0xa8] sm:$0xff] %vm279_vm0, %v4563_v0  ;;  %v364_v49 = vld [vmem:[%s4695_s30 + $0xe8] sm:$0xff] }
  0x1b   : > { %303 = vst.msk [vmem:[#allocation2 + $0xb0] sm:$0xff] %vm279_vm0, %v4563_v0  ;;  %v464_v62 = vld [vmem:[#allocation2 + $0x2] sm:$0xff] }
  0x1c   : > { %305 = vst.msk [vmem:[#allocation2 + $0xc0] sm:$0xff] %vm279_vm0, %v4563_v0 }
  0x1d   : > { %306 = vst.msk [vmem:[#allocation2 + $0xc8] sm:$0xff] %vm279_vm0, %v4563_v0 }
  0x1e   : > { %308 = vst.msk [vmem:[#allocation2 + $0xd8] sm:$0xff] %vm279_vm0, %v4563_v0 }
  0x1f   : > { %309 = vst.msk [vmem:[#allocation2 + $0xe0] sm:$0xff] %vm279_vm0, %v4563_v0 }
  0x20   : > { %311 = vst.msk [vmem:[#allocation2 + $0xf0] sm:$0xff] %vm279_vm0, %v4563_v0 }
  0x21   : > { %312 = vst.msk [vmem:[#allocation2 + $0xf8] sm:$0xff] %vm279_vm0, %v4563_v0 }
  0x22   : > { %314 = vst.msk [vmem:[#allocation2 + $0x108] sm:$0xff] %vm279_vm0, %v4563_v0 }
  0x23   : > { %315 = vst.msk [vmem:[#allocation2 + $0x110] sm:$0xff] %vm279_vm0, %v4563_v0 }
  0x24   : > { %317 = vst.msk [vmem:[#allocation2 + $0x120] sm:$0xff] %vm279_vm0, %v4563_v0 }
  0x25   : > { %318 = vst.msk [vmem:[#allocation2 + $0x128] sm:$0xff] %vm279_vm0, %v4563_v0 }
  0x26   : > { %320 = vst.msk [vmem:[#allocation2 + $0x138] sm:$0xff] %vm279_vm0, %v4563_v0 }
  0x27   : > { %321 = vst.msk [vmem:[#allocation2 + $0x140] sm:$0xff] %vm279_vm0, %v4563_v0 }
  0x28   : > { %323 = vst.msk [vmem:[#allocation2 + $0x150] sm:$0xff] %vm279_vm0, %v4563_v0 }
  0x29   : > { %324 = vst.msk [vmem:[#allocation2 + $0x158] sm:$0xff] %vm279_vm0, %v4563_v0 }
  0x2a   : > { %326 = vst.msk [vmem:[#allocation2 + $0x168] sm:$0xff] %vm279_vm0, %v4563_v0 }
  0x2b   : > { %327 = vst.msk [vmem:[#allocation2 + $0x170] sm:$0xff] %vm279_vm0, %v4563_v0 }
  0x2c   : > { %329 = vst.msk [vmem:[#allocation2 + $0x180] sm:$0xff] %vm279_vm0, %v4563_v0 }
  0x2d   : > { %330 = vst.msk [vmem:[#allocation2 + $0x188] sm:$0xff] %vm279_vm0, %v4563_v0 }
  0x2e   : > { %332 = vst.msk [vmem:[#allocation2 + $0x198] sm:$0xff] %vm279_vm0, %v4563_v0 }
  0x2f   : > { %333 = vst.msk [vmem:[#allocation2 + $0x1a0] sm:$0xff] %vm279_vm0, %v4563_v0 }
  0x30   : > { %370 = vst.msk [vmem:[#allocation2 + $0x31] sm:$0xff] %vm279_vm0, %v337_v2 }
  0x31   : > { %368 = vst.msk [vmem:[#allocation2 + $0x19] sm:$0xff] %vm279_vm0, %v335_v3 }
  0x32   : > { %283 = vst.msk [vmem:[#allocation2 + $0x10] sm:$0x3] %vm282_vm1, %v4563_v0 }
  0x33   : > { %286 = vst.msk [vmem:[#allocation2 + $0x28] sm:$0x3] %vm282_vm1, %v4563_v0 }
  0x34   : > { %289 = vst.msk [vmem:[#allocation2 + $0x40] sm:$0x3] %vm282_vm1, %v4563_v0 }
  0x35   : > { %292 = vst.msk [vmem:[#allocation2 + $0x58] sm:$0x3] %vm282_vm1, %v4563_v0 }
  0x36   : > { %295 = vst.msk [vmem:[#allocation2 + $0x70] sm:$0x3] %vm282_vm1, %v4563_v0 }
  0x37   : > { %v4721_v4 = vld [vmem:[#allocation2 + $0x31] sm:$0xff]  ;;  %298 = vst.msk [vmem:[#allocation2 + $0x88] sm:$0x3] %vm282_vm1, %v4563_v0 }
  0x38   : > { %729 = vrot.lane.b32.xlu2 %v4721_v4, %s4564_s26  ;;  %v4727_v5 = vld [vmem:[#allocation2 + $0x19] sm:$0xff]  ;;  %301 = vst.msk [vmem:[#allocation2 + $0xa0] sm:$0x3] %vm282_vm1, %v4563_v0 }
  0x39   : > { %725 = vrot.lane.b32.xlu1 %v4727_v5, %s4564_s26  ;;  %v433_v6 = vld [vmem:[#allocation2 + $0x9] sm:$0xff]  ;;  %304 = vst.msk [vmem:[#allocation2 + $0xb8] sm:$0x3] %vm282_vm1, %v4563_v0 }
  0x3a   : > { %723 = vrot.lane.b32.xlu0 %v433_v6, %s4564_s26  ;;  %307 = vst.msk [vmem:[#allocation2 + $0xd0] sm:$0x3] %vm282_vm1, %v4563_v0 }
  0x3b   : > { %310 = vst.msk [vmem:[#allocation2 + $0xe8] sm:$0x3] %vm282_vm1, %v4563_v0 }
  0x3c   : > { %313 = vst.msk [vmem:[#allocation2 + $0x100] sm:$0x3] %vm282_vm1, %v4563_v0 }
  0x3d   : > { %316 = vst.msk [vmem:[#allocation2 + $0x118] sm:$0x3] %vm282_vm1, %v4563_v0 }
  0x3e   : > { %319 = vst.msk [vmem:[#allocation2 + $0x130] sm:$0x3] %vm282_vm1, %v4563_v0 }
  0x3f   : > { %322 = vst.msk [vmem:[#allocation2 + $0x148] sm:$0x3] %vm282_vm1, %v4563_v0 }
  0x40   : > { %325 = vst.msk [vmem:[#allocation2 + $0x160] sm:$0x3] %vm282_vm1, %v4563_v0 }
  0x41   : > { %328 = vst.msk [vmem:[#allocation2 + $0x178] sm:$0x3] %vm282_vm1, %v4563_v0 }
  0x42   : > { %331 = vst.msk [vmem:[#allocation2 + $0x190] sm:$0x3] %vm282_vm1, %v4563_v0 }
  0x43   : > { %334 = vst.msk [vmem:[#allocation2 + $0x1a8] sm:$0x3] %vm282_vm1, %v4563_v0  ;;  %v465_v0 = vld [vmem:[#allocation2 + $0xa] sm:$0xff] }
  0x44   : > { %371 = vst.msk [vmem:[#allocation2 + $0x39] sm:$0xff] %vm279_vm0, %v338_v7 }
  0x45   : > { %369 = vst.msk [vmem:[#allocation2 + $0x21] sm:$0xff] %vm279_vm0, %v336_v8 }
  0x46   : > { %372 = vst.msk [vmem:[#allocation2 + $0x49] sm:$0xff] %vm279_vm0, %v339_v9 }
  0x47   : > { %374 = vst.msk [vmem:[#allocation2 + $0x61] sm:$0xff] %vm279_vm0, %v341_v10 }
  0x48   : > { %373 = vst.msk [vmem:[#allocation2 + $0x51] sm:$0xff] %vm279_vm0, %v340_v11 }
  0x49   : > { %375 = vst.msk [vmem:[#allocation2 + $0x69] sm:$0xff] %vm279_vm0, %v342_v12 }
  0x4a   : > { %377 = vst.msk [vmem:[#allocation2 + $0x81] sm:$0xff] %vm279_vm0, %v344_v13 }
  0x4b   : > { %v4773_v17 = vld [vmem:[#allocation2 + $0x39] sm:$0xff]  ;;  %376 = vst.msk [vmem:[#allocation2 + $0x79] sm:$0xff] %vm279_vm0, %v343_v14 }
  0x4c   : > { %731 = vrot.lane.b32.xlu2 %v4773_v17, %s4564_s26  ;;  %v4779_v19 = vld [vmem:[#allocation2 + $0x21] sm:$0xff]  ;;  %378 = vst.msk [vmem:[#allocation2 + $0x91] sm:$0xff] %vm279_vm0, %v345_v15  ;;  %v4930_v3 = vld [vmem:[#allocation2 + $0x32] sm:$0xff] }
  0x4d   : > { %727 = vrot.lane.b32.xlu1 %v4779_v19, %s4564_s26  ;;  %v4785_v21 = vld [vmem:[#allocation2 + $0x49] sm:$0xff]  ;;  %380 = vst.msk [vmem:[#allocation2 + $0xa9] sm:$0xff] %vm279_vm0, %v347_v16  ;;  %v4928_v2 = vld [vmem:[#allocation2 + $0x1a] sm:$0xff] }
  0x4e   : > { %733 = vrot.lane.b32.xlu0 %v4785_v21, %s4564_s26  ;;  %379 = vst.msk [vmem:[#allocation2 + $0x99] sm:$0xff] %vm279_vm0, %v346_v18  ;;  %v4797_v26 = vld [vmem:[#allocation2 + $0x61] sm:$0xff] }
  0x4f   : > { %381 = vst.msk [vmem:[#allocation2 + $0xb1] sm:$0xff] %vm279_vm0, %v348_v20  ;;  %v4801_v28 = vld [vmem:[#allocation2 + $0x51] sm:$0xff]  ;;  %v4926_v1 = vld [vmem:[#allocation2 + $0x22] sm:$0xff]  ;;  %v4942_v8 = vld [vmem:[#allocation2 + $0x3a] sm:$0xff] }
  0x50   : > { %383 = vst.msk [vmem:[#allocation2 + $0xc9] sm:$0xff] %vm279_vm0, %v350_v22  ;;  %v4805_v30 = vld [vmem:[#allocation2 + $0x69] sm:$0xff]  ;;  %v4944_v9 = vld [vmem:[#allocation2 + $0x52] sm:$0xff] }
  0x51   : > { %382 = vst.msk [vmem:[#allocation2 + $0xc1] sm:$0xff] %vm279_vm0, %v349_v23  ;;  %v4822_v34 = vld [vmem:[#allocation2 + $0x81] sm:$0xff]  ;;  %v4940_v7 = vld [vmem:[#allocation2 + $0x4a] sm:$0xff] }
  0x52   : > { %384 = vst.msk [vmem:[#allocation2 + $0xd9] sm:$0xff] %vm279_vm0, %v351_v24  ;;  %v4824_v35 = vld [vmem:[#allocation2 + $0x79] sm:$0xff]  ;;  %v4954_v11 = vld [vmem:[#allocation2 + $0x6a] sm:$0xff]  ;;  %v4956_v12 = vld [vmem:[#allocation2 + $0x62] sm:$0xff] }
  0x53   : > { %386 = vst.msk [vmem:[#allocation2 + $0xf1] sm:$0xff] %vm279_vm0, %v353_v25  ;;  %v4826_v36 = vld [vmem:[#allocation2 + $0x91] sm:$0xff]  ;;  %v4958_v13 = vld [vmem:[#allocation2 + $0x7a] sm:$0xff]  ;;  %v4972_v18 = vld [vmem:[#allocation2 + $0x82] sm:$0xff] }
  0x54   : > { %737 = vrot.lane.b32.xlu2 %v4797_v26, %s4564_s26  ;;  %385 = vst.msk [vmem:[#allocation2 + $0xe1] sm:$0xff] %vm279_vm0, %v352_v27  ;;  %v4840_v40 = vld [vmem:[#allocation2 + $0xa9] sm:$0xff] }
  0x55   : > { %735 = vrot.lane.b32.xlu1 %v4801_v28, %s4564_s26  ;;  %387 = vst.msk [vmem:[#allocation2 + $0xf9] sm:$0xff] %vm279_vm0, %v354_v29  ;;  %v4842_v41 = vld [vmem:[#allocation2 + $0x99] sm:$0xff] }
  0x56   : > { %739 = vrot.lane.b32.xlu0 %v4805_v30, %s4564_s26  ;;  %389 = vst.msk [vmem:[#allocation2 + $0x111] sm:$0xff] %vm279_vm0, %v356_v31  ;;  %v4844_v42 = vld [vmem:[#allocation2 + $0xb1] sm:$0xff]  ;;  %v4974_v20 = vld [vmem:[#allocation2 + $0x9a] sm:$0xff] }
  0x57   : > { %388 = vst.msk [vmem:[#allocation2 + $0x109] sm:$0xff] %vm279_vm0, %v355_v32  ;;  %v4858_v46 = vld [vmem:[#allocation2 + $0xc9] sm:$0xff]  ;;  %v4970_v16 = vld [vmem:[#allocation2 + $0x92] sm:$0xff] }
  0x58   : > { %390 = vst.msk [vmem:[#allocation2 + $0x121] sm:$0xff] %vm279_vm0, %v357_v33  ;;  %v4860_v47 = vld [vmem:[#allocation2 + $0xc1] sm:$0xff]  ;;  %v4988_v25 = vld [vmem:[#allocation2 + $0xb2] sm:$0xff]  ;;  %v4990_v27 = vld [vmem:[#allocation2 + $0xaa] sm:$0xff] }
  0x59   : > { %392 = vst.msk [vmem:[#allocation2 + $0x139] sm:$0xff] %vm279_vm0, %v359_v37  ;;  %v4862_v48 = vld [vmem:[#allocation2 + $0xd9] sm:$0xff]  ;;  %v4992_v29 = vld [vmem:[#allocation2 + $0xc2] sm:$0xff] }
  0x5a   : > { %391 = vst.msk [vmem:[#allocation2 + $0x129] sm:$0xff] %vm279_vm0, %v358_v38  ;;  %v4872_v50 = vld [vmem:[#allocation2 + $0xf1] sm:$0xff] }
  0x5b   : > { %393 = vst.msk [vmem:[#allocation2 + $0x141] sm:$0xff] %vm279_vm0, %v360_v39  ;;  %v4874_v51 = vld [vmem:[#allocation2 + $0xe1] sm:$0xff]  ;;  %v5008_v38 = vld [vmem:[#allocation2 + $0xca] sm:$0xff] }
  0x5c   : > { %743 = vrot.lane.b32.xlu2 %v4822_v34, %s4564_s26  ;;  %395 = vst.msk [vmem:[#allocation2 + $0x159] sm:$0xff] %vm279_vm0, %v362_v43  ;;  %v4876_v52 = vld [vmem:[#allocation2 + $0xf9] sm:$0xff]  ;;  %v5010_v39 = vld [vmem:[#allocation2 + $0xe2] sm:$0xff] }
  0x5d   : > { %741 = vrot.lane.b32.xlu1 %v4824_v35, %s4564_s26  ;;  %394 = vst.msk [vmem:[#allocation2 + $0x151] sm:$0xff] %vm279_vm0, %v361_v44  ;;  %v4884_v53 = vld [vmem:[#allocation2 + $0x111] sm:$0xff]  ;;  %v5006_v37 = vld [vmem:[#allocation2 + $0xda] sm:$0xff] }
  0x5e   : > { %745 = vrot.lane.b32.xlu0 %v4826_v36, %s4564_s26  ;;  %396 = vst.msk [vmem:[#allocation2 + $0x169] sm:$0xff] %vm279_vm0, %v363_v45  ;;  %v4886_v54 = vld [vmem:[#allocation2 + $0x109] sm:$0xff] }
  0x5f   : > { %397 = vst.msk [vmem:[#allocation2 + $0x171] sm:$0xff] %vm279_vm0, %v364_v49  ;;  %v4888_v55 = vld [vmem:[#allocation2 + $0x121] sm:$0xff] }
  0x60   : > { %v4896_v56 = vld [vmem:[#allocation2 + $0x139] sm:$0xff] }
  0x61   : > { %v4898_v57 = vld [vmem:[#allocation2 + $0x129] sm:$0xff]  ;;  %v5024_v49 = vld [vmem:[#allocation2 + $0xfa] sm:$0xff] }
  0x62   : > { %v4900_v58 = vld [vmem:[#allocation2 + $0x141] sm:$0xff] }
  0x63   : > { %v4908_v59 = vld [vmem:[#allocation2 + $0x159] sm:$0xff] }
  0x64   : > { %749 = vrot.lane.b32.xlu2 %v4840_v40, %s4564_s26  ;;  %v4910_v60 = vld [vmem:[#allocation2 + $0x151] sm:$0xff] }
  0x65   : > { %747 = vrot.lane.b32.xlu1 %v4842_v41, %s4564_s26  ;;  %v4912_v61 = vld [vmem:[#allocation2 + $0x169] sm:$0xff] }
  0x66   : > { %751 = vrot.lane.b32.xlu0 %v4844_v42, %s4564_s26  ;;  %v4920_v63 = vld [vmem:[#allocation2 + $0x171] sm:$0xff] }
  0x6c   : > { %755 = vrot.lane.b32.xlu2 %v4858_v46, %s4564_s26 }
  0x6d   : > { %753 = vrot.lane.b32.xlu1 %v4860_v47, %s4564_s26 }
  0x6e   : > { %757 = vrot.lane.b32.xlu0 %v4862_v48, %s4564_s26 }
  0x74   : > { %761 = vrot.lane.b32.xlu2 %v4872_v50, %s4564_s26 }
  0x75   : > { %759 = vrot.lane.b32.xlu1 %v4874_v51, %s4564_s26 }
  0x76   : > { %763 = vrot.lane.b32.xlu0 %v4876_v52, %s4564_s26 }
  0x7c   : > { %767 = vrot.lane.b32.xlu2 %v4884_v53, %s4564_s26 }
  0x7d   : > { %765 = vrot.lane.b32.xlu1 %v4886_v54, %s4564_s26 }
  0x7e   : > { %769 = vrot.lane.b32.xlu0 %v4888_v55, %s4564_s26 }
  0x84   : > { %773 = vrot.lane.b32.xlu2 %v4896_v56, %s4564_s26 }
  0x85   : > { %771 = vrot.lane.b32.xlu1 %v4898_v57, %s4564_s26 }
  0x86   : > { %775 = vrot.lane.b32.xlu0 %v4900_v58, %s4564_s26 }
  0x87   : > { %v4962_v14 = vpop.permute.xlu0 %721 }
  0x88   : > { %8099 = vst [vmem:[#allocation5_spill] sm:$0xff] %v4962_v14  ;;  %v403_v14 = vld [vmem:[#allocation2 + $0x20] sm:$0xff] }
  0x8c   : > { %779 = vrot.lane.b32.xlu2 %v4908_v59, %s4564_s26 }
  0x8d   : > { %777 = vrot.lane.b32.xlu1 %v4910_v60, %s4564_s26 }
  0x8e   : > { %781 = vrot.lane.b32.xlu0 %v4912_v61, %s4564_s26 }
  0x92   : > { %v4934_v6 = vpop.permute.xlu2 %729 }
  0x93   : > { %8097 = vst [vmem:[#allocation3_spill] sm:$0xff] %v4934_v6  ;;  %v5064_v6 = vld [vmem:[#allocation2 + $0x152] sm:$0xff] }
  0x94   : > { %849 = vrot.lane.b32.xlu2 %v464_v62, %s4565_s8  ;;  %v5026_v62 = vld [vmem:[#allocation2 + $0xf2] sm:$0xff]  ;;  %8118 = vst [vmem:[#allocation24_spill] sm:$0xff] %v5064_v6 }
  0x95   : > { %783 = vrot.lane.b32.xlu1 %v4920_v63, %s4564_s26 }
  0x96   : > { %851 = vrot.lane.b32.xlu0 %v465_v0, %s4565_s8  ;;  %v5028_v0 = vld [vmem:[#allocation2 + $0x10a] sm:$0xff] }
  0x9c   : > { %855 = vrot.lane.b32.xlu2 %v4926_v1, %s4565_s8 }
  0x9d   : > { %853 = vrot.lane.b32.xlu1 %v4928_v2, %s4565_s8 }
  0x9e   : > { %857 = vrot.lane.b32.xlu0 %v4930_v3, %s4565_s8 }
  0xa4   : > { %861 = vrot.lane.b32.xlu2 %v4940_v7, %s4565_s8 }
  0xa5   : > { %859 = vrot.lane.b32.xlu1 %v4942_v8, %s4565_s8 }
  0xa6   : > { %863 = vrot.lane.b32.xlu0 %v4944_v9, %s4565_s8  ;;  %v4952_v10 = vpop.permute.xlu2 %731 }
  0xa7   : > { %8098 = vst [vmem:[#allocation4_spill] sm:$0xff] %v4952_v10  ;;  %v5062_v10 = vld [vmem:[#allocation2 + $0x13a] sm:$0xff] }
  0xab   : > { %v4980_v22 = vpop.permute.xlu1 %725 }
  0xac   : > { %867 = vrot.lane.b32.xlu2 %v4954_v11, %s4565_s8  ;;  %8101 = vst [vmem:[#allocation7_spill] sm:$0xff] %v4980_v22  ;;  %v4986_v24 = vpop.permute.xlu0 %723  ;;  %v5080_v22 = vld [vmem:[#allocation2 + $0x15a] sm:$0xff] }
  0xad   : > { %865 = vrot.lane.b32.xlu1 %v4956_v12, %s4565_s8  ;;  %8103 = vst [vmem:[#allocation9_spill] sm:$0xff] %v4986_v24  ;;  %v5082_v24 = vld [vmem:[#allocation2 + $0x172] sm:$0xff] }
  0xae   : > { %869 = vrot.lane.b32.xlu0 %v4958_v13, %s4565_s8  ;;  %v4968_v15 = vpop.permute.xlu2 %737  ;;  %8123 = vst [vmem:[#allocation29_spill] sm:$0xff] %v5080_v22 }
  0xaf   : > { %8100 = vst [vmem:[#allocation6_spill] sm:$0xff] %v4968_v15  ;;  %v5042_v15 = vld [vmem:[#allocation2 + $0x122] sm:$0xff] }
  0xb0   : > { %8124 = vst [vmem:[#allocation30_spill] sm:$0xff] %v5082_v24 }
  0xb4   : > { %873 = vrot.lane.b32.xlu2 %v4970_v16, %s4565_s8 }
  0xb5   : > { %871 = vrot.lane.b32.xlu1 %v4972_v18, %s4565_s8 }
  0xb6   : > { %875 = vrot.lane.b32.xlu0 %v4974_v20, %s4565_s8  ;;  %v4984_v23 = vpop.permute.xlu2 %743 }
  0xb7   : > { %8102 = vst [vmem:[#allocation8_spill] sm:$0xff] %v4984_v23 }
  0xbc   : > { %879 = vrot.lane.b32.xlu2 %v4988_v25, %s4565_s8 }
  0xbd   : > { %877 = vrot.lane.b32.xlu1 %v4990_v27, %s4565_s8 }
  0xbe   : > { %881 = vrot.lane.b32.xlu0 %v4992_v29, %s4565_s8  ;;  %v5000_v31 = vpop.permute.xlu2 %749 }
  0xbf   : > { %8104 = vst [vmem:[#allocation10_spill] sm:$0xff] %v5000_v31  ;;  %v5002_v32 = vpop.permute.xlu1 %727 }
  0xc0   : > { %8105 = vst [vmem:[#allocation11_spill] sm:$0xff] %v5002_v32  ;;  %v5004_v33 = vpop.permute.xlu0 %733  ;;  %v5078_v32 = vld [vmem:[#allocation2 + $0x16a] sm:$0xff] }
  0xc1   : > { %8106 = vst [vmem:[#allocation12_spill] sm:$0xff] %v5004_v33  ;;  %v5060_v33 = vld [vmem:[#allocation2 + $0x142] sm:$0xff] }
  0xc2   : > { %8117 = vst [vmem:[#allocation23_spill] sm:$0xff] %v5060_v33 }
  0xc3   : > { %8122 = vst [vmem:[#allocation28_spill] sm:$0xff] %v5078_v32 }
  0xc4   : > { %885 = vrot.lane.b32.xlu2 %v5006_v37, %s4565_s8 }
  0xc5   : > { %883 = vrot.lane.b32.xlu1 %v5008_v38, %s4565_s8 }
  0xc6   : > { %887 = vrot.lane.b32.xlu0 %v5010_v39, %s4565_s8  ;;  %v5018_v43 = vpop.permute.xlu2 %755 }
  0xc7   : > { %8107 = vst [vmem:[#allocation13_spill] sm:$0xff] %v5018_v43  ;;  %v5020_v44 = vpop.permute.xlu1 %735  ;;  %v5046_v43 = vld [vmem:[#allocation2 + $0x12a] sm:$0xff] }
  0xc8   : > { %8108 = vst [vmem:[#allocation14_spill] sm:$0xff] %v5020_v44  ;;  %v5022_v45 = vpop.permute.xlu0 %739  ;;  %v5044_v44 = vld [vmem:[#allocation2 + $0x112] sm:$0xff] }
  0xc9   : > { %8109 = vst [vmem:[#allocation15_spill] sm:$0xff] %v5022_v45 }
  0xca   : > { %8113 = vst [vmem:[#allocation19_spill] sm:$0xff] %v5046_v43 }
  0xcc   : > { %891 = vrot.lane.b32.xlu2 %v5024_v49, %s4565_s8 }
  0xcd   : > { %889 = vrot.lane.b32.xlu1 %v5026_v62, %s4565_s8 }
  0xce   : > { %893 = vrot.lane.b32.xlu0 %v5028_v0, %s4565_s8  ;;  %v5036_v31 = vpop.permute.xlu2 %761 }
  0xcf   : > { %8110 = vst [vmem:[#allocation16_spill] sm:$0xff] %v5036_v31  ;;  %v5038_v23 = vpop.permute.xlu1 %741 }
  0xd0   : > { %8111 = vst [vmem:[#allocation17_spill] sm:$0xff] %v5038_v23  ;;  %v5040_v45 = vpop.permute.xlu0 %745 }
  0xd1   : > { %8112 = vst [vmem:[#allocation18_spill] sm:$0xff] %v5040_v45 }
  0xd4   : > { %897 = vrot.lane.b32.xlu2 %v5042_v15, %s4565_s8 }
  0xd5   : > { %895 = vrot.lane.b32.xlu1 %v5044_v44, %s4565_s8 }
  0xd6   : > { %899 = vrot.lane.b32.xlu0 %v5046_v43, %s4565_s8  ;;  %v5054_v31 = vpop.permute.xlu2 %767  ;;  %v5171_v43 = vld [vmem:[#allocation2 + $0xe0] sm:$0xff] }
  0xd7   : > { %8114 = vst [vmem:[#allocation20_spill] sm:$0xff] %v5054_v31  ;;  %v5056_v23 = vpop.permute.xlu1 %747 }
  0xd8   : > { %8115 = vst [vmem:[#allocation21_spill] sm:$0xff] %v5056_v23  ;;  %v5058_v45 = vpop.permute.xlu0 %751 }
  0xd9   : > { %8116 = vst [vmem:[#allocation22_spill] sm:$0xff] %v5058_v45 }
  0xdc   : > { %903 = vrot.lane.b32.xlu2 %v5060_v33, %s4565_s8  ;;  %v404_v33 = vld [vmem:[#allocation2 + $0x30] sm:$0xff] }
  0xdd   : > { %901 = vrot.lane.b32.xlu1 %v5062_v10, %s4565_s8 }
  0xde   : > { %905 = vrot.lane.b32.xlu0 %v5064_v6, %s4565_s8  ;;  %v5072_v31 = vpop.permute.xlu2 %773  ;;  %v402_v6 = vld [vmem:[#allocation2 + $0x18] sm:$0xff] }
  0xdf   : > { %8119 = vst [vmem:[#allocation25_spill] sm:$0xff] %v5072_v31  ;;  %v5074_v23 = vpop.permute.xlu1 %753 }
  0xe0   : > { %8120 = vst [vmem:[#allocation26_spill] sm:$0xff] %v5074_v23  ;;  %v5076_v45 = vpop.permute.xlu0 %757 }
  0xe1   : > { %8121 = vst [vmem:[#allocation27_spill] sm:$0xff] %v5076_v45 }
  0xe4   : > { %909 = vrot.lane.b32.xlu2 %v5078_v32, %s4565_s8 }
  0xe5   : > { %907 = vrot.lane.b32.xlu1 %v5080_v22, %s4565_s8 }
  0xe6   : > { %911 = vrot.lane.b32.xlu0 %v5082_v24, %s4565_s8  ;;  %v5090_v31 = vpop.permute.xlu2 %779 }
  0xe7   : > { %8125 = vst [vmem:[#allocation31_spill] sm:$0xff] %v5090_v31  ;;  %v5092_v23 = vpop.permute.xlu1 %759  ;;  %v5105_v31 = vld [vmem:[#allocation2 + $0x48] sm:$0xff] }
  0xe8   : > { %8126 = vst [vmem:[#allocation32_spill] sm:$0xff] %v5092_v23  ;;  %v5094_v45 = vpop.permute.xlu0 %763  ;;  %v405_v23 = vld [vmem:[#allocation2 + $0x38] sm:$0xff] }
  0xe9   : > { %8127 = vst [vmem:[#allocation33_spill] sm:$0xff] %v5094_v45  ;;  %v5109_v45 = vld [vmem:[#allocation2 + $0x50] sm:$0xff] }
  0xea   : > { %8131 = vst [vmem:[#allocation37_spill] sm:$0xff] %v5105_v31 }
  0xeb   : > { %8132 = vst [vmem:[#allocation38_spill] sm:$0xff] %v5109_v45 }
  0xec   : > { %979 = vrot.lane.b32.xlu2 %v403_v14, %s4566_s9 }
  0xed   : > { %977 = vrot.lane.b32.xlu1 %v402_v6, %s4566_s9 }
  0xee   : > { %981 = vrot.lane.b32.xlu0 %v404_v33, %s4566_s9  ;;  %v5099_v32 = vpop.permute.xlu2 %849 }
  0xef   : > { %8128 = vst [vmem:[#allocation34_spill] sm:$0xff] %v5099_v32  ;;  %v5101_v22 = vpop.permute.xlu1 %765  ;;  %v5124_v32 = vld [vmem:[#allocation2 + $0x78] sm:$0xff] }
  0xf0   : > { %8129 = vst [vmem:[#allocation35_spill] sm:$0xff] %v5101_v22  ;;  %v5103_v24 = vpop.permute.xlu0 %769  ;;  %v408_v22 = vld [vmem:[#allocation2 + $0x60] sm:$0xff] }
  0xf1   : > { %8130 = vst [vmem:[#allocation36_spill] sm:$0xff] %v5103_v24  ;;  %v5120_v24 = vld [vmem:[#allocation2 + $0x68] sm:$0xff] }
  0xf2   : > { %8136 = vst [vmem:[#allocation42_spill] sm:$0xff] %v5120_v24 }
  0xf3   : > { %8137 = vst [vmem:[#allocation43_spill] sm:$0xff] %v5124_v32 }
  0xf4   : > { %985 = vrot.lane.b32.xlu2 %v5105_v31, %s4566_s9  ;;  %v366_v31 = vld [vmem:[%s4695_s30 + $0xf8] sm:$0xff] }
  0xf5   : > { %983 = vrot.lane.b32.xlu1 %v405_v23, %s4566_s9  ;;  %399 = vst.msk [vmem:[#allocation2 + $0x189] sm:$0xff] %vm279_vm0, %v366_v31 }
  0xf6   : > { %987 = vrot.lane.b32.xlu0 %v5109_v45, %s4566_s9  ;;  %v5114_v6 = vpop.permute.xlu2 %855  ;;  %v411_v45 = vld [vmem:[#allocation2 + $0x80] sm:$0xff] }
  0xf7   : > { %8133 = vst [vmem:[#allocation39_spill] sm:$0xff] %v5114_v6  ;;  %v5116_v14 = vpop.permute.xlu1 %771 }
  0xf8   : > { %8134 = vst [vmem:[#allocation40_spill] sm:$0xff] %v5116_v14  ;;  %v5118_v33 = vpop.permute.xlu0 %775 }
  0xf9   : > { %8135 = vst [vmem:[#allocation41_spill] sm:$0xff] %v5118_v33  ;;  %v5135_v33 = vld [vmem:[#allocation2 + $0x90] sm:$0xff] }
  0xfa   : > { %8141 = vst [vmem:[#allocation47_spill] sm:$0xff] %v5135_v33 }
  0xfc   : > { %991 = vrot.lane.b32.xlu2 %v5120_v24, %s4566_s9  ;;  %v5139_v24 = vld [vmem:[#allocation2 + $0x98] sm:$0xff] }
  0xfd   : > { %989 = vrot.lane.b32.xlu1 %v408_v22, %s4566_s9  ;;  %8142 = vst [vmem:[#allocation48_spill] sm:$0xff] %v5139_v24 }
  0xfe   : > { %993 = vrot.lane.b32.xlu0 %v5124_v32, %s4566_s9  ;;  %v5129_v23 = vpop.permute.xlu2 %861  ;;  %v414_v32 = vld [vmem:[#allocation2 + $0xa8] sm:$0xff] }
  0xff   : > { %8138 = vst [vmem:[#allocation44_spill] sm:$0xff] %v5129_v23  ;;  %v5131_v6 = vpop.permute.xlu1 %777  ;;  %v5150_v23 = vld [vmem:[#allocation2 + $0xb0] sm:$0xff] }
 0x100   : > { %8139 = vst [vmem:[#allocation45_spill] sm:$0xff] %v5131_v6  ;;  %v5133_v14 = vpop.permute.xlu0 %781 }
 0x101   : > { %8140 = vst [vmem:[#allocation46_spill] sm:$0xff] %v5133_v14 }
 0x102   : > { %8146 = vst [vmem:[#allocation52_spill] sm:$0xff] %v5150_v23 }
 0x104   : > { %997 = vrot.lane.b32.xlu2 %v5135_v33, %s4566_s9  ;;  %v5154_v33 = vld [vmem:[#allocation2 + $0xc0] sm:$0xff] }
 0x105   : > { %995 = vrot.lane.b32.xlu1 %v411_v45, %s4566_s9 }
 0x106   : > { %999 = vrot.lane.b32.xlu0 %v5139_v24, %s4566_s9  ;;  %v5144_v22 = vpop.permute.xlu2 %867  ;;  %v417_v24 = vld [vmem:[#allocation2 + $0xc8] sm:$0xff] }
 0x107   : > { %8143 = vst [vmem:[#allocation49_spill] sm:$0xff] %v5144_v22  ;;  %v5146_v6 = vpop.permute.xlu1 %783 }
 0x108   : > { %8144 = vst [vmem:[#allocation50_spill] sm:$0xff] %v5146_v6  ;;  %v5148_v14 = vpop.permute.xlu0 %851 }
 0x109   : > { %8145 = vst [vmem:[#allocation51_spill] sm:$0xff] %v5148_v14  ;;  %v5165_v14 = vld [vmem:[#allocation2 + $0xd8] sm:$0xff] }
 0x10a   : > { %8150 = vst [vmem:[#allocation56_spill] sm:$0xff] %v5165_v14 }
 0x10c   : > { %1003 = vrot.lane.b32.xlu2 %v5150_v23, %s4566_s9  ;;  %v365_v23 = vld [vmem:[%s4695_s30 + $0xf0] sm:$0xff] }
 0x10d   : > { %1001 = vrot.lane.b32.xlu1 %v414_v32, %s4566_s9  ;;  %398 = vst.msk [vmem:[#allocation2 + $0x181] sm:$0xff] %vm279_vm0, %v365_v23 }
 0x10e   : > { %1005 = vrot.lane.b32.xlu0 %v5154_v33, %s4566_s9  ;;  %v5159_v45 = vpop.permute.xlu2 %873 }
 0x10f   : > { %8147 = vst [vmem:[#allocation53_spill] sm:$0xff] %v5159_v45  ;;  %v5161_v22 = vpop.permute.xlu1 %853 }
 0x110   : > { %8148 = vst [vmem:[#allocation54_spill] sm:$0xff] %v5161_v22  ;;  %v5163_v6 = vpop.permute.xlu0 %857  ;;  %v5184_v22 = vld [vmem:[#allocation2 + $0xf8] sm:$0xff] }
 0x111   : > { %8149 = vst [vmem:[#allocation55_spill] sm:$0xff] %v5163_v6 }
 0x112   : > { %8154 = vst [vmem:[#allocation60_spill] sm:$0xff] %v5184_v22 }
 0x114   : > { %1009 = vrot.lane.b32.xlu2 %v5165_v14, %s4566_s9  ;;  %v420_v14 = vld [vmem:[#allocation2 + $0xf0] sm:$0xff] }
 0x115   : > { %1007 = vrot.lane.b32.xlu1 %v417_v24, %s4566_s9  ;;  %v5188_v24 = vld [vmem:[#allocation2 + $0x108] sm:$0xff] }
 0x116   : > { %1011 = vrot.lane.b32.xlu0 %v5171_v43, %s4566_s9  ;;  %v5177_v32 = vpop.permute.xlu2 %879  ;;  %8155 = vst [vmem:[#allocation61_spill] sm:$0xff] %v5188_v24 }
 0x117   : > { %8151 = vst [vmem:[#allocation57_spill] sm:$0xff] %v5177_v32  ;;  %v5180_v45 = vpop.permute.xlu1 %859 }
 0x118   : > { %8152 = vst [vmem:[#allocation58_spill] sm:$0xff] %v5180_v45  ;;  %v5182_v6 = vpop.permute.xlu0 %863  ;;  %v423_v45 = vld [vmem:[#allocation2 + $0x110] sm:$0xff] }
 0x119   : > { %8153 = vst [vmem:[#allocation59_spill] sm:$0xff] %v5182_v6  ;;  %v5199_v6 = vld [vmem:[#allocation2 + $0x120] sm:$0xff] }
 0x11a   : > { %8159 = vst [vmem:[#allocation65_spill] sm:$0xff] %v5199_v6 }
 0x11c   : > { %1015 = vrot.lane.b32.xlu2 %v5184_v22, %s4566_s9  ;;  %v5203_v22 = vld [vmem:[#allocation2 + $0x128] sm:$0xff] }
 0x11d   : > { %1013 = vrot.lane.b32.xlu1 %v420_v14, %s4566_s9  ;;  %8160 = vst [vmem:[#allocation66_spill] sm:$0xff] %v5203_v22 }
 0x11e   : > { %1017 = vrot.lane.b32.xlu0 %v5188_v24, %s4566_s9  ;;  %v5193_v23 = vpop.permute.xlu2 %885  ;;  %v5216_v24 = vld [vmem:[#allocation2 + $0x138] sm:$0xff] }
 0x11f   : > { %8156 = vst [vmem:[#allocation62_spill] sm:$0xff] %v5193_v23  ;;  %v5195_v31 = vpop.permute.xlu1 %865 }
 0x120   : > { %8157 = vst [vmem:[#allocation63_spill] sm:$0xff] %v5195_v31  ;;  %v5197_v32 = vpop.permute.xlu0 %869 }
 0x121   : > { %8158 = vst [vmem:[#allocation64_spill] sm:$0xff] %v5197_v32  ;;  %v5214_v32 = vld [vmem:[#allocation2 + $0x140] sm:$0xff] }
 0x122   : > { %8164 = vst [vmem:[#allocation70_spill] sm:$0xff] %v5214_v32 }
 0x123   : > { %8165 = vst [vmem:[#allocation71_spill] sm:$0xff] %v5216_v24 }
 0x124   : > { %1021 = vrot.lane.b32.xlu2 %v5199_v6, %s4566_s9  ;;  %v5220_v6 = vld [vmem:[#allocation2 + $0x150] sm:$0xff] }
 0x125   : > { %1019 = vrot.lane.b32.xlu1 %v423_v45, %s4566_s9  ;;  %8166 = vst [vmem:[#allocation72_spill] sm:$0xff] %v5220_v6 }
 0x126   : > { %1023 = vrot.lane.b32.xlu0 %v5203_v22, %s4566_s9  ;;  %v5208_v14 = vpop.permute.xlu2 %891  ;;  %v5234_v22 = vld [vmem:[#allocation2 + $0x158] sm:$0xff] }
 0x127   : > { %8161 = vst [vmem:[#allocation67_spill] sm:$0xff] %v5208_v14  ;;  %v5210_v23 = vpop.permute.xlu1 %871  ;;  %v5232_v14 = vld [vmem:[#allocation2 + $0x168] sm:$0xff] }
 0x128   : > { %8162 = vst [vmem:[#allocation68_spill] sm:$0xff] %v5210_v23  ;;  %v5212_v31 = vpop.permute.xlu0 %875 }
 0x129   : > { %8163 = vst [vmem:[#allocation69_spill] sm:$0xff] %v5212_v31 }
 0x12a   : > { %8170 = vst [vmem:[#allocation76_spill] sm:$0xff] %v5232_v14 }
 0x12c   : > { %1027 = vrot.lane.b32.xlu2 %v5214_v32, %s4566_s9  ;;  %v5238_v32 = vld [vmem:[#allocation2 + $0x170] sm:$0xff] }
 0x12d   : > { %1025 = vrot.lane.b32.xlu1 %v5216_v24, %s4566_s9  ;;  %v5252_v24 = vld [vmem:[#allocation2 + $0x180] sm:$0xff] }
 0x12e   : > { %1029 = vrot.lane.b32.xlu0 %v5220_v6, %s4566_s9  ;;  %v5226_v45 = vpop.permute.xlu2 %897  ;;  %v5250_v6 = vld [vmem:[#allocation2 + $0x188] sm:$0xff] }
 0x12f   : > { %8167 = vst [vmem:[#allocation73_spill] sm:$0xff] %v5226_v45  ;;  %v5228_v23 = vpop.permute.xlu1 %877 }
 0x130   : > { %8168 = vst [vmem:[#allocation74_spill] sm:$0xff] %v5228_v23  ;;  %v5230_v31 = vpop.permute.xlu0 %881 }
 0x131   : > { %8169 = vst [vmem:[#allocation75_spill] sm:$0xff] %v5230_v31 }
 0x132   : > { %8174 = vst [vmem:[#allocation80_spill] sm:$0xff] %v5250_v6 }
 0x134   : > { %1033 = vrot.lane.b32.xlu2 %v5232_v14, %s4566_s9 }
 0x135   : > { %1031 = vrot.lane.b32.xlu1 %v5234_v22, %s4566_s9 }
 0x136   : > { %1035 = vrot.lane.b32.xlu0 %v5238_v32, %s4566_s9  ;;  %v5244_v45 = vpop.permute.xlu2 %903 }
 0x137   : > { %8171 = vst [vmem:[#allocation77_spill] sm:$0xff] %v5244_v45  ;;  %v5246_v23 = vpop.permute.xlu1 %883 }
 0x138   : > { %8172 = vst [vmem:[#allocation78_spill] sm:$0xff] %v5246_v23  ;;  %v5248_v31 = vpop.permute.xlu0 %887 }
 0x139   : > { %8173 = vst [vmem:[#allocation79_spill] sm:$0xff] %v5248_v31 }
 0x13c   : > { %1039 = vrot.lane.b32.xlu2 %v5250_v6, %s4566_s9 }
 0x13d   : > { %1037 = vrot.lane.b32.xlu1 %v5252_v24, %s4566_s9 }
 0x13e   : > { %v5258_v14 = vpop.permute.xlu2 %909  ;;  %1105 = vrot.lane.b32.xlu0 %v4727_v5, %s4567_s10 }
 0x13f   : > { %8175 = vst [vmem:[#allocation81_spill] sm:$0xff] %v5258_v14  ;;  %v5262_v45 = vpop.permute.xlu1 %889 }
 0x140   : > { %8176 = vst [vmem:[#allocation82_spill] sm:$0xff] %v5262_v45  ;;  %v5264_v23 = vpop.permute.xlu0 %893  ;;  %v647_v45 = vld [vmem:[#allocation2 + $0x139] sm:$0xff] }
 0x141   : > { %8177 = vst [vmem:[#allocation83_spill] sm:$0xff] %v5264_v23 }
 0x144   : > { %1109 = vrot.lane.b32.xlu2 %v4721_v4, %s4567_s10 }
 0x145   : > { %1107 = vrot.lane.b32.xlu1 %v4779_v19, %s4567_s10 }
 0x146   : > { %1111 = vrot.lane.b32.xlu0 %v4773_v17, %s4567_s10  ;;  %v5272_v31 = vpop.permute.xlu2 %979 }
 0x147   : > { %v5274_v14 = vpop.permute.xlu1 %895 }
 0x148   : > { %8178 = vst [vmem:[#allocation84_spill] sm:$0xff] %v5274_v14  ;;  %v5276_v6 = vpop.permute.xlu0 %899  ;;  %v612_v14 = vld [vmem:[#allocation2 + $0x110] sm:$0xff] }
 0x149   : > { %8179 = vst [vmem:[#allocation85_spill] sm:$0xff] %v5276_v6 }
 0x14c   : > { %1115 = vrot.lane.b32.xlu2 %v4801_v28, %s4567_s10 }
 0x14d   : > { %1113 = vrot.lane.b32.xlu1 %v4785_v21, %s4567_s10 }
 0x14e   : > { %1117 = vrot.lane.b32.xlu0 %v4797_v26, %s4567_s10  ;;  %v5284_v4 = vpop.permute.xlu2 %985 }
 0x14f   : > { %v5286_v5 = vpop.permute.xlu1 %901 }
 0x150   : > { %8180 = vst [vmem:[#allocation86_spill] sm:$0xff] %v5286_v5  ;;  %v5288_v17 = vpop.permute.xlu0 %905  ;;  %v5512_v5 = vld [vmem:[#allocation2 + $0x18a] sm:$0xff] }
 0x151   : > { %8181 = vst [vmem:[#allocation87_spill] sm:$0xff] %v5288_v17  ;;  %v8216_v17 = vld [vmem:[#allocation24_spill] sm:$0xff] }
 0x154   : > { %1121 = vrot.lane.b32.xlu2 %v4824_v35, %s4567_s10 }
 0x155   : > { %1119 = vrot.lane.b32.xlu1 %v4805_v30, %s4567_s10 }
 0x156   : > { %1123 = vrot.lane.b32.xlu0 %v4822_v34, %s4567_s10  ;;  %v5296_v19 = vpop.permute.xlu2 %991 }
 0x157   : > { %v5298_v21 = vpop.permute.xlu1 %907 }
 0x158   : > { %8182 = vst [vmem:[#allocation88_spill] sm:$0xff] %v5298_v21  ;;  %v5300_v26 = vpop.permute.xlu0 %911 }
 0x159   : > { %8183 = vst [vmem:[#allocation89_spill] sm:$0xff] %v5300_v26  ;;  %v5388_v26 = vld [vmem:[#allocation2 + $0x189] sm:$0xff] }
 0x15c   : > { %1127 = vrot.lane.b32.xlu2 %v4842_v41, %s4567_s10 }
 0x15d   : > { %1125 = vrot.lane.b32.xlu1 %v4826_v36, %s4567_s10 }
 0x15e   : > { %1129 = vrot.lane.b32.xlu0 %v4840_v40, %s4567_s10  ;;  %v5308_v28 = vpop.permute.xlu2 %997 }
 0x15f   : > { %8184 = vst [vmem:[#allocation90_spill] sm:$0xff] %v5308_v28  ;;  %v5310_v30 = vpop.permute.xlu1 %977  ;;  %v648_v28 = vld [vmem:[#allocation2 + $0x141] sm:$0xff] }
 0x160   : > { %v5312_v34 = vpop.permute.xlu0 %981 }
 0x164   : > { %1133 = vrot.lane.b32.xlu2 %v4860_v47, %s4567_s10 }
 0x165   : > { %1131 = vrot.lane.b32.xlu1 %v4844_v42, %s4567_s10 }
 0x166   : > { %1135 = vrot.lane.b32.xlu0 %v4858_v46, %s4567_s10  ;;  %v5320_v35 = vpop.permute.xlu2 %1003 }
 0x167   : > { %8185 = vst [vmem:[#allocation91_spill] sm:$0xff] %v5320_v35  ;;  %v5322_v36 = vpop.permute.xlu1 %983  ;;  %v606_v35 = vld [vmem:[#allocation2 + $0xc8] sm:$0xff] }
 0x168   : > { %v5324_v40 = vpop.permute.xlu0 %987 }
 0x16c   : > { %1139 = vrot.lane.b32.xlu2 %v4874_v51, %s4567_s10 }
 0x16d   : > { %1137 = vrot.lane.b32.xlu1 %v4862_v48, %s4567_s10 }
 0x16e   : > { %1141 = vrot.lane.b32.xlu0 %v4872_v50, %s4567_s10  ;;  %v5332_v41 = vpop.permute.xlu2 %1009 }
 0x16f   : > { %v5334_v42 = vpop.permute.xlu1 %989 }
 0x170   : > { %v5336_v46 = vpop.permute.xlu0 %993 }
 0x174   : > { %1145 = vrot.lane.b32.xlu2 %v4886_v54, %s4567_s10 }
 0x175   : > { %1143 = vrot.lane.b32.xlu1 %v4876_v52, %s4567_s10 }
 0x176   : > { %1147 = vrot.lane.b32.xlu0 %v4884_v53, %s4567_s10  ;;  %v5344_v47 = vpop.permute.xlu2 %1015 }
 0x177   : > { %8186 = vst [vmem:[#allocation92_spill] sm:$0xff] %v5344_v47  ;;  %v5346_v48 = vpop.permute.xlu1 %995  ;;  %v674_v47 = vld [vmem:[#allocation2 + $0xfa] sm:$0xff] }
 0x178   : > { %8187 = vst [vmem:[#allocation93_spill] sm:$0xff] %v5346_v48  ;;  %v5348_v50 = vpop.permute.xlu0 %999  ;;  %v671_v48 = vld [vmem:[#allocation2 + $0xda] sm:$0xff] }
 0x179   : > { %8188 = vst [vmem:[#allocation94_spill] sm:$0xff] %v5348_v50  ;;  %v632_v50 = vld [vmem:[#allocation2 + $0x81] sm:$0xff] }
 0x17c   : > { %1151 = vrot.lane.b32.xlu2 %v4898_v57, %s4567_s10  ;;  %v5374_v57 = vld [vmem:[#allocation2 + $0x181] sm:$0xff] }
 0x17d   : > { %1149 = vrot.lane.b32.xlu1 %v4888_v55, %s4567_s10 }
 0x17e   : > { %1153 = vrot.lane.b32.xlu0 %v4896_v56, %s4567_s10  ;;  %v5356_v51 = vpop.permute.xlu2 %1021 }
 0x17f   : > { %8189 = vst [vmem:[#allocation95_spill] sm:$0xff] %v5356_v51  ;;  %v5358_v52 = vpop.permute.xlu1 %1001  ;;  %v8254_v51 = vld [vmem:[#allocation72_spill] sm:$0xff] }
 0x180   : > { %8190 = vst [vmem:[#allocation96_spill] sm:$0xff] %v5358_v52  ;;  %v5360_v53 = vpop.permute.xlu0 %1005 }
 0x181   : > { %8191 = vst [vmem:[#allocation97_spill] sm:$0xff] %v5360_v53  ;;  %v8228_v53 = vld [vmem:[#allocation42_spill] sm:$0xff] }
 0x184   : > { %1157 = vrot.lane.b32.xlu2 %v4910_v60, %s4567_s10 }
 0x185   : > { %1155 = vrot.lane.b32.xlu1 %v4900_v58, %s4567_s10 }
 0x186   : > { %1159 = vrot.lane.b32.xlu0 %v4908_v59, %s4567_s10  ;;  %v5368_v54 = vpop.permute.xlu2 %1027 }
 0x187   : > { %8192 = vst [vmem:[#allocation98_spill] sm:$0xff] %v5368_v54  ;;  %v5370_v55 = vpop.permute.xlu1 %1007  ;;  %v8224_v54 = vld [vmem:[#allocation37_spill] sm:$0xff] }
 0x188   : > { %8193 = vst [vmem:[#allocation99_spill] sm:$0xff] %v5370_v55  ;;  %v5372_v56 = vpop.permute.xlu0 %1011  ;;  %v593_v55 = vld [vmem:[#allocation2 + $0x30] sm:$0xff] }
 0x18c   : > { %1163 = vrot.lane.b32.xlu2 %v4920_v63, %s4567_s10 }
 0x18d   : > { %1161 = vrot.lane.b32.xlu1 %v4912_v61, %s4567_s10 }
 0x18e   : > { %1165 = vrot.lane.b32.xlu0 %v5374_v57, %s4567_s10  ;;  %v5382_v58 = vpop.permute.xlu2 %1033 }
 0x18f   : > { %8194 = vst [vmem:[#allocation100_spill] sm:$0xff] %v5382_v58  ;;  %v5384_v59 = vpop.permute.xlu1 %1013 }
 0x190   : > { %v5386_v60 = vpop.permute.xlu0 %1017 }
 0x191   : > { %8195 = vst [vmem:[#allocation101_spill] sm:$0xff] %v5386_v60  ;;  %v646_v60 = vld [vmem:[#allocation2 + $0x129] sm:$0xff] }
 0x194   : > { %1233 = vrot.lane.b32.xlu2 %v4928_v2, %s4568_s11 }
 0x195   : > { %1167 = vrot.lane.b32.xlu1 %v5388_v26, %s4567_s10 }
 0x196   : > { %1235 = vrot.lane.b32.xlu0 %v4926_v1, %s4568_s11  ;;  %v5396_v61 = vpop.permute.xlu2 %1039 }
 0x197   : > { %8196 = vst [vmem:[#allocation102_spill] sm:$0xff] %v5396_v61  ;;  %v5398_v63 = vpop.permute.xlu1 %1019  ;;  %v8210_v61 = vld [vmem:[#allocation19_spill] sm:$0xff] }
 0x198   : > { %8197 = vst [vmem:[#allocation103_spill] sm:$0xff] %v5398_v63  ;;  %v5400_v21 = vpop.permute.xlu0 %1023  ;;  %v631_v63 = vld [vmem:[#allocation2 + $0x79] sm:$0xff] }
 0x199   : > { %8198 = vst [vmem:[#allocation104_spill] sm:$0xff] %v5400_v21  ;;  %v603_v21 = vld [vmem:[#allocation2 + $0xa8] sm:$0xff] }
 0x19c   : > { %1239 = vrot.lane.b32.xlu2 %v4942_v8, %s4568_s11 }
 0x19d   : > { %1237 = vrot.lane.b32.xlu1 %v4930_v3, %s4568_s11 }
 0x19e   : > { %1241 = vrot.lane.b32.xlu0 %v4940_v7, %s4568_s11  ;;  %v5408_v2 = vpop.permute.xlu2 %1109 }
 0x19f   : > { %v5410_v58 = vpop.permute.xlu1 %1025 }
 0x1a0   : > { %8199 = vst [vmem:[#allocation105_spill] sm:$0xff] %v5410_v58  ;;  %v5412_v1 = vpop.permute.xlu0 %1029  ;;  %v8227_v58 = vld [vmem:[#allocation38_spill] sm:$0xff] }
 0x1a1   : > { %8200 = vst [vmem:[#allocation106_spill] sm:$0xff] %v5412_v1  ;;  %v5510_v1 = vld [vmem:[#allocation2 + $0x182] sm:$0xff] }
 0x1a4   : > { %1245 = vrot.lane.b32.xlu2 %v4956_v12, %s4568_s11 }
 0x1a5   : > { %1243 = vrot.lane.b32.xlu1 %v4944_v9, %s4568_s11 }
 0x1a6   : > { %1247 = vrot.lane.b32.xlu0 %v4954_v11, %s4568_s11  ;;  %v5420_v8 = vpop.permute.xlu2 %1115 }
 0x1a7   : > { %v5422_v3 = vpop.permute.xlu1 %1031 }
 0x1a8   : > { %8201 = vst [vmem:[#allocation107_spill] sm:$0xff] %v5422_v3  ;;  %v5424_v7 = vpop.permute.xlu0 %1035 }
 0x1a9   : > { %8202 = vst [vmem:[#allocation108_spill] sm:$0xff] %v5424_v7  ;;  %v8215_v7 = vld [vmem:[#allocation29_spill] sm:$0xff] }
 0x1ac   : > { %1251 = vrot.lane.b32.xlu2 %v4972_v18, %s4568_s11 }
 0x1ad   : > { %1249 = vrot.lane.b32.xlu1 %v4958_v13, %s4568_s11 }
 0x1ae   : > { %1253 = vrot.lane.b32.xlu0 %v4970_v16, %s4568_s11  ;;  %v5432_v12 = vpop.permute.xlu2 %1121 }
 0x1af   : > { %v5434_v9 = vpop.permute.xlu1 %1037 }
 0x1b0   : > { %8203 = vst [vmem:[#allocation109_spill] sm:$0xff] %v5434_v9  ;;  %v5436_v11 = vpop.permute.xlu0 %1105 }
 0x1b4   : > { %1257 = vrot.lane.b32.xlu2 %v4990_v27, %s4568_s11 }
 0x1b5   : > { %1255 = vrot.lane.b32.xlu1 %v4974_v20, %s4568_s11 }
 0x1b6   : > { %1259 = vrot.lane.b32.xlu0 %v4988_v25, %s4568_s11  ;;  %v5444_v18 = vpop.permute.xlu2 %1127 }
 0x1b7   : > { %8204 = vst [vmem:[#allocation110_spill] sm:$0xff] %v5444_v18  ;;  %v5446_v13 = vpop.permute.xlu1 %1107  ;;  %v629_v18 = vld [vmem:[#allocation2 + $0x61] sm:$0xff] }
 0x1b8   : > { %v5448_v16 = vpop.permute.xlu0 %1111 }
 0x1bc   : > { %1263 = vrot.lane.b32.xlu2 %v5008_v38, %s4568_s11 }
 0x1bd   : > { %1261 = vrot.lane.b32.xlu1 %v4992_v29, %s4568_s11 }
 0x1be   : > { %1265 = vrot.lane.b32.xlu0 %v5006_v37, %s4568_s11  ;;  %v5456_v27 = vpop.permute.xlu2 %1133 }
 0x1bf   : > { %8205 = vst [vmem:[#allocation111_spill] sm:$0xff] %v5456_v27  ;;  %v5458_v20 = vpop.permute.xlu1 %1113 }
 0x1c0   : > { %v5460_v25 = vpop.permute.xlu0 %1117 }
 0x1c4   : > { %1269 = vrot.lane.b32.xlu2 %v5026_v62, %s4568_s11 }
 0x1c5   : > { %1267 = vrot.lane.b32.xlu1 %v5010_v39, %s4568_s11 }
 0x1c6   : > { %1271 = vrot.lane.b32.xlu0 %v5024_v49, %s4568_s11  ;;  %v5468_v38 = vpop.permute.xlu2 %1139 }
 0x1c7   : > { %v5470_v29 = vpop.permute.xlu1 %1119 }
 0x1c8   : > { %v5472_v37 = vpop.permute.xlu0 %1123 }
 0x1c9   : > { %8206 = vst [vmem:[#allocation112_spill] sm:$0xff] %v5472_v37  ;;  %v668_v37 = vld [vmem:[#allocation2 + $0xb2] sm:$0xff] }
 0x1cc   : > { %1275 = vrot.lane.b32.xlu2 %v5044_v44, %s4568_s11  ;;  %v8211_v44 = vld [vmem:[#allocation23_spill] sm:$0xff] }
 0x1cd   : > { %1273 = vrot.lane.b32.xlu1 %v5028_v0, %s4568_s11 }
 0x1ce   : > { %1277 = vrot.lane.b32.xlu0 %v5042_v15, %s4568_s11  ;;  %v5480_v62 = vpop.permute.xlu2 %1145 }
 0x1cf   : > { %8207 = vst [vmem:[#allocation113_spill] sm:$0xff] %v5480_v62  ;;  %v5482_v39 = vpop.permute.xlu1 %1125  ;;  %v644_v62 = vld [vmem:[#allocation2 + $0x111] sm:$0xff] }
 0x1d0   : > { %8208 = vst [vmem:[#allocation114_spill] sm:$0xff] %v5482_v39  ;;  %v5484_v49 = vpop.permute.xlu0 %1129  ;;  %v643_v39 = vld [vmem:[#allocation2 + $0x109] sm:$0xff] }
 0x1d1   : > { %8209 = vst [vmem:[#allocation115_spill] sm:$0xff] %v5484_v49  ;;  %v8249_v49 = vld [vmem:[#allocation66_spill] sm:$0xff] }
 0x1d4   : > { %1281 = vrot.lane.b32.xlu2 %v5062_v10, %s4568_s11  ;;  %v8217_v10 = vld [vmem:[#allocation28_spill] sm:$0xff] }
 0x1d5   : > { %1279 = vrot.lane.b32.xlu1 %v8210_v61, %s4568_s11 }
 0x1d6   : > { %1283 = vrot.lane.b32.xlu0 %v8211_v44, %s4568_s11  ;;  %v5492_v9 = vpop.permute.xlu2 %1151 }
 0x1d7   : > { %8212 = vst [vmem:[#allocation19_spill] sm:$0xff] %v5492_v9  ;;  %v5494_v0 = vpop.permute.xlu1 %1131 }
 0x1d8   : > { %8213 = vst [vmem:[#allocation23_spill] sm:$0xff] %v5494_v0  ;;  %v5496_v15 = vpop.permute.xlu0 %1135  ;;  %v600_v0 = vld [vmem:[#allocation2 + $0x80] sm:$0xff] }
 0x1d9   : > { %8214 = vst [vmem:[#allocation116_spill] sm:$0xff] %v5496_v15  ;;  %v594_v15 = vld [vmem:[#allocation2 + $0x38] sm:$0xff] }
 0x1dc   : > { %1287 = vrot.lane.b32.xlu2 %v8215_v7, %s4568_s11  ;;  %v8220_v7 = vld [vmem:[#allocation30_spill] sm:$0xff] }
 0x1dd   : > { %1285 = vrot.lane.b32.xlu1 %v8216_v17, %s4568_s11 }
 0x1de   : > { %1289 = vrot.lane.b32.xlu0 %v8217_v10, %s4568_s11  ;;  %v5504_v3 = vpop.permute.xlu2 %1157 }
 0x1df   : > { %8218 = vst [vmem:[#allocation29_spill] sm:$0xff] %v5504_v3  ;;  %v5506_v61 = vpop.permute.xlu1 %1137 }
 0x1e0   : > { %v5508_v44 = vpop.permute.xlu0 %1141 }
 0x1e1   : > { %8219 = vst [vmem:[#allocation24_spill] sm:$0xff] %v5508_v44  ;;  %v680_v44 = vld [vmem:[#allocation2 + $0x142] sm:$0xff] }
 0x1e4   : > { %1293 = vrot.lane.b32.xlu2 %v5510_v1, %s4568_s11 }
 0x1e5   : > { %1291 = vrot.lane.b32.xlu1 %v8220_v7, %s4568_s11 }
 0x1e6   : > { %1295 = vrot.lane.b32.xlu0 %v5512_v5, %s4568_s11  ;;  %v5520_v17 = vpop.permute.xlu2 %1163 }
 0x1e7   : > { %8221 = vst [vmem:[#allocation28_spill] sm:$0xff] %v5520_v17  ;;  %v5522_v10 = vpop.permute.xlu1 %1143  ;;  %v597_v17 = vld [vmem:[#allocation2 + $0x60] sm:$0xff] }
 0x1e8   : > { %8222 = vst [vmem:[#allocation30_spill] sm:$0xff] %v5522_v10  ;;  %v5524_v3 = vpop.permute.xlu0 %1147  ;;  %v665_v10 = vld [vmem:[#allocation2 + $0x92] sm:$0xff] }
 0x1e9   : > { %8223 = vst [vmem:[#allocation117_spill] sm:$0xff] %v5524_v3  ;;  %v628_v3 = vld [vmem:[#allocation2 + $0x51] sm:$0xff] }
 0x1ec   : > { %1363 = vrot.lane.b32.xlu2 %v594_v15, %s4569_s12 }
 0x1ed   : > { %1361 = vrot.lane.b32.xlu1 %v593_v55, %s4569_s12 }
 0x1ee   : > { %1365 = vrot.lane.b32.xlu0 %v8224_v54, %s4569_s12  ;;  %v5530_v7 = vpop.permute.xlu2 %1233 }
 0x1ef   : > { %v5532_v6 = vpop.permute.xlu1 %1149 }
 0x1f0   : > { %8225 = vst [vmem:[#allocation37_spill] sm:$0xff] %v5532_v6  ;;  %v5534_v27 = vpop.permute.xlu0 %1153 }
 0x1f1   : > { %8226 = vst [vmem:[#allocation118_spill] sm:$0xff] %v5534_v27  ;;  %v8231_v27 = vld [vmem:[#allocation43_spill] sm:$0xff] }
 0x1f4   : > { %1369 = vrot.lane.b32.xlu2 %v597_v17, %s4569_s12  ;;  %v8232_v17 = vld [vmem:[#allocation47_spill] sm:$0xff] }
 0x1f5   : > { %1367 = vrot.lane.b32.xlu1 %v8227_v58, %s4569_s12 }
 0x1f6   : > { %1371 = vrot.lane.b32.xlu0 %v8228_v53, %s4569_s12  ;;  %v5541_v15 = vpop.permute.xlu2 %1239 }
 0x1f7   : > { %v5543_v55 = vpop.permute.xlu1 %1155 }
 0x1f8   : > { %8229 = vst [vmem:[#allocation38_spill] sm:$0xff] %v5543_v55  ;;  %v5545_v54 = vpop.permute.xlu0 %1159 }
 0x1f9   : > { %8230 = vst [vmem:[#allocation42_spill] sm:$0xff] %v5545_v54  ;;  %v8235_v54 = vld [vmem:[#allocation48_spill] sm:$0xff] }
 0x1fc   : > { %1375 = vrot.lane.b32.xlu2 %v600_v0, %s4569_s12  ;;  %v8236_v0 = vld [vmem:[#allocation52_spill] sm:$0xff] }
 0x1fd   : > { %1373 = vrot.lane.b32.xlu1 %v8231_v27, %s4569_s12 }
 0x1fe   : > { %1377 = vrot.lane.b32.xlu0 %v8232_v17, %s4569_s12  ;;  %v5552_v9 = vpop.permute.xlu2 %1245 }
 0x1ff   : > { %v5554_v58 = vpop.permute.xlu1 %1161 }
 0x200   : > { %8233 = vst [vmem:[#allocation43_spill] sm:$0xff] %v5554_v58  ;;  %v5556_v53 = vpop.permute.xlu0 %1165  ;;  %v609_v58 = vld [vmem:[#allocation2 + $0xf0] sm:$0xff] }
 0x201   : > { %8234 = vst [vmem:[#allocation47_spill] sm:$0xff] %v5556_v53 }
 0x204   : > { %1381 = vrot.lane.b32.xlu2 %v603_v21, %s4569_s12  ;;  %v8239_v21 = vld [vmem:[#allocation56_spill] sm:$0xff] }
 0x205   : > { %1379 = vrot.lane.b32.xlu1 %v8235_v54, %s4569_s12 }
 0x206   : > { %1383 = vrot.lane.b32.xlu0 %v8236_v0, %s4569_s12  ;;  %v5563_v55 = vpop.permute.xlu2 %1251 }
 0x207   : > { %8237 = vst [vmem:[#allocation48_spill] sm:$0xff] %v5563_v55  ;;  %v5565_v27 = vpop.permute.xlu1 %1167  ;;  %v650_v55 = vld [vmem:[#allocation2 + $0x159] sm:$0xff] }
 0x208   : > { %8238 = vst [vmem:[#allocation52_spill] sm:$0xff] %v5565_v27  ;;  %v5567_v17 = vpop.permute.xlu0 %1235 }
 0x20c   : > { %1387 = vrot.lane.b32.xlu2 %v606_v35, %s4569_s12  ;;  %v8241_v35 = vld [vmem:[#allocation60_spill] sm:$0xff] }
 0x20d   : > { %1385 = vrot.lane.b32.xlu1 %v5154_v33, %s4569_s12 }
 0x20e   : > { %1389 = vrot.lane.b32.xlu0 %v8239_v21, %s4569_s12  ;;  %v5574_v53 = vpop.permute.xlu2 %1257 }
 0x20f   : > { %8240 = vst [vmem:[#allocation56_spill] sm:$0xff] %v5574_v53  ;;  %v5576_v54 = vpop.permute.xlu1 %1237  ;;  %v8243_v53 = vld [vmem:[#allocation61_spill] sm:$0xff] }
 0x210   : > { %v5578_v0 = vpop.permute.xlu0 %1241 }
 0x214   : > { %1393 = vrot.lane.b32.xlu2 %v609_v58, %s4569_s12  ;;  %v8244_v58 = vld [vmem:[#allocation65_spill] sm:$0xff] }
 0x215   : > { %1391 = vrot.lane.b32.xlu1 %v5171_v43, %s4569_s12 }
 0x216   : > { %1395 = vrot.lane.b32.xlu0 %v8241_v35, %s4569_s12  ;;  %v5585_v27 = vpop.permute.xlu2 %1263 }
 0x217   : > { %8242 = vst [vmem:[#allocation60_spill] sm:$0xff] %v5585_v27  ;;  %v5587_v33 = vpop.permute.xlu1 %1243  ;;  %v8248_v27 = vld [vmem:[#allocation71_spill] sm:$0xff] }
 0x218   : > { %v5589_v21 = vpop.permute.xlu0 %1247 }
 0x21c   : > { %1399 = vrot.lane.b32.xlu2 %v612_v14, %s4569_s12  ;;  %v8250_v14 = vld [vmem:[#allocation70_spill] sm:$0xff] }
 0x21d   : > { %1397 = vrot.lane.b32.xlu1 %v8243_v53, %s4569_s12 }
 0x21e   : > { %1401 = vrot.lane.b32.xlu0 %v8244_v58, %s4569_s12  ;;  %v5596_v6 = vpop.permute.xlu2 %1269 }
 0x21f   : > { %8245 = vst [vmem:[#allocation61_spill] sm:$0xff] %v5596_v6  ;;  %v5598_v43 = vpop.permute.xlu1 %1249 }
 0x220   : > { %8246 = vst [vmem:[#allocation65_spill] sm:$0xff] %v5598_v43  ;;  %v5600_v35 = vpop.permute.xlu0 %1253 }
 0x221   : > { %8247 = vst [vmem:[#allocation119_spill] sm:$0xff] %v5600_v35  ;;  %v638_v35 = vld [vmem:[#allocation2 + $0xc9] sm:$0xff] }
 0x224   : > { %1405 = vrot.lane.b32.xlu2 %v8248_v27, %s4569_s12  ;;  %v8255_v27 = vld [vmem:[#allocation76_spill] sm:$0xff] }
 0x225   : > { %1403 = vrot.lane.b32.xlu1 %v8249_v49, %s4569_s12 }
 0x226   : > { %1407 = vrot.lane.b32.xlu0 %v8250_v14, %s4569_s12  ;;  %v5608_v52 = vpop.permute.xlu2 %1275 }
 0x227   : > { %8251 = vst [vmem:[#allocation71_spill] sm:$0xff] %v5608_v52  ;;  %v5610_v53 = vpop.permute.xlu1 %1255  ;;  %v626_v52 = vld [vmem:[#allocation2 + $0x39] sm:$0xff] }
 0x228   : > { %8252 = vst [vmem:[#allocation66_spill] sm:$0xff] %v5610_v53  ;;  %v5612_v58 = vpop.permute.xlu0 %1259  ;;  %v623_v53 = vld [vmem:[#allocation2 + $0x198] sm:$0xff] }
 0x229   : > { %8253 = vst [vmem:[#allocation70_spill] sm:$0xff] %v5612_v58 }
 0x22c   : > { %1411 = vrot.lane.b32.xlu2 %v5234_v22, %s4569_s12  ;;  %v8258_v22 = vld [vmem:[#allocation80_spill] sm:$0xff] }
 0x22d   : > { %1409 = vrot.lane.b32.xlu1 %v8254_v51, %s4569_s12 }
 0x22e   : > { %1413 = vrot.lane.b32.xlu0 %v8255_v27, %s4569_s12  ;;  %v5620_v23 = vpop.permute.xlu2 %1281 }
 0x22f   : > { %8256 = vst [vmem:[#allocation72_spill] sm:$0xff] %v5620_v23  ;;  %v5622_v49 = vpop.permute.xlu1 %1261  ;;  %v624_v23 = vld [vmem:[#allocation2 + $0x1a0] sm:$0xff] }
 0x230   : > { %8257 = vst [vmem:[#allocation76_spill] sm:$0xff] %v5622_v49  ;;  %v5624_v14 = vpop.permute.xlu0 %1265  ;;  %v625_v49 = vld [vmem:[#allocation2 + $0x31] sm:$0xff] }
 0x234   : > { %1417 = vrot.lane.b32.xlu2 %v5252_v24, %s4569_s12 }
 0x235   : > { %1415 = vrot.lane.b32.xlu1 %v5238_v32, %s4569_s12 }
 0x236   : > { %1419 = vrot.lane.b32.xlu0 %v8258_v22, %s4569_s12  ;;  %v5632_v58 = vpop.permute.xlu2 %1287 }
 0x237   : > { %8259 = vst [vmem:[#allocation80_spill] sm:$0xff] %v5632_v58  ;;  %v5634_v51 = vpop.permute.xlu1 %1267  ;;  %v627_v58 = vld [vmem:[#allocation2 + $0x49] sm:$0xff] }
 0x238   : > { %v5636_v27 = vpop.permute.xlu0 %1271 }
 0x239   : > { %8260 = vst [vmem:[#allocation120_spill] sm:$0xff] %v5636_v27  ;;  %v649_v27 = vld [vmem:[#allocation2 + $0x151] sm:$0xff] }
 0x23c   : > { %1423 = vrot.lane.b32.xlu2 %v624_v23, %s4569_s12 }
 0x23d   : > { %1421 = vrot.lane.b32.xlu1 %v623_v53, %s4569_s12 }
 0x23e   : > { %1489 = vrot.lane.b32.xlu0 %v625_v49, %s4570_s13  ;;  %v5641_v32 = vpop.permute.xlu2 %1293 }
 0x23f   : > { %8261 = vst [vmem:[#allocation121_spill] sm:$0xff] %v5641_v32  ;;  %v5643_v24 = vpop.permute.xlu1 %1273  ;;  %v630_v32 = vld [vmem:[#allocation2 + $0x69] sm:$0xff] }
 0x240   : > { %8262 = vst [vmem:[#allocation122_spill] sm:$0xff] %v5643_v24  ;;  %v5645_v22 = vpop.permute.xlu0 %1277  ;;  %v635_v24 = vld [vmem:[#allocation2 + $0xa9] sm:$0xff] }
 0x241   : > { %8263 = vst [vmem:[#allocation123_spill] sm:$0xff] %v5645_v22  ;;  %v633_v22 = vld [vmem:[#allocation2 + $0x91] sm:$0xff] }
 0x244   : > { %1493 = vrot.lane.b32.xlu2 %v627_v58, %s4570_s13 }
 0x245   : > { %1491 = vrot.lane.b32.xlu1 %v626_v52, %s4570_s13 }
 0x246   : > { %1495 = vrot.lane.b32.xlu0 %v628_v3, %s4570_s13  ;;  %v5650_v23 = vpop.permute.xlu2 %1363 }
 0x247   : > { %v5652_v53 = vpop.permute.xlu1 %1279 }
 0x248   : > { %8264 = vst [vmem:[#allocation124_spill] sm:$0xff] %v5652_v53  ;;  %v5654_v49 = vpop.permute.xlu0 %1283  ;;  %v634_v53 = vld [vmem:[#allocation2 + $0x99] sm:$0xff] }
 0x249   : > { %8265 = vst [vmem:[#allocation125_spill] sm:$0xff] %v5654_v49  ;;  %v636_v49 = vld [vmem:[#allocation2 + $0xb1] sm:$0xff] }
 0x24c   : > { %1499 = vrot.lane.b32.xlu2 %v630_v32, %s4570_s13 }
 0x24d   : > { %1497 = vrot.lane.b32.xlu1 %v629_v18, %s4570_s13 }
 0x24e   : > { %1501 = vrot.lane.b32.xlu0 %v631_v63, %s4570_s13  ;;  %v5659_v58 = vpop.permute.xlu2 %1369 }
 0x24f   : > { %v5661_v52 = vpop.permute.xlu1 %1285 }
 0x250   : > { %8266 = vst [vmem:[#allocation126_spill] sm:$0xff] %v5661_v52  ;;  %v5663_v3 = vpop.permute.xlu0 %1289  ;;  %v637_v52 = vld [vmem:[#allocation2 + $0xc1] sm:$0xff] }
 0x251   : > { %8267 = vst [vmem:[#allocation127_spill] sm:$0xff] %v5663_v3  ;;  %v639_v3 = vld [vmem:[#allocation2 + $0xd9] sm:$0xff] }
 0x254   : > { %1505 = vrot.lane.b32.xlu2 %v633_v22, %s4570_s13 }
 0x255   : > { %1503 = vrot.lane.b32.xlu1 %v632_v50, %s4570_s13 }
 0x256   : > { %1507 = vrot.lane.b32.xlu0 %v634_v53, %s4570_s13  ;;  %v5668_v32 = vpop.permute.xlu2 %1375 }
 0x257   : > { %v5670_v18 = vpop.permute.xlu1 %1291 }
 0x258   : > { %8268 = vst [vmem:[#allocation128_spill] sm:$0xff] %v5670_v18  ;;  %v5672_v63 = vpop.permute.xlu0 %1295  ;;  %v640_v18 = vld [vmem:[#allocation2 + $0xe1] sm:$0xff] }
 0x259   : > { %8269 = vst [vmem:[#allocation129_spill] sm:$0xff] %v5672_v63  ;;  %v642_v63 = vld [vmem:[#allocation2 + $0xf9] sm:$0xff] }
 0x25c   : > { %1511 = vrot.lane.b32.xlu2 %v636_v49, %s4570_s13 }
 0x25d   : > { %1509 = vrot.lane.b32.xlu1 %v635_v24, %s4570_s13 }
 0x25e   : > { %1513 = vrot.lane.b32.xlu0 %v637_v52, %s4570_s13  ;;  %v5677_v22 = vpop.permute.xlu2 %1381 }
 0x25f   : > { %8270 = vst [vmem:[#allocation130_spill] sm:$0xff] %v5677_v22  ;;  %v5679_v50 = vpop.permute.xlu1 %1361  ;;  %v641_v22 = vld [vmem:[#allocation2 + $0xf1] sm:$0xff] }
 0x260   : > { %v5681_v53 = vpop.permute.xlu0 %1365 }
 0x264   : > { %1517 = vrot.lane.b32.xlu2 %v639_v3, %s4570_s13 }
 0x265   : > { %1515 = vrot.lane.b32.xlu1 %v638_v35, %s4570_s13 }
 0x266   : > { %1519 = vrot.lane.b32.xlu0 %v640_v18, %s4570_s13  ;;  %v5686_v49 = vpop.permute.xlu2 %1387 }
 0x267   : > { %8271 = vst [vmem:[#allocation131_spill] sm:$0xff] %v5686_v49  ;;  %v5688_v24 = vpop.permute.xlu1 %1367  ;;  %v645_v49 = vld [vmem:[#allocation2 + $0x121] sm:$0xff] }
 0x268   : > { %v5690_v52 = vpop.permute.xlu0 %1371 }
 0x26c   : > { %1523 = vrot.lane.b32.xlu2 %v642_v63, %s4570_s13 }
 0x26d   : > { %1521 = vrot.lane.b32.xlu1 %v641_v22, %s4570_s13 }
 0x26e   : > { %1525 = vrot.lane.b32.xlu0 %v643_v39, %s4570_s13  ;;  %v5695_v3 = vpop.permute.xlu2 %1393 }
 0x26f   : > { %v5697_v35 = vpop.permute.xlu1 %1373 }
 0x270   : > { %v5699_v18 = vpop.permute.xlu0 %1377 }
 0x271   : > { %8272 = vst [vmem:[#allocation132_spill] sm:$0xff] %v5699_v18  ;;  %v679_v18 = vld [vmem:[#allocation2 + $0x13a] sm:$0xff] }
 0x274   : > { %1529 = vrot.lane.b32.xlu2 %v645_v49, %s4570_s13 }
 0x275   : > { %1527 = vrot.lane.b32.xlu1 %v644_v62, %s4570_s13 }
 0x276   : > { %1531 = vrot.lane.b32.xlu0 %v646_v60, %s4570_s13  ;;  %v5704_v63 = vpop.permute.xlu2 %1399 }
 0x277   : > { %8273 = vst [vmem:[#allocation133_spill] sm:$0xff] %v5704_v63  ;;  %v5706_v22 = vpop.permute.xlu1 %1379  ;;  %v651_v63 = vld [vmem:[#allocation2 + $0x169] sm:$0xff] }
 0x278   : > { %8274 = vst [vmem:[#allocation134_spill] sm:$0xff] %v5706_v22  ;;  %v5708_v39 = vpop.permute.xlu0 %1383  ;;  %v652_v22 = vld [vmem:[#allocation2 + $0x171] sm:$0xff] }
 0x279   : > { %8275 = vst [vmem:[#allocation135_spill] sm:$0xff] %v5708_v39  ;;  %v661_v39 = vld [vmem:[#allocation2 + $0x62] sm:$0xff] }
 0x27c   : > { %1535 = vrot.lane.b32.xlu2 %v648_v28, %s4570_s13 }
 0x27d   : > { %1533 = vrot.lane.b32.xlu1 %v647_v45, %s4570_s13 }
 0x27e   : > { %1537 = vrot.lane.b32.xlu0 %v649_v27, %s4570_s13  ;;  %v5713_v49 = vpop.permute.xlu2 %1405 }
 0x27f   : > { %8276 = vst [vmem:[#allocation136_spill] sm:$0xff] %v5713_v49  ;;  %v5715_v62 = vpop.permute.xlu1 %1385  ;;  %v655_v49 = vld [vmem:[#allocation2 + $0x199] sm:$0xff] }
 0x280   : > { %8277 = vst [vmem:[#allocation137_spill] sm:$0xff] %v5715_v62  ;;  %v5717_v60 = vpop.permute.xlu0 %1389  ;;  %v659_v62 = vld [vmem:[#allocation2 + $0x4a] sm:$0xff] }
 0x281   : > { %8278 = vst [vmem:[#allocation138_spill] sm:$0xff] %v5717_v60  ;;  %v656_v60 = vld [vmem:[#allocation2 + $0x1a1] sm:$0xff] }
 0x284   : > { %1541 = vrot.lane.b32.xlu2 %v651_v63, %s4570_s13 }
 0x285   : > { %1539 = vrot.lane.b32.xlu1 %v650_v55, %s4570_s13 }
 0x286   : > { %1543 = vrot.lane.b32.xlu0 %v652_v22, %s4570_s13  ;;  %v5722_v28 = vpop.permute.xlu2 %1411 }
 0x287   : > { %8279 = vst [vmem:[#allocation139_spill] sm:$0xff] %v5722_v28  ;;  %v5724_v45 = vpop.permute.xlu1 %1391  ;;  %v657_v28 = vld [vmem:[#allocation2 + $0x32] sm:$0xff] }
 0x288   : > { %8280 = vst [vmem:[#allocation140_spill] sm:$0xff] %v5724_v45  ;;  %v5726_v27 = vpop.permute.xlu0 %1395  ;;  %v658_v45 = vld [vmem:[#allocation2 + $0x3a] sm:$0xff] }
 0x28c   : > { %1547 = vrot.lane.b32.xlu2 %v5388_v26, %s4570_s13 }
 0x28d   : > { %1545 = vrot.lane.b32.xlu1 %v5374_v57, %s4570_s13 }
 0x28e   : > { %1549 = vrot.lane.b32.xlu0 %v655_v49, %s4570_s13  ;;  %v5733_v63 = vpop.permute.xlu2 %1417 }
 0x28f   : > { %8281 = vst [vmem:[#allocation141_spill] sm:$0xff] %v5733_v63  ;;  %v5735_v55 = vpop.permute.xlu1 %1397  ;;  %v660_v63 = vld [vmem:[#allocation2 + $0x52] sm:$0xff] }
 0x290   : > { %8282 = vst [vmem:[#allocation142_spill] sm:$0xff] %v5735_v55  ;;  %v5737_v22 = vpop.permute.xlu0 %1401  ;;  %v677_v55 = vld [vmem:[#allocation2 + $0x122] sm:$0xff] }
 0x291   : > { %8283 = vst [vmem:[#allocation143_spill] sm:$0xff] %v5737_v22  ;;  %v662_v22 = vld [vmem:[#allocation2 + $0x6a] sm:$0xff] }
 0x294   : > { %1617 = vrot.lane.b32.xlu2 %v657_v28, %s4571_s14 }
 0x295   : > { %1551 = vrot.lane.b32.xlu1 %v656_v60, %s4570_s13 }
 0x296   : > { %1619 = vrot.lane.b32.xlu0 %v658_v45, %s4571_s14  ;;  %v5742_v26 = vpop.permute.xlu2 %1423 }
 0x297   : > { %8284 = vst [vmem:[#allocation144_spill] sm:$0xff] %v5742_v26  ;;  %v5744_v57 = vpop.permute.xlu1 %1403  ;;  %v663_v26 = vld [vmem:[#allocation2 + $0x7a] sm:$0xff] }
 0x298   : > { %8285 = vst [vmem:[#allocation145_spill] sm:$0xff] %v5744_v57  ;;  %v5746_v49 = vpop.permute.xlu0 %1407  ;;  %v664_v57 = vld [vmem:[#allocation2 + $0x82] sm:$0xff] }
 0x299   : > { %8286 = vst [vmem:[#allocation146_spill] sm:$0xff] %v5746_v49  ;;  %v666_v49 = vld [vmem:[#allocation2 + $0x9a] sm:$0xff] }
 0x29c   : > { %1623 = vrot.lane.b32.xlu2 %v660_v63, %s4571_s14 }
 0x29d   : > { %1621 = vrot.lane.b32.xlu1 %v659_v62, %s4571_s14 }
 0x29e   : > { %1625 = vrot.lane.b32.xlu0 %v661_v39, %s4571_s14  ;;  %v5751_v28 = vpop.permute.xlu2 %1493 }
 0x29f   : > { %v5753_v60 = vpop.permute.xlu1 %1409 }
 0x2a0   : > { %8287 = vst [vmem:[#allocation147_spill] sm:$0xff] %v5753_v60  ;;  %v5755_v45 = vpop.permute.xlu0 %1413  ;;  %v667_v60 = vld [vmem:[#allocation2 + $0xaa] sm:$0xff] }
 0x2a1   : > { %8288 = vst [vmem:[#allocation148_spill] sm:$0xff] %v5755_v45  ;;  %v669_v45 = vld [vmem:[#allocation2 + $0xc2] sm:$0xff] }
 0x2a4   : > { %1629 = vrot.lane.b32.xlu2 %v663_v26, %s4571_s14 }
 0x2a5   : > { %1627 = vrot.lane.b32.xlu1 %v662_v22, %s4571_s14 }
 0x2a6   : > { %1631 = vrot.lane.b32.xlu0 %v664_v57, %s4571_s14  ;;  %v5760_v63 = vpop.permute.xlu2 %1499 }
 0x2a7   : > { %v5762_v62 = vpop.permute.xlu1 %1415 }
 0x2a8   : > { %8289 = vst [vmem:[#allocation149_spill] sm:$0xff] %v5762_v62  ;;  %v5764_v39 = vpop.permute.xlu0 %1419  ;;  %v670_v62 = vld [vmem:[#allocation2 + $0xca] sm:$0xff] }
 0x2a9   : > { %8290 = vst [vmem:[#allocation150_spill] sm:$0xff] %v5764_v39  ;;  %v672_v39 = vld [vmem:[#allocation2 + $0xe2] sm:$0xff] }
 0x2ac   : > { %1635 = vrot.lane.b32.xlu2 %v666_v49, %s4571_s14 }
 0x2ad   : > { %1633 = vrot.lane.b32.xlu1 %v665_v10, %s4571_s14 }
 0x2ae   : > { %1637 = vrot.lane.b32.xlu0 %v667_v60, %s4571_s14  ;;  %v5769_v26 = vpop.permute.xlu2 %1505 }
 0x2af   : > { %8291 = vst [vmem:[#allocation151_spill] sm:$0xff] %v5769_v26  ;;  %v5771_v22 = vpop.permute.xlu1 %1421  ;;  %v676_v26 = vld [vmem:[#allocation2 + $0x112] sm:$0xff] }
 0x2b0   : > { %8292 = vst [vmem:[#allocation152_spill] sm:$0xff] %v5771_v22  ;;  %v5773_v57 = vpop.permute.xlu0 %1489  ;;  %v673_v22 = vld [vmem:[#allocation2 + $0xf2] sm:$0xff] }
 0x2b4   : > { %1641 = vrot.lane.b32.xlu2 %v669_v45, %s4571_s14 }
 0x2b5   : > { %1639 = vrot.lane.b32.xlu1 %v668_v37, %s4571_s14 }
 0x2b6   : > { %1643 = vrot.lane.b32.xlu0 %v670_v62, %s4571_s14  ;;  %v5778_v49 = vpop.permute.xlu2 %1511 }
 0x2b7   : > { %8293 = vst [vmem:[#allocation153_spill] sm:$0xff] %v5778_v49  ;;  %v5780_v10 = vpop.permute.xlu1 %1491  ;;  %v675_v49 = vld [vmem:[#allocation2 + $0x10a] sm:$0xff] }
 0x2b8   : > { %v5782_v60 = vpop.permute.xlu0 %1495 }
 0x2bc   : > { %1647 = vrot.lane.b32.xlu2 %v672_v39, %s4571_s14 }
 0x2bd   : > { %1645 = vrot.lane.b32.xlu1 %v671_v48, %s4571_s14 }
 0x2be   : > { %1649 = vrot.lane.b32.xlu0 %v673_v22, %s4571_s14  ;;  %v5787_v45 = vpop.permute.xlu2 %1517  ;;  %v1980_v22 = vld [vmem:[%s8041_s1 + $0x20] sm:$0xf] }
 0x2bf   : > { %8294 = vst [vmem:[#allocation154_spill] sm:$0xff] %v5787_v45  ;;  %v5789_v37 = vpop.permute.xlu1 %1497  ;;  %4412 = vmatpush.msk.msra.mxu0 %vm2082_vm2, %v1980_v22  ;;  %4482 = vmatpush.msk.msra.mxu2 %vm2082_vm2, %v1980_v22 }
 0x2c0   : > { %v5791_v62 = vpop.permute.xlu0 %1501 }
 0x2c4   : > { %1653 = vrot.lane.b32.xlu2 %v675_v49, %s4571_s14  ;;  %v678_v49 = vld [vmem:[#allocation2 + $0x12a] sm:$0xff] }
 0x2c5   : > { %1651 = vrot.lane.b32.xlu1 %v674_v47, %s4571_s14  ;;  %v1979_v47 = vld [vmem:[%s8041_s1 + $0x18] sm:$0xff] }
 0x2c6   : > { %1655 = vrot.lane.b32.xlu0 %v676_v26, %s4571_s14  ;;  %v5796_v39 = vpop.permute.xlu2 %1523  ;;  %v1978_v26 = vld [vmem:[%s8041_s1 + $0x10] sm:$0xff]  ;;  %2098 = vmatpush.msra.mxu0 %v1979_v47 }
 0x2c7   : > { %v5798_v48 = vpop.permute.xlu1 %1503  ;;  %4483 = vmatpush.msra.mxu2 %v1979_v47  ;;  %v1976_v47 = vld [vmem:[%s8041_s1] sm:$0xff] }
 0x2c8   : > { %v5803_v45 = vpop.permute.xlu0 %1507  ;;  %2099 = vmatpush.msra.mxu0 %v1978_v26 }
 0x2c9   : > { %8295 = vst [vmem:[#allocation155_spill] sm:$0xff] %v5803_v45  ;;  %v1977_v45 = vld [vmem:[%s8041_s1 + $0x8] sm:$0xff]  ;;  %4484 = vmatpush.msra.mxu2 %v1978_v26 }
 0x2ca   : > { %2100 = vmatpush.msra.mxu0 %v1977_v45 }
 0x2cb   : > { %4485 = vmatpush.msra.mxu2 %v1977_v45  ;;  %v684_v45 = vld [vmem:[#allocation2 + $0x172] sm:$0xff] }
 0x2cc   : > { %1659 = vrot.lane.b32.xlu2 %v678_v49, %s4571_s14  ;;  %2101 = vmatpush.msra.mxu0 %v1976_v47  ;;  %v681_v49 = vld [vmem:[#allocation2 + $0x152] sm:$0xff] }
 0x2cd   : > { %1657 = vrot.lane.b32.xlu1 %v677_v55, %s4571_s14  ;;  %4486 = vmatpush.msra.mxu2 %v1976_v47  ;;  %v682_v55 = vld [vmem:[#allocation2 + $0x15a] sm:$0xff] }
 0x2ce   : > { %1661 = vrot.lane.b32.xlu0 %v679_v18, %s4571_s14  ;;  %v5819_v22 = vpop.permute.xlu2 %1529 }
 0x2cf   : > { %8296 = vst [vmem:[#allocation156_spill] sm:$0xff] %v5819_v22  ;;  %v5821_v43 = vpop.permute.xlu1 %1509  ;;  %v683_v22 = vld [vmem:[#allocation2 + $0x16a] sm:$0xff] }
 0x2d0   : > { %8297 = vst [vmem:[#allocation157_spill] sm:$0xff] %v5821_v43  ;;  %v5826_v6 = vpop.permute.xlu0 %1513 }
 0x2d1   : > { %8298 = vst [vmem:[#allocation158_spill] sm:$0xff] %v5826_v6  ;;  %v8306_v6 = vld [vmem:[#allocation34_spill] sm:$0xff] }
 0x2d4   : > { %1665 = vrot.lane.b32.xlu2 %v681_v49, %s4571_s14 }
 0x2d5   : > { %1663 = vrot.lane.b32.xlu1 %v680_v44, %s4571_s14 }
 0x2d6   : > { %1667 = vrot.lane.b32.xlu0 %v682_v55, %s4571_s14  ;;  %v5831_v18 = vpop.permute.xlu2 %1535  ;;  %v687_v55 = vld [vmem:[#allocation2 + $0x19a] sm:$0xff] }
 0x2d7   : > { %8299 = vst [vmem:[#allocation159_spill] sm:$0xff] %v5831_v18  ;;  %v5833_v26 = vpop.permute.xlu1 %1515  ;;  %v688_v18 = vld [vmem:[#allocation2 + $0x1a2] sm:$0xff] }
 0x2d8   : > { %8300 = vst [vmem:[#allocation160_spill] sm:$0xff] %v5833_v26  ;;  %v5835_v43 = vpop.permute.xlu0 %1519 }
 0x2d9   : > { %8301 = vst [vmem:[#allocation161_spill] sm:$0xff] %v5835_v43  ;;  %v400_v43 = vld [vmem:[#allocation2] sm:$0xff] }
 0x2dc   : > { %1671 = vrot.lane.b32.xlu2 %v684_v45, %s4571_s14  ;;  %v8305_v45 = vld [vmem:[#allocation5_spill] sm:$0xff] }
 0x2dd   : > { %1669 = vrot.lane.b32.xlu1 %v683_v22, %s4571_s14 }
 0x2de   : > { %1673 = vrot.lane.b32.xlu0 %v5510_v1, %s4571_s14  ;;  %v5841_v47 = vpop.permute.xlu2 %1541 }
 0x2df   : > { %8302 = vst [vmem:[#allocation162_spill] sm:$0xff] %v5841_v47  ;;  %v5843_v44 = vpop.permute.xlu1 %1521  ;;  %v1713_v47 = vsel %vm279_vm0, %v400_v43, %v8305_v45 }
 0x2e0   : > { %v5845_v49 = vpop.permute.xlu0 %1525 }
 0x2e1   : > { %8303 = vst [vmem:[#allocation163_spill] sm:$0xff] %v5845_v49  ;;  %v1746_v49 = vsel %vm1745_vm3, %v1713_v47, %v8306_v6 }
 0x2e4   : > { %1677 = vrot.lane.b32.xlu2 %v687_v55, %s4571_s14 }
 0x2e5   : > { %1675 = vrot.lane.b32.xlu1 %v5512_v5, %s4571_s14  ;;  %v1779_v5 = vsel %vm1778_vm4, %v1746_v49, %v5310_v30 }
 0x2e6   : > { %1679 = vrot.lane.b32.xlu0 %v688_v18, %s4571_s14  ;;  %v5851_v22 = vpop.permute.xlu2 %1547  ;;  %v1812_v18 = vsel %vm1811_vm6, %v1779_v5, %v5436_v11  ;;  %v401_v5 = vld [vmem:[#allocation2 + $0x8] sm:$0xff] }
 0x2e7   : > { %8304 = vst [vmem:[#allocation164_spill] sm:$0xff] %v5851_v22  ;;  %v5853_v1 = vpop.permute.xlu1 %1527  ;;  %v1845_v55 = vsel %vm1844_vm5, %v1812_v18, %v5530_v7 }
 0x2e8   : > { %v5857_v26 = vpop.permute.xlu0 %1531  ;;  %v1878_v43 = vsel %vm1877_vm7, %v1845_v55, %v5679_v50  ;;  %v8310_v55 = vld [vmem:[#allocation9_spill] sm:$0xff] }
 0x2e9   : > { %v1911_v6 = vsel %vm1910_vm9, %v1878_v43, %v5773_v57  ;;  %v1714_v57 = vsel %vm279_vm0, %v401_v5, %v8310_v55  ;;  %v8311_v43 = vld [vmem:[#allocation51_spill] sm:$0xff] }
 0x2ea   : > { %v1747_v22 = vsel %vm1745_vm3, %v1714_v57, %v8311_v43  ;;  %v4513_v43 = vld [vmem:[#allocation2 + $0x18] sm:$0xff] }
 0x2ee   : > { %v1618_v47 = vpop.permute.xlu2 %1617 }
 0x2ef   : > { %v5871_v45 = vpop.permute.xlu1 %1533  ;;  %v1944_v30 = vsel %vm1943_vm8, %v1911_v6, %v1618_v47  ;;  %v1780_v6 = vsel %vm1778_vm4, %v1747_v22, %v5272_v31 }
 0x2f0   : > { %v5874_v49 = vpop.permute.xlu0 %1537  ;;  %4413 = vmatmul.msk.f32.vlgmr.msra.gmra.mxu0 %vm1985_vm10, %v1944_v30  ;;  %v1813_v47 = vsel %vm1811_vm6, %v1780_v6, %v5446_v13  ;;  %v8313_v13 = vld [vmem:[#allocation54_spill] sm:$0xff] }
 0x2f1   : > { %v1846_v30 = vsel %vm1844_vm5, %v1813_v47, %v5567_v17 }
 0x2f6   : > { %v1624_v22 = vpop.permute.xlu2 %1623 }
 0x2f7   : > { %v5877_v11 = vpop.permute.xlu1 %1539 }
 0x2f8   : > { %v5879_v7 = vpop.permute.xlu0 %1543 }
 0x2f9   : > { %8307 = vst [vmem:[#allocation5_spill] sm:$0xff] %v5879_v7 }
 0x2ff   : > { %v5881_v50 = vpop.permute.xlu1 %1545 }
 0x300   : > { %8308 = vst [vmem:[#allocation34_spill] sm:$0xff] %v5881_v50  ;;  %v5883_v18 = vpop.permute.xlu0 %1549  ;;  %v1879_v50 = vsel %vm1877_vm7, %v1846_v30, %v5650_v23 }
 0x301   : > { %8309 = vst [vmem:[#allocation165_spill] sm:$0xff] %v5883_v18  ;;  %v1912_v5 = vsel %vm1910_vm9, %v1879_v50, %v5780_v10  ;;  %v8312_v18 = vld [vmem:[#allocation7_spill] sm:$0xff] }
 0x302   : > { %v1715_v31 = vsel %vm279_vm0, %v4513_v43, %v8312_v18 }
 0x303   : > { %v1748_v17 = vsel %vm1745_vm3, %v1715_v31, %v8313_v13  ;;  %v1630_v31 = vpop.permute.xlu2 %1629 }
 0x304   : > { %v1781_v23 = vsel %vm1778_vm4, %v1748_v17, %v5312_v34 }
 0x305   : > { %v1814_v6 = vsel %vm1811_vm6, %v1781_v23, %v5408_v2  ;;  %v8315_v2 = vld [vmem:[#allocation39_spill] sm:$0xff] }
 0x306   : > { %v1847_v10 = vsel %vm1844_vm5, %v1814_v6, %v5576_v54 }
 0x307   : > { %v5897_v7 = vpop.permute.xlu1 %1551  ;;  %v1880_v50 = vsel %vm1877_vm7, %v1847_v10, %v5681_v53 }
 0x308   : > { %v1620_v55 = vpop.permute.xlu0 %1619  ;;  %v1913_v18 = vsel %vm1910_vm9, %v1880_v50, %v5751_v28  ;;  %v4515_v50 = vld [vmem:[#allocation2 + $0x30] sm:$0xff] }
 0x309   : > { %v1945_v57 = vsel %vm1943_vm8, %v1912_v5, %v1620_v55  ;;  %v4514_v55 = vld [vmem:[#allocation2 + $0x20] sm:$0xff] }
 0x30a   : > { %4414 = vmatmul.msk.f32.gmra.mxu0 %vm1985_vm10, %v1945_v57  ;;  %v8314_v57 = vld [vmem:[#allocation11_spill] sm:$0xff] }
 0x30b   : > { %v1716_v34 = vsel %vm279_vm0, %v4514_v55, %v8314_v57  ;;  %v5953_v57 = vpop.permute.xlu2 %1635 }
 0x30c   : > { %v1749_v43 = vsel %vm1745_vm3, %v1716_v34, %v8315_v2  ;;  %v4516_v2 = vld [vmem:[#allocation2 + $0x38] sm:$0xff] }
 0x30d   : > { %v1782_v54 = vsel %vm1778_vm4, %v1749_v43, %v5322_v36  ;;  %v8316_v36 = vld [vmem:[#allocation3_spill] sm:$0xff]  ;;  %v8318_v43 = vld [vmem:[#allocation4_spill] sm:$0xff] }
 0x30e   : > { %v1815_v53 = vsel %vm1811_vm6, %v1782_v54, %v5448_v16  ;;  %v8317_v16 = vld [vmem:[#allocation55_spill] sm:$0xff] }
 0x30f   : > { %v1622_v47 = vpop.permute.xlu1 %1621  ;;  %v1848_v28 = vsel %vm1844_vm5, %v1815_v53, %v5541_v15 }
 0x310   : > { %v1626_v30 = vpop.permute.xlu0 %1625  ;;  %v1946_v5 = vsel %vm1943_vm8, %v1913_v18, %v1622_v47  ;;  %v1881_v13 = vsel %vm1877_vm7, %v1848_v28, %v5688_v24  ;;  %v1717_v47 = vsel %vm279_vm0, %v4515_v50, %v8316_v36  ;;  %v4517_v50 = vld [vmem:[#allocation2 + $0x48] sm:$0xff] }
 0x311   : > { %v1914_v23 = vsel %vm1910_vm9, %v1881_v13, %v5782_v60  ;;  %v1750_v15 = vsel %vm1745_vm3, %v1717_v47, %v8317_v16  ;;  %v8321_v47 = vld [vmem:[#allocation26_spill] sm:$0xff] }
 0x312   : > { %4415 = vmatmul.msk.f32.gmra.mxu0 %vm1985_vm10, %v1946_v5  ;;  %v1947_v10 = vsel %vm1943_vm8, %v1914_v23, %v1624_v22  ;;  %v1783_v24 = vsel %vm1778_vm4, %v1750_v15, %v5284_v4 }
 0x313   : > { %v1816_v18 = vsel %vm1811_vm6, %v1783_v24, %v5458_v20  ;;  %v1718_v20 = vsel %vm279_vm0, %v4516_v2, %v8318_v43  ;;  %v5982_v16 = vpop.permute.xlu2 %1641 }
 0x314   : > { %v1849_v60 = vsel %vm1844_vm5, %v1816_v18, %v5578_v0  ;;  %v8319_v0 = vld [vmem:[#allocation58_spill] sm:$0xff] }
 0x315   : > { %v1882_v22 = vsel %vm1877_vm7, %v1849_v60, %v5659_v58  ;;  %v1751_v58 = vsel %vm1745_vm3, %v1718_v20, %v8319_v0  ;;  %v8324_v0 = vld [vmem:[#allocation13_spill] sm:$0xff] }
 0x316   : > { %v1915_v55 = vsel %vm1910_vm9, %v1882_v22, %v5789_v37  ;;  %v1784_v54 = vsel %vm1778_vm4, %v1751_v58, %v5324_v40  ;;  %v8320_v40 = vld [vmem:[#allocation12_spill] sm:$0xff]  ;;  %v4520_v58 = vld [vmem:[#allocation2 + $0x50] sm:$0xff] }
 0x317   : > { %v1628_v17 = vpop.permute.xlu1 %1627  ;;  %v1948_v4 = vsel %vm1943_vm8, %v1915_v55, %v1626_v30  ;;  %v1817_v37 = vsel %vm1811_vm6, %v1784_v54, %v5420_v8  ;;  %v1719_v36 = vsel %vm279_vm0, %v4517_v50, %v8320_v40  ;;  %v4518_v8 = vld [vmem:[#allocation2 + $0xc0] sm:$0xff]  ;;  %v8325_v54 = vld [vmem:[#allocation14_spill] sm:$0xff] }
 0x318   : > { %v5933_v6 = vpop.permute.xlu0 %1631  ;;  %v1850_v53 = vsel %vm1844_vm5, %v1817_v37, %v5587_v33  ;;  %v1729_v33 = vsel %vm279_vm0, %v4518_v8, %v8321_v47  ;;  %v8327_v37 = vld [vmem:[#allocation78_spill] sm:$0xff] }
 0x319   : > { %v1883_v30 = vsel %vm1877_vm7, %v1850_v53, %v5690_v52  ;;  %v8322_v52 = vld [vmem:[#allocation44_spill] sm:$0xff] }
 0x31a   : > { %4416 = vmatmul.msk.f32.gmra.mxu0 %vm1985_vm10, %v1947_v10  ;;  %v1916_v13 = vsel %vm1910_vm9, %v1883_v30, %v5760_v63  ;;  %v1752_v15 = vsel %vm1745_vm3, %v1719_v36, %v8322_v52  ;;  %v8323_v63 = vld [vmem:[#allocation75_spill] sm:$0xff] }
 0x31b   : > { %v1949_v10 = vsel %vm1943_vm8, %v1916_v13, %v1628_v17  ;;  %v1762_v24 = vsel %vm1745_vm3, %v1729_v33, %v8323_v63  ;;  %v1785_v18 = vsel %vm1778_vm4, %v1752_v15, %v5334_v42  ;;  %v6027_v13 = vpop.permute.xlu2 %1647  ;;  %v4521_v33 = vld [vmem:[#allocation2 + $0x60] sm:$0xff]  ;;  %v8329_v15 = vld [vmem:[#allocation27_spill] sm:$0xff] }
 0x31c   : > { %v1795_v17 = vsel %vm1778_vm4, %v1762_v24, %v5332_v41  ;;  %v1818_v60 = vsel %vm1811_vm6, %v1785_v18, %v5460_v25  ;;  %v8331_v63 = vld [vmem:[#allocation63_spill] sm:$0xff] }
 0x31d   : > { %v1828_v22 = vsel %vm1811_vm6, %v1795_v17, %v5506_v61  ;;  %v1851_v55 = vsel %vm1844_vm5, %v1818_v60, %v5552_v9  ;;  %v8332_v60 = vld [vmem:[#allocation24_spill] sm:$0xff] }
 0x31e   : > { %v1884_v41 = vsel %vm1877_vm7, %v1851_v55, %v5697_v35  ;;  %v1720_v35 = vsel %vm279_vm0, %v4520_v58, %v8325_v54  ;;  %v8333_v55 = vld [vmem:[#allocation61_spill] sm:$0xff]  ;;  %v4523_v58 = vld [vmem:[#allocation2 + $0x68] sm:$0xff]  ;;  %v8339_v54 = vld [vmem:[#allocation15_spill] sm:$0xff] }
 0x31f   : > { %v5949_v5 = vpop.permute.xlu1 %1633  ;;  %v1917_v42 = vsel %vm1910_vm9, %v1884_v41, %v5791_v62  ;;  %v8326_v62 = vld [vmem:[#allocation59_spill] sm:$0xff] }
 0x320   : > { %v5955_v34 = vpop.permute.xlu0 %1637  ;;  %v1950_v9 = vsel %vm1943_vm8, %v1917_v42, %v1630_v31 }
 0x322   : > { %4417 = vmatmul.msk.f32.gmra.mxu0 %vm1985_vm10, %v1948_v4  ;;  %v1861_v4 = vsel %vm1844_vm5, %v1828_v22, %v5624_v14  ;;  %v4519_v14 = vld [vmem:[#allocation2 + $0xc8] sm:$0xff] }
 0x323   : > { %v1894_v2 = vsel %vm1877_vm7, %v1861_v4, %v5695_v3  ;;  %v1730_v3 = vsel %vm279_vm0, %v4519_v14, %v8324_v0  ;;  %v1654_v42 = vpop.permute.xlu2 %1653 }
 0x324   : > { %v1927_v25 = vsel %vm1910_vm9, %v1894_v2, %v5843_v44  ;;  %v1753_v44 = vsel %vm1745_vm3, %v1720_v35, %v8326_v62  ;;  %v1763_v31 = vsel %vm1745_vm3, %v1730_v3, %v8327_v37  ;;  %v8334_v2 = vld [vmem:[#allocation65_spill] sm:$0xff]  ;;  %v1722_v35 = vsel %vm279_vm0, %v4523_v58, %v8339_v54 }
 0x325   : > { %v1786_v53 = vsel %vm1778_vm4, %v1753_v44, %v5296_v19  ;;  %v1796_v30 = vsel %vm1778_vm4, %v1763_v31, %v5372_v56  ;;  %v4524_v62 = vld [vmem:[#allocation2 + $0xe0] sm:$0xff]  ;;  %v8340_v44 = vld [vmem:[#allocation32_spill] sm:$0xff] }
 0x326   : > { %v1819_v50 = vsel %vm1811_vm6, %v1786_v53, %v5470_v29  ;;  %v1732_v37 = vsel %vm279_vm0, %v4524_v62, %v8340_v44  ;;  %v8341_v31 = vld [vmem:[#allocation49_spill] sm:$0xff]  ;;  %v8363_v44 = vld [vmem:[#allocation143_spill] sm:$0xff] }
 0x327   : > { %v5971_v28 = vpop.permute.xlu1 %1639  ;;  %v1852_v40 = vsel %vm1844_vm5, %v1819_v50, %v5589_v21  ;;  %v1755_v53 = vsel %vm1745_vm3, %v1722_v35, %v8341_v31  ;;  %v8362_v35 = vld [vmem:[#allocation130_spill] sm:$0xff]  ;;  %v8364_v31 = vld [vmem:[#allocation156_spill] sm:$0xff] }
 0x328   : > { %v5975_v23 = vpop.permute.xlu0 %1643  ;;  %v1885_v19 = vsel %vm1877_vm7, %v1852_v40, %v5668_v32  ;;  %v4522_v32 = vld [vmem:[#allocation2 + $0xd8] sm:$0xff]  ;;  %v8344_v40 = vld [vmem:[#allocation93_spill] sm:$0xff] }
 0x32a   : > { %4418 = vmatmul.msk.f32.gmra.mxu0 %vm1985_vm10, %v1949_v10  ;;  %v1829_v10 = vsel %vm1811_vm6, %v1796_v30, %v5468_v38  ;;  %v1918_v38 = vsel %vm1910_vm9, %v1885_v19, %v5798_v48  ;;  %v8342_v30 = vld [vmem:[#allocation79_spill] sm:$0xff]  ;;  %v8345_v19 = vld [vmem:[#allocation112_spill] sm:$0xff] }
 0x32b   : > { %v1862_v36 = vsel %vm1844_vm5, %v1829_v10, %v5634_v51  ;;  %v1951_v29 = vsel %vm1943_vm8, %v1918_v38, %v5933_v6  ;;  %v8328_v51 = vld [vmem:[#allocation6_spill] sm:$0xff]  ;;  %v8343_v10 = vld [vmem:[#allocation92_spill] sm:$0xff] }
 0x32c   : > { %v1895_v56 = vsel %vm1877_vm7, %v1862_v36, %v5726_v27  ;;  %v1721_v52 = vsel %vm279_vm0, %v4521_v33, %v8328_v51  ;;  %v1731_v27 = vsel %vm279_vm0, %v4522_v32, %v8329_v15  ;;  %v1788_v36 = vsel %vm1778_vm4, %v1755_v53, %v8344_v40  ;;  %v8347_v38 = vld [vmem:[#allocation48_spill] sm:$0xff]  ;;  %v8350_v15 = vld [vmem:[#allocation134_spill] sm:$0xff]  ;;  %v4527_v40 = vld [vmem:[#allocation2 + $0x80] sm:$0xff] }
 0x32d   : > { %v1928_v47 = vsel %vm1910_vm9, %v1895_v56, %v5796_v39  ;;  %v8330_v39 = vld [vmem:[#allocation62_spill] sm:$0xff]  ;;  %v1754_v6 = vsel %vm1745_vm3, %v1721_v52, %v8331_v63  ;;  %v1821_v56 = vsel %vm1811_vm6, %v1788_v36, %v8345_v19  ;;  %v8349_v52 = vld [vmem:[#allocation133_spill] sm:$0xff]  ;;  %v8366_v36 = vld [vmem:[#allocation8_spill] sm:$0xff] }
 0x32e   : > { %v1764_v48 = vsel %vm1745_vm3, %v1731_v27, %v8330_v39  ;;  %v1787_v24 = vsel %vm1778_vm4, %v1754_v6, %v5336_v46  ;;  %v8336_v46 = vld [vmem:[#allocation142_spill] sm:$0xff]  ;;  %v8351_v39 = vld [vmem:[#allocation155_spill] sm:$0xff]  ;;  %v1724_v19 = vsel %vm279_vm0, %v4527_v40, %v8366_v36  ;;  %v8390_v36 = vld [vmem:[#allocation137_spill] sm:$0xff] }
 0x32f   : > { %v6005_v43 = vpop.permute.xlu1 %1645  ;;  %v1797_v17 = vsel %vm1778_vm4, %v1764_v48, %v5384_v59  ;;  %v1820_v18 = vsel %vm1811_vm6, %v1787_v24, %v5432_v12  ;;  %v8337_v59 = vld [vmem:[#allocation151_spill] sm:$0xff] }
 0x330   : > { %v1650_v61 = vpop.permute.xlu0 %1649  ;;  %v1830_v22 = vsel %vm1811_vm6, %v1797_v17, %v8332_v60  ;;  %v1853_v41 = vsel %vm1844_vm5, %v1820_v18, %v8334_v2  ;;  %v8338_v12 = vld [vmem:[#allocation163_spill] sm:$0xff]  ;;  %v8352_v18 = vld [vmem:[#allocation16_spill] sm:$0xff] }
 0x331   : > { %v1960_v20 = vsel %vm1943_vm8, %v1927_v25, %v1650_v61  ;;  %v1863_v4 = vsel %vm1844_vm5, %v1830_v22, %v8333_v55  ;;  %v8335_v25 = vld [vmem:[#allocation132_spill] sm:$0xff]  ;;  %v4525_v17 = vld [vmem:[#allocation2 + $0xf0] sm:$0xff]  ;;  %v8353_v55 = vld [vmem:[#allocation17_spill] sm:$0xff] }
 0x332   : > { %4419 = vmatmul.msk.f32.gmra.mxu0 %vm1985_vm10, %v1950_v9  ;;  %4429 = vmatmul.msk.f32.vlgmr.msra.gmra.mxu2 %vm1985_vm10, %v1960_v20  ;;  %v1886_v61 = vsel %vm1877_vm7, %v1853_v41, %v8335_v25  ;;  %v1896_v9 = vsel %vm1877_vm7, %v1863_v4, %v8336_v46  ;;  %v1733_v60 = vsel %vm279_vm0, %v4525_v17, %v8352_v18  ;;  %v4526_v22 = vld [vmem:[#allocation2 + $0x78] sm:$0xff]  ;;  %v8355_v41 = vld [vmem:[#allocation82_spill] sm:$0xff]  ;;  %v1660_v18 = vpop.permute.xlu2 %1659 }
 0x333   : > { %v1919_v20 = vsel %vm1910_vm9, %v1886_v61, %v8337_v59  ;;  %v1929_v14 = vsel %vm1910_vm9, %v1896_v9, %v8338_v12  ;;  %v1723_v4 = vsel %vm279_vm0, %v4526_v22, %v8353_v55  ;;  %v8354_v2 = vld [vmem:[#allocation64_spill] sm:$0xff]  ;;  %v8357_v61 = vld [vmem:[#allocation101_spill] sm:$0xff] }
 0x334   : > { %v1952_v0 = vsel %vm1943_vm8, %v1919_v20, %v5949_v5  ;;  %v1962_v3 = vsel %vm1943_vm8, %v1929_v14, %v1654_v42  ;;  %v1765_v5 = vsel %vm1745_vm3, %v1732_v37, %v8342_v30  ;;  %v8356_v42 = vld [vmem:[#allocation90_spill] sm:$0xff]  ;;  %v8358_v9 = vld [vmem:[#allocation113_spill] sm:$0xff]  ;;  %v8360_v14 = vld [vmem:[#allocation119_spill] sm:$0xff] }
 0x335   : > { %v1798_v50 = vsel %vm1778_vm4, %v1765_v5, %v8343_v10  ;;  %v8359_v20 = vld [vmem:[#allocation114_spill] sm:$0xff]  ;;  %v8365_v30 = vld [vmem:[#allocation157_spill] sm:$0xff] }
 0x336   : > { %v8377_v55 = vld [vmem:[#allocation145_spill] sm:$0xff] }
 0x337   : > { %v1652_v8 = vpop.permute.xlu1 %1651 }
 0x338   : > { %v1961_v21 = vsel %vm1943_vm8, %v1928_v47, %v1652_v8  ;;  %v8346_v8 = vld [vmem:[#allocation30_spill] sm:$0xff]  ;;  %v1656_v51 = vpop.permute.xlu0 %1655 }
 0x339   : > { %v1831_v47 = vsel %vm1811_vm6, %v1798_v50, %v8346_v8  ;;  %v8367_v8 = vld [vmem:[#allocation33_spill] sm:$0xff] }
 0x33a   : > { %4420 = vmatmul.msk.f32.gmra.mxu0 %vm1985_vm10, %v1951_v29  ;;  %4430 = vmatmul.msk.f32.gmra.mxu2 %vm1985_vm10, %v1961_v21  ;;  %v1854_v29 = vsel %vm1844_vm5, %v1821_v56, %v8347_v38  ;;  %v8348_v21 = vld [vmem:[#allocation120_spill] sm:$0xff]  ;;  %v8368_v38 = vld [vmem:[#allocation67_spill] sm:$0xff] }
 0x33b   : > { %v1864_v33 = vsel %vm1844_vm5, %v1831_v47, %v8348_v21  ;;  %v1887_v27 = vsel %vm1877_vm7, %v1854_v29, %v8350_v15  ;;  %v4528_v56 = vld [vmem:[#allocation2 + $0xf8] sm:$0xff]  ;;  %v8372_v15 = vld [vmem:[#allocation110_spill] sm:$0xff] }
 0x33c   : > { %v1897_v32 = vsel %vm1877_vm7, %v1864_v33, %v8349_v52  ;;  %v1920_v48 = vsel %vm1910_vm9, %v1887_v27, %v8351_v39  ;;  %v1734_v47 = vsel %vm279_vm0, %v4528_v56, %v8367_v8  ;;  %v8369_v21 = vld [vmem:[#allocation68_spill] sm:$0xff]  ;;  %v8370_v33 = vld [vmem:[#allocation94_spill] sm:$0xff]  ;;  %v8371_v52 = vld [vmem:[#allocation103_spill] sm:$0xff] }
 0x33d   : > { %v1930_v63 = vsel %vm1910_vm9, %v1897_v32, %v5853_v1  ;;  %v1953_v6 = vsel %vm1943_vm8, %v1920_v48, %v5953_v57  ;;  %v1756_v1 = vsel %vm1745_vm3, %v1723_v4, %v8354_v2  ;;  %v1766_v57 = vsel %vm1745_vm3, %v1733_v60, %v8355_v41  ;;  %v8373_v39 = vld [vmem:[#allocation117_spill] sm:$0xff]  ;;  %v8376_v60 = vld [vmem:[#allocation135_spill] sm:$0xff]  ;;  %v8391_v56 = vld [vmem:[#allocation158_spill] sm:$0xff] }
 0x33e   : > { %v1963_v24 = vsel %vm1943_vm8, %v1930_v63, %v1656_v51  ;;  %v1789_v25 = vsel %vm1778_vm4, %v1756_v1, %v8356_v42  ;;  %v1799_v46 = vsel %vm1778_vm4, %v1766_v57, %v8357_v61  ;;  %v1767_v29 = vsel %vm1745_vm3, %v1734_v47, %v8368_v38  ;;  %v8374_v63 = vld [vmem:[#allocation71_spill] sm:$0xff]  ;;  %v8378_v2 = vld [vmem:[#allocation153_spill] sm:$0xff]  ;;  %v8379_v61 = vld [vmem:[#allocation18_spill] sm:$0xff] }
 0x33f   : > { %v1832_v59 = vsel %vm1811_vm6, %v1799_v46, %v8358_v9  ;;  %v1822_v12 = vsel %vm1811_vm6, %v1789_v25, %v8359_v20  ;;  %v1658_v54 = vpop.permute.xlu1 %1657  ;;  %v1800_v32 = vsel %vm1778_vm4, %v1767_v29, %v8371_v52  ;;  %v4529_v25 = vld [vmem:[#allocation2 + $0x90] sm:$0xff]  ;;  %v4530_v9 = vld [vmem:[#allocation2 + $0x108] sm:$0xff]  ;;  %v8393_v52 = vld [vmem:[#allocation21_spill] sm:$0xff] }
 0x340   : > { %v1833_v48 = vsel %vm1811_vm6, %v1800_v32, %v8373_v39  ;;  %v1725_v46 = vsel %vm279_vm0, %v4529_v25, %v8379_v61  ;;  %v8396_v39 = vld [vmem:[#allocation91_spill] sm:$0xff] }
 0x341   : > { %v8404_v61 = vld [vmem:[#allocation159_spill] sm:$0xff] }
 0x342   : > { %4421 = vmatmul.msk.f32.gmra.mxu0 %vm1985_vm10, %v1952_v0  ;;  %4431 = vmatmul.msk.f32.gmra.mxu2 %vm1985_vm10, %v1962_v3  ;;  %v1855_v0 = vsel %vm1844_vm5, %v1822_v12, %v8360_v14  ;;  %v8361_v3 = vld [vmem:[#allocation122_spill] sm:$0xff]  ;;  %v8381_v12 = vld [vmem:[#allocation53_spill] sm:$0xff]  ;;  %v8382_v14 = vld [vmem:[#allocation83_spill] sm:$0xff] }
 0x343   : > { %v1865_v58 = vsel %vm1844_vm5, %v1832_v59, %v8361_v3  ;;  %v1888_v62 = vsel %vm1877_vm7, %v1855_v0, %v8362_v35  ;;  %v8380_v59 = vld [vmem:[#allocation35_spill] sm:$0xff] }
 0x344   : > { %v1898_v37 = vsel %vm1877_vm7, %v1865_v58, %v8363_v44  ;;  %v1921_v5 = vsel %vm1910_vm9, %v1888_v62, %v8365_v30  ;;  %v1735_v20 = vsel %vm279_vm0, %v4530_v9, %v8380_v59  ;;  %v8383_v0 = vld [vmem:[#allocation95_spill] sm:$0xff]  ;;  %v8384_v58 = vld [vmem:[#allocation96_spill] sm:$0xff]  ;;  %v8386_v44 = vld [vmem:[#allocation37_spill] sm:$0xff] }
 0x345   : > { %v1931_v53 = vsel %vm1910_vm9, %v1898_v37, %v8364_v31  ;;  %v1954_v10 = vsel %vm1943_vm8, %v1921_v5, %v5955_v34  ;;  %v1757_v34 = vsel %vm1745_vm3, %v1724_v19, %v8369_v21  ;;  %v8385_v35 = vld [vmem:[#allocation115_spill] sm:$0xff]  ;;  %v8387_v31 = vld [vmem:[#allocation56_spill] sm:$0xff] }
 0x346   : > { %v1964_v50 = vsel %vm1943_vm8, %v1931_v53, %v1658_v54  ;;  %v1790_v51 = vsel %vm1778_vm4, %v1757_v34, %v8370_v33  ;;  %v8388_v30 = vld [vmem:[#allocation123_spill] sm:$0xff]  ;;  %v8392_v34 = vld [vmem:[#allocation20_spill] sm:$0xff] }
 0x347   : > { %v1823_v27 = vsel %vm1811_vm6, %v1790_v51, %v8372_v15  ;;  %v4531_v21 = vld [vmem:[#allocation2 + $0x110] sm:$0xff]  ;;  %v4532_v51 = vld [vmem:[#allocation2 + $0x98] sm:$0xff]  ;;  %v8394_v15 = vld [vmem:[#allocation69_spill] sm:$0xff] }
 0x348   : > { %v1736_v33 = vsel %vm279_vm0, %v4531_v21, %v8392_v34  ;;  %v1726_v32 = vsel %vm279_vm0, %v4532_v51, %v8393_v52  ;;  %v8405_v9 = vld [vmem:[#allocation160_spill] sm:$0xff]  ;;  %v1666_v21 = vpop.permute.xlu2 %1665  ;;  %v8417_v52 = vld [vmem:[#allocation147_spill] sm:$0xff] }
 0x34a   : > { %4422 = vmatmul.msk.f32.gmra.mxu0 %vm1985_vm10, %v1953_v6  ;;  %4432 = vmatmul.msk.f32.gmra.mxu2 %vm1985_vm10, %v1963_v24  ;;  %v1866_v6 = vsel %vm1844_vm5, %v1833_v48, %v8374_v63  ;;  %v8375_v24 = vld [vmem:[#allocation66_spill] sm:$0xff]  ;;  %v8397_v63 = vld [vmem:[#allocation104_spill] sm:$0xff] }
 0x34b   : > { %v1856_v17 = vsel %vm1844_vm5, %v1823_v27, %v8375_v24  ;;  %v1899_v4 = vsel %vm1877_vm7, %v1866_v6, %v8377_v55  ;;  %v8395_v27 = vld [vmem:[#allocation84_spill] sm:$0xff]  ;;  %v8398_v24 = vld [vmem:[#allocation19_spill] sm:$0xff] }
 0x34c   : > { %v1889_v22 = vsel %vm1877_vm7, %v1856_v17, %v8376_v60  ;;  %v1932_v41 = vsel %vm1910_vm9, %v1899_v4, %v5857_v26  ;;  %v1758_v26 = vsel %vm1745_vm3, %v1725_v46, %v8381_v12  ;;  %v8401_v4 = vld [vmem:[#allocation124_spill] sm:$0xff] }
 0x34d   : > { %v1922_v1 = vsel %vm1910_vm9, %v1889_v22, %v8378_v2  ;;  %v1965_v42 = vsel %vm1943_vm8, %v1932_v41, %v1660_v18  ;;  %v1791_v54 = vsel %vm1778_vm4, %v1758_v26, %v8384_v58  ;;  %v8399_v18 = vld [vmem:[#allocation23_spill] sm:$0xff]  ;;  %v8400_v22 = vld [vmem:[#allocation70_spill] sm:$0xff] }
 0x34e   : > { %v1955_v57 = vsel %vm1943_vm8, %v1922_v1, %v5971_v28  ;;  %v1768_v28 = vsel %vm1745_vm3, %v1735_v20, %v8382_v14  ;;  %v1824_v62 = vsel %vm1811_vm6, %v1791_v54, %v8385_v35  ;;  %v1664_v1 = vpop.permute.xlu1 %1663  ;;  %v8402_v41 = vld [vmem:[#allocation131_spill] sm:$0xff]  ;;  %v4533_v26 = vld [vmem:[#allocation2 + $0xa8] sm:$0xff]  ;;  %v6255_v54 = vld [vmem:[%s8042_s2] ss:$0 sm:$0xff] }
 0x34f   : > { %v1801_v3 = vsel %vm1778_vm4, %v1768_v28, %v8383_v0  ;;  %v1857_v53 = vsel %vm1844_vm5, %v1824_v62, %v8387_v31  ;;  %v8406_v14 = vld [vmem:[#allocation10_spill] sm:$0xff]  ;;  %v4534_v0 = vld [vmem:[#allocation2 + $0x120] sm:$0xff] }
 0x350   : > { %v1834_v37 = vsel %vm1811_vm6, %v1801_v3, %v8386_v44  ;;  %v1890_v19 = vsel %vm1877_vm7, %v1857_v53, %v8390_v36  ;;  %v1727_v28 = vsel %vm279_vm0, %v4533_v26, %v8406_v14  ;;  %v8407_v3 = vld [vmem:[#allocation36_spill] sm:$0xff]  ;;  %v8409_v62 = vld [vmem:[#allocation74_spill] sm:$0xff]  ;;  %v8411_v53 = vld [vmem:[#allocation105_spill] sm:$0xff] }
 0x351   : > { %v1867_v5 = vsel %vm1844_vm5, %v1834_v37, %v8388_v30  ;;  %v1923_v8 = vsel %vm1910_vm9, %v1890_v19, %v8391_v56  ;;  %v1737_v58 = vsel %vm279_vm0, %v4534_v0, %v8407_v3  ;;  %v1760_v44 = vsel %vm1745_vm3, %v1727_v28, %v8409_v62  ;;  %v8410_v37 = vld [vmem:[#allocation97_spill] sm:$0xff]  ;;  %v8429_v28 = vld [vmem:[#allocation139_spill] sm:$0xff]  ;;  %v8430_v3 = vld [vmem:[#allocation140_spill] sm:$0xff] }
 0x352   : > { %4423 = vmatmul.msk.f32.gmra.mxu0 %vm1985_vm10, %v1954_v10  ;;  %4433 = vmatmul.msk.f32.gmra.mxu2 %vm1985_vm10, %v1964_v50  ;;  %v1662_v10 = vpop.permute.xlu0 %1661  ;;  %v8389_v50 = vld [vmem:[#allocation136_spill] sm:$0xff]  ;;  %v1956_v38 = vsel %vm1943_vm8, %v1923_v8, %v5982_v16  ;;  %v1769_v16 = vsel %vm1745_vm3, %v1736_v33, %v8395_v27  ;;  %v1793_v31 = vsel %vm1778_vm4, %v1760_v44, %v8410_v37  ;;  %v2363_v56 = vld [vmem:[#allocation2 + $0x1] sm:$0xff] }
 0x353   : > { %v1900_v40 = vsel %vm1877_vm7, %v1867_v5, %v8389_v50  ;;  %v1802_v6 = vsel %vm1778_vm4, %v1769_v16, %v8397_v63  ;;  %v6268_v5 = vld [vmem:[%s8043_s3] ss:$0 sm:$0xff]  ;;  %v8414_v8 = vld [vmem:[#allocation72_spill] sm:$0xff]  ;;  %2651 = vrot.lane.b32.xlu1 %v2363_v56, %s4564_s26  ;;  %v8416_v33 = vld [vmem:[#allocation138_spill] sm:$0xff] }
 0x354   : > { %v1933_v47 = vsel %vm1910_vm9, %v1900_v40, %v5871_v45  ;;  %v1759_v45 = vsel %vm1745_vm3, %v1726_v32, %v8394_v15  ;;  %v1835_v17 = vsel %vm1811_vm6, %v1802_v6, %v8398_v24  ;;  %v8413_v40 = vld [vmem:[#allocation118_spill] sm:$0xff]  ;;  %v4535_v63 = vld [vmem:[#allocation2 + $0xb0] sm:$0xff] }
 0x355   : > { %v1966_v29 = vsel %vm1943_vm8, %v1933_v47, %v1662_v10  ;;  %v1792_v48 = vsel %vm1778_vm4, %v1759_v45, %v8396_v39  ;;  %v1868_v2 = vsel %vm1844_vm5, %v1835_v17, %v8401_v4  ;;  %v8412_v10 = vld [vmem:[#allocation111_spill] sm:$0xff]  ;;  %v8418_v15 = vld [vmem:[#allocation154_spill] sm:$0xff]  ;;  %v8422_v4 = vld [vmem:[#allocation85_spill] sm:$0xff] }
 0x356   : > { %v1825_v60 = vsel %vm1811_vm6, %v1792_v48, %v8399_v18  ;;  %v1826_v50 = vsel %vm1811_vm6, %v1793_v31, %v8412_v10  ;;  %v8419_v6 = vld [vmem:[#allocation22_spill] sm:$0xff]  ;;  %v8420_v18 = vld [vmem:[#allocation40_spill] sm:$0xff] }
 0x357   : > { %v1858_v55 = vsel %vm1844_vm5, %v1825_v60, %v8400_v22  ;;  %v1728_v24 = vsel %vm279_vm0, %v4535_v63, %v8419_v6  ;;  %v4536_v17 = vld [vmem:[#allocation2 + $0x128] sm:$0xff]  ;;  %v4537_v31 = vld [vmem:[#allocation2 + $0x138] sm:$0xff] }
 0x358   : > { %v1738_v60 = vsel %vm279_vm0, %v4536_v17, %v8420_v18  ;;  %v8436_v56 = vld [vmem:[#allocation126_spill] sm:$0xff]  ;;  %v8443_v63 = vld [vmem:[#allocation80_spill] sm:$0xff]  ;;  %v8444_v17 = vld [vmem:[#allocation149_spill] sm:$0xff] }
 0x35a   : > { %4424 = vmatmul.msk.f32.gmra.mxu0 %vm1985_vm10, %v1955_v57  ;;  %4434 = vmatmul.msk.f32.gmra.mxu2 %vm1985_vm10, %v1965_v42  ;;  %v1891_v57 = vsel %vm1877_vm7, %v1858_v55, %v8402_v41  ;;  %v8403_v42 = vld [vmem:[#allocation146_spill] sm:$0xff]  ;;  %v8424_v41 = vld [vmem:[#allocation99_spill] sm:$0xff]  ;;  %v1668_v14 = vpop.permute.xlu0 %1667 }
 0x35b   : > { %v1901_v25 = vsel %vm1877_vm7, %v1868_v2, %v8403_v42  ;;  %v1924_v59 = vsel %vm1910_vm9, %v1891_v57, %v8405_v9  ;;  %v8423_v2 = vld [vmem:[#allocation98_spill] sm:$0xff]  ;;  %v8425_v42 = vld [vmem:[#allocation116_spill] sm:$0xff] }
 0x35c   : > { %v1934_v46 = vsel %vm1910_vm9, %v1901_v25, %v8404_v61  ;;  %v1957_v20 = vsel %vm1943_vm8, %v1924_v59, %v5975_v23  ;;  %v8408_v23 = vld [vmem:[#allocation73_spill] sm:$0xff]  ;;  %v8426_v61 = vld [vmem:[#allocation38_spill] sm:$0xff]  ;;  %v8427_v59 = vld [vmem:[#allocation60_spill] sm:$0xff] }
 0x35d   : > { %v1967_v12 = vsel %vm1943_vm8, %v1934_v46, %v1664_v1  ;;  %v1770_v35 = vsel %vm1745_vm3, %v1737_v58, %v8408_v23  ;;  %v2364_v9 = vld [vmem:[#allocation2 + $0x9] sm:$0xff]  ;;  %v8431_v23 = vld [vmem:[#allocation161_spill] sm:$0xff] }
 0x35e   : > { %v1803_v30 = vsel %vm1778_vm4, %v1770_v35, %v8411_v53  ;;  %2653 = vrot.lane.b32.xlu2 %v2364_v9, %s4564_s26  ;;  %v8432_v53 = vld [vmem:[#allocation25_spill] sm:$0xff]  ;;  %v8449_v9 = vld [vmem:[#allocation43_spill] sm:$0xff] }
 0x35f   : > { %v1836_v36 = vsel %vm1811_vm6, %v1803_v30, %v8413_v40  ;;  %v1739_v30 = vsel %vm279_vm0, %v4537_v31, %v8432_v53  ;;  %v8454_v53 = vld [vmem:[#allocation88_spill] sm:$0xff] }
 0x360   : > { %v1869_v47 = vsel %vm1844_vm5, %v1836_v36, %v8414_v8 }
 0x361   : > { %v1902_v32 = vsel %vm1877_vm7, %v1869_v47, %v8417_v52  ;;  %v1670_v47 = vpop.permute.xlu1 %1669  ;;  %v8439_v52 = vld [vmem:[#allocation41_spill] sm:$0xff] }
 0x362   : > { %4425 = vmatmul.msk.f32.gmra.mxu0 %vm1985_vm10, %v1956_v38  ;;  %4435 = vmatmul.msk.f32.gmra.mxu2 %vm1985_vm10, %v1966_v29  ;;  %v8415_v38 = vld [vmem:[#allocation76_spill] sm:$0xff]  ;;  %v1935_v27 = vsel %vm1910_vm9, %v1902_v32, %v5874_v49  ;;  %v8421_v49 = vld [vmem:[#allocation57_spill] sm:$0xff] }
 0x363   : > { %v1859_v29 = vsel %vm1844_vm5, %v1826_v50, %v8415_v38  ;;  %v1968_v48 = vsel %vm1943_vm8, %v1935_v27, %v1666_v21  ;;  %v1761_v55 = vsel %vm1745_vm3, %v1728_v24, %v8421_v49  ;;  %v8433_v50 = vld [vmem:[#allocation86_spill] sm:$0xff]  ;;  %v8437_v38 = vld [vmem:[#allocation148_spill] sm:$0xff]  ;;  %v8441_v27 = vld [vmem:[#allocation107_spill] sm:$0xff]  ;;  %v1672_v24 = vpop.permute.xlu2 %1671 }
 0x364   : > { %v1892_v51 = vsel %vm1877_vm7, %v1859_v29, %v8416_v33  ;;  %v1794_v57 = vsel %vm1778_vm4, %v1761_v55, %v8424_v41  ;;  %v1772_v40 = vsel %vm1745_vm3, %v1739_v30, %v8433_v50  ;;  %v8438_v21 = vld [vmem:[#allocation162_spill] sm:$0xff] }
 0x365   : > { %v1925_v45 = vsel %vm1910_vm9, %v1892_v51, %v8418_v15  ;;  %v1827_v25 = vsel %vm1811_vm6, %v1794_v57, %v8425_v42  ;;  %v4538_v51 = vld [vmem:[#allocation2 + $0x140] sm:$0xff]  ;;  %v8447_v57 = vld [vmem:[#allocation87_spill] sm:$0xff] }
 0x366   : > { %v1958_v39 = vsel %vm1943_vm8, %v1925_v45, %v6005_v43  ;;  %v1771_v43 = vsel %vm1745_vm3, %v1738_v60, %v8422_v4  ;;  %v1740_v32 = vsel %vm279_vm0, %v4538_v51, %v8439_v52  ;;  %v8440_v15 = vld [vmem:[#allocation77_spill] sm:$0xff]  ;;  %v4541_v52 = vld [vmem:[#allocation2 + $0x168] sm:$0xff] }
 0x367   : > { %v1804_v1 = vsel %vm1778_vm4, %v1771_v43, %v8423_v2  ;;  %v1773_v45 = vsel %vm1745_vm3, %v1740_v32, %v8440_v15  ;;  %v4539_v43 = vld [vmem:[#allocation2 + $0x150] sm:$0xff]  ;;  %v8446_v2 = vld [vmem:[#allocation45_spill] sm:$0xff]  ;;  %v8460_v32 = vld [vmem:[#allocation46_spill] sm:$0xff] }
 0x368   : > { %v1837_v46 = vsel %vm1811_vm6, %v1804_v1, %v8426_v61  ;;  %v1741_v1 = vsel %vm279_vm0, %v4539_v43, %v8446_v2  ;;  %v1743_v15 = vsel %vm279_vm0, %v4541_v52, %v8460_v32  ;;  %v8466_v43 = vld [vmem:[#allocation165_spill] sm:$0xff] }
 0x369   : > { %v1774_v42 = vsel %vm1745_vm3, %v1741_v1, %v8447_v57  ;;  %v4542_v57 = vld [vmem:[#allocation2 + $0x170] sm:$0xff] }
 0x36a   : > { %4426 = vmatmul.msk.f32.gmra.mxu0 %vm1985_vm10, %v1957_v20  ;;  %4436 = vmatmul.msk.f32.gmra.mxu2 %vm1985_vm10, %v1967_v12  ;;  %v1860_v20 = vsel %vm1844_vm5, %v1827_v25, %v8427_v59  ;;  %v8428_v12 = vld [vmem:[#allocation125_spill] sm:$0xff]  ;;  %v8448_v25 = vld [vmem:[#allocation100_spill] sm:$0xff] }
 0x36b   : > { %v1870_v26 = vsel %vm1844_vm5, %v1837_v46, %v8428_v12  ;;  %v1893_v58 = vsel %vm1877_vm7, %v1860_v20, %v8430_v3  ;;  %v1807_v61 = vsel %vm1778_vm4, %v1774_v42, %v8448_v25  ;;  %v8450_v20 = vld [vmem:[#allocation127_spill] sm:$0xff]  ;;  %v8452_v3 = vld [vmem:[#allocation34_spill] sm:$0xff] }
 0x36c   : > { %v1903_v0 = vsel %vm1877_vm7, %v1870_v26, %v8429_v28  ;;  %v1926_v35 = vsel %vm1910_vm9, %v1893_v58, %v8431_v23  ;;  %v1840_v59 = vsel %vm1811_vm6, %v1807_v61, %v8449_v9  ;;  %v1674_v26 = vpop.permute.xlu0 %1673  ;;  %v8467_v42 = vld [vmem:[#allocation50_spill] sm:$0xff] }
 0x36d   : > { %v2103_v19 = vpop.f32.mrf.mxu0  ;;  %v1936_v62 = vsel %vm1910_vm9, %v1903_v0, %v5877_v11  ;;  %v1959_v44 = vsel %vm1943_vm8, %v1926_v35, %v6027_v13  ;;  %v8434_v11 = vld [vmem:[#allocation106_spill] sm:$0xff]  ;;  %v8435_v13 = vld [vmem:[#allocation29_spill] sm:$0xff]  ;;  %v1873_v12 = vsel %vm1844_vm5, %v1840_v59, %v8450_v20  ;;  %v1744_v25 = vsel %vm279_vm0, %v4542_v57, %v8467_v42 }
 0x36e   : > { %v2104_v34 = vadd.f32 %v6255_v54, %v2103_v19  ;;  %v1969_v37 = vsel %vm1943_vm8, %v1936_v62, %v1668_v14  ;;  %v1805_v36 = vsel %vm1778_vm4, %v1772_v40, %v8434_v11  ;;  %v8451_v14 = vld [vmem:[#allocation141_spill] sm:$0xff]  ;;  %v4540_v62 = vld [vmem:[#allocation2 + $0x158] sm:$0xff]  ;;  %v8469_v59 = vld [vmem:[#allocation102_spill] sm:$0xff] }
 0x36f   : > { %v1838_v19 = vsel %vm1811_vm6, %v1805_v36, %v8435_v13  ;;  %v1906_v28 = vsel %vm1877_vm7, %v1873_v12, %v8451_v14  ;;  %v8456_v36 = vld [vmem:[#allocation28_spill] sm:$0xff] }
 0x370   : > { %vm2199_vm11 = vcmp.gt.f32.partialorder %v2104_v34, 0.0  ;;  %v2235_v16 = vmul.f32 %v6268_v5, %v2104_v34  ;;  %v1871_v8 = vsel %vm1844_vm5, %v1838_v19, %v8436_v56  ;;  %v1939_v58 = vsel %vm1910_vm9, %v1906_v28, %v8452_v3  ;;  %v8457_v19 = vld [vmem:[#allocation128_spill] sm:$0xff] }
 0x371   : > { %v1904_v29 = vsel %vm1877_vm7, %v1871_v8, %v8437_v38  ;;  %v1972_v35 = vsel %vm1943_vm8, %v1939_v58, %v1674_v26  ;;  %v1676_v8 = vpop.permute.xlu1 %1675  ;;  %v8470_v14 = vld [vmem:[#allocation52_spill] sm:$0xff] }
 0x372   : > { %v2267_v22 = vsel %vm2199_vm11, %v2104_v34, %v2235_v16  ;;  %4427 = vmatmul.msk.f32.gmra.mxu0 %vm1985_vm10, %v1958_v39  ;;  %4437 = vmatmul.msk.f32.gmra.mxu2 %vm1985_vm10, %v1968_v48  ;;  %v1937_v34 = vsel %vm1910_vm9, %v1904_v29, %v8438_v21  ;;  %v1806_v16 = vsel %vm1778_vm4, %v1773_v45, %v8441_v27  ;;  %v8442_v39 = vld [vmem:[#allocation42_spill] sm:$0xff]  ;;  %v8459_v21 = vld [vmem:[#allocation164_spill] sm:$0xff]  ;;  %v8461_v27 = vld [vmem:[#allocation81_spill] sm:$0xff] }
 0x373   : > { %2299 = vst.msk [vmem:[#allocation2 + $0x19] sm:$0xff] %vm279_vm0, %v2267_v22  ;;  %v1970_v33 = vsel %vm1943_vm8, %v1937_v34, %v1670_v47  ;;  %v1839_v48 = vsel %vm1811_vm6, %v1806_v16, %v8442_v39  ;;  %v8445_v22 = vld [vmem:[#allocation5_spill] sm:$0xff]  ;;  %v8458_v47 = vld [vmem:[#allocation150_spill] sm:$0xff]  ;;  %v1776_v16 = vsel %vm1745_vm3, %v1743_v15, %v8461_v27 }
 0x374   : > { %v1872_v6 = vsel %vm1844_vm5, %v1839_v48, %v8443_v63  ;;  %v8462_v39 = vld [vmem:[#allocation109_spill] sm:$0xff]  ;;  %v1680_v58 = vpop.permute.xlu0 %1679 }
 0x375   : > { %v1905_v18 = vsel %vm1877_vm7, %v1872_v6, %v8444_v17  ;;  %v1809_v48 = vsel %vm1778_vm4, %v1776_v16, %v8462_v39 }
 0x376   : > { %v1938_v49 = vsel %vm1910_vm9, %v1905_v18, %v8445_v22  ;;  %v8464_v18 = vld [vmem:[#allocation121_spill] sm:$0xff]  ;;  %v1678_v22 = vpop.permute.xlu2 %1677 }
 0x377   : > { %v1971_v4 = vsel %vm1943_vm8, %v1938_v49, %v1672_v24  ;;  %v8463_v24 = vld [vmem:[#allocation47_spill] sm:$0xff]  ;;  %v8465_v49 = vld [vmem:[#allocation152_spill] sm:$0xff] }
 0x378   : > { %v1842_v17 = vsel %vm1811_vm6, %v1809_v48, %v8463_v24 }
 0x37a   : > { %4428 = vmatmul.msk.f32.gmra.mxu0 %vm1985_vm10, %v1959_v44  ;;  %4438 = vmatmul.msk.f32.gmra.mxu2 %vm1985_vm10, %v1969_v37  ;;  %v2365_v10 = vld [vmem:[#allocation2 + $0x19] sm:$0xff]  ;;  %v8453_v44 = vld [vmem:[#allocation31_spill] sm:$0xff] }
 0x37b   : > { %2655 = vrot.lane.b32.xlu0 %v2365_v10, %s4564_s26  ;;  %v1742_v37 = vsel %vm279_vm0, %v4540_v62, %v8453_v44  ;;  %v8455_v10 = vld [vmem:[#allocation108_spill] sm:$0xff] }
 0x37c   : > { %v1775_v30 = vsel %vm1745_vm3, %v1742_v37, %v8454_v53 }
 0x37d   : > { %v1808_v50 = vsel %vm1778_vm4, %v1775_v30, %v8455_v10 }
 0x37e   : > { %v1841_v13 = vsel %vm1811_vm6, %v1808_v50, %v8456_v36 }
 0x37f   : > { %v1874_v56 = vsel %vm1844_vm5, %v1841_v13, %v8457_v19 }
 0x380   : > { %v1907_v38 = vsel %vm1877_vm7, %v1874_v56, %v8458_v47 }
 0x381   : > { %v1940_v34 = vsel %vm1910_vm9, %v1907_v38, %v8459_v21 }
 0x382   : > { %4439 = vmatmul.msk.f32.gmra.mxu2 %vm1985_vm10, %v1970_v33  ;;  %v1973_v51 = vsel %vm1943_vm8, %v1940_v34, %v1676_v8 }
 0x387   : > { %v2106_v60 = vpop.f32.mrf.mxu0 }
 0x388   : > { %v2107_v55 = vadd.f32 %v6255_v54, %v2106_v60  ;;  %v1875_v60 = vsel %vm1844_vm5, %v1842_v17, %v8464_v18 }
 0x38a   : > { %vm2200_vm12 = vcmp.gt.f32.partialorder %v2107_v55, 0.0  ;;  %v2236_v41 = vmul.f32 %v6268_v5, %v2107_v55  ;;  %4440 = vmatmul.msk.f32.gmra.mxu2 %vm1985_vm10, %v1971_v4 }
 0x38c   : > { %v2268_v46 = vsel %vm2200_vm12, %v2107_v55, %v2236_v41  ;;  %v1908_v55 = vsel %vm1877_vm7, %v1875_v60, %v8465_v49 }
 0x38d   : > { %2300 = vst.msk [vmem:[#allocation2 + $0x21] sm:$0xff] %vm279_vm0, %v2268_v46  ;;  %v1941_v2 = vsel %vm1910_vm9, %v1908_v55, %v8466_v43  ;;  %v8468_v46 = vld [vmem:[#allocation89_spill] sm:$0xff] }
 0x38e   : > { %v1974_v41 = vsel %vm1943_vm8, %v1941_v2, %v1678_v22  ;;  %v1777_v9 = vsel %vm1745_vm3, %v1744_v25, %v8468_v46 }
 0x38f   : > { %v2109_v0 = vpop.f32.mrf.mxu0  ;;  %v1810_v20 = vsel %vm1778_vm4, %v1777_v9, %v8469_v59 }
 0x390   : > { %v2110_v23 = vadd.f32 %v6255_v54, %v2109_v0  ;;  %v1843_v28 = vsel %vm1811_vm6, %v1810_v20, %v8470_v14  ;;  %v8471_v0 = vld [vmem:[#allocation129_spill] sm:$0xff] }
 0x391   : > { %v1876_v3 = vsel %vm1844_vm5, %v1843_v28, %v8471_v0 }
 0x392   : > { %vm2201_vm13 = vcmp.gt.f32.partialorder %v2110_v23, 0.0  ;;  %v2237_v31 = vmul.f32 %v6268_v5, %v2110_v23  ;;  %4441 = vmatmul.msk.f32.gmra.mxu2 %vm1985_vm10, %v1972_v35 }
 0x394   : > { %v2269_v40 = vsel %vm2201_vm13, %v2110_v23, %v2237_v31  ;;  %v2366_v11 = vld [vmem:[#allocation2 + $0x21] sm:$0xff]  ;;  %v8472_v23 = vld [vmem:[#allocation144_spill] sm:$0xff] }
 0x395   : > { %2301 = vst.msk [vmem:[#allocation2 + $0x31] sm:$0xff] %vm279_vm0, %v2269_v40  ;;  %2657 = vrot.lane.b32.xlu1 %v2366_v11, %s4564_s26  ;;  %v1909_v35 = vsel %vm1877_vm7, %v1876_v3, %v8472_v23 }
 0x396   : > { %v1942_v44 = vsel %vm1910_vm9, %v1909_v35, %v5897_v7 }
 0x397   : > { %v2112_v29 = vpop.f32.mrf.mxu0  ;;  %v1975_v31 = vsel %vm1943_vm8, %v1942_v44, %v1680_v58 }
 0x398   : > { %v2113_v33 = vadd.f32 %v6255_v54, %v2112_v29 }
 0x39a   : > { %vm2202_vm14 = vcmp.gt.f32.partialorder %v2113_v33, 0.0  ;;  %v2238_v45 = vmul.f32 %v6268_v5, %v2113_v33  ;;  %4442 = vmatmul.msk.f32.gmra.mxu2 %vm1985_vm10, %v1973_v51 }
 0x39c   : > { %v2270_v63 = vsel %vm2202_vm14, %v2113_v33, %v2238_v45  ;;  %v6409_v6 = vld [vmem:[#allocation2 + $0x31] sm:$0xff] }
 0x39d   : > { %2302 = vst.msk [vmem:[#allocation2 + $0x39] sm:$0xff] %vm279_vm0, %v2270_v63  ;;  %2659 = vrot.lane.b32.xlu2 %v6409_v6, %s4564_s26 }
 0x39f   : > { %v2115_v4 = vpop.f32.mrf.mxu0 }
 0x3a0   : > { %v2116_v1 = vadd.f32 %v6255_v54, %v2115_v4 }
 0x3a2   : > { %vm2203_vm15 = vcmp.gt.f32.partialorder %v2116_v1, 0.0  ;;  %v2239_v61 = vmul.f32 %v6268_v5, %v2116_v1  ;;  %4443 = vmatmul.msk.f32.gmra.mxu2 %vm1985_vm10, %v1974_v41 }
 0x3a4   : > { %v2271_v12 = vsel %vm2203_vm15, %v2116_v1, %v2239_v61  ;;  %v6432_v26 = vld [vmem:[#allocation2 + $0x39] sm:$0xff] }
 0x3a5   : > { %2303 = vst.msk [vmem:[#allocation2 + $0x49] sm:$0xff] %vm279_vm0, %v2271_v12  ;;  %2661 = vrot.lane.b32.xlu0 %v6432_v26, %s4564_s26 }
 0x3a7   : > { %v2118_v62 = vpop.f32.mrf.mxu0 }
 0x3a8   : > { %v2119_v37 = vadd.f32 %v6255_v54, %v2118_v62 }
 0x3aa   : > { %vm2204_vm1 = vcmp.gt.f32.partialorder %v2119_v37, 0.0  ;;  %v2240_v53 = vmul.f32 %v6268_v5, %v2119_v37  ;;  %4444 = vmatmul.msk.f32.gmra.mxu2 %vm1985_vm10, %v1975_v31 }
 0x3ac   : > { %v2272_v30 = vsel %vm2204_vm1, %v2119_v37, %v2240_v53  ;;  %v6449_v10 = vld [vmem:[#allocation2 + $0x49] sm:$0xff] }
 0x3ad   : > { %2304 = vst.msk [vmem:[#allocation2 + $0x51] sm:$0xff] %vm279_vm0, %v2272_v30  ;;  %2663 = vrot.lane.b32.xlu1 %v6449_v10, %s4564_s26 }
 0x3af   : > { %v2121_v50 = vpop.f32.mrf.mxu0 }
 0x3b0   : > { %v2122_v7 = vadd.f32 %v6255_v54, %v2121_v50 }
 0x3b2   : > { %vm2205_vm11 = vcmp.gt.f32.partialorder %v2122_v7, 0.0  ;;  %v2241_v40 = vmul.f32 %v6268_v5, %v2122_v7 }
 0x3b4   : > { %v2273_v11 = vsel %vm2205_vm11, %v2122_v7, %v2241_v40  ;;  %v6456_v36 = vld [vmem:[#allocation2 + $0x51] sm:$0xff] }
 0x3b5   : > { %2305 = vst.msk [vmem:[#allocation2 + $0x61] sm:$0xff] %vm279_vm0, %v2273_v11  ;;  %v2151_v13 = vpop.f32.mrf.mxu2  ;;  %2665 = vrot.lane.b32.xlu2 %v6456_v36, %s4564_s26 }
 0x3b6   : > { %v2152_v19 = vadd.f32 %v6255_v54, %v2151_v13 }
 0x3b7   : > { %v2124_v56 = vpop.f32.mrf.mxu0 }
 0x3b8   : > { %vm2215_vm12 = vcmp.gt.f32.partialorder %v2152_v19, 0.0  ;;  %v2251_v8 = vmul.f32 %v6268_v5, %v2152_v19  ;;  %v2125_v47 = vadd.f32 %v6255_v54, %v2124_v56 }
 0x3ba   : > { %v2283_v38 = vsel %vm2215_vm12, %v2152_v19, %v2251_v8  ;;  %vm2206_vm13 = vcmp.gt.f32.partialorder %v2125_v47, 0.0  ;;  %v2242_v29 = vmul.f32 %v6268_v5, %v2125_v47 }
 0x3bb   : > { %2315 = vst.msk [vmem:[#allocation2 + $0xd9] sm:$0xff] %vm279_vm0, %v2283_v38 }
 0x3bc   : > { %v2274_v21 = vsel %vm2206_vm13, %v2125_v47, %v2242_v29  ;;  %v6466_v34 = vld [vmem:[#allocation2 + $0x61] sm:$0xff] }
 0x3bd   : > { %2306 = vst.msk [vmem:[#allocation2 + $0x69] sm:$0xff] %vm279_vm0, %v2274_v21  ;;  %v2154_v33 = vpop.f32.mrf.mxu2  ;;  %2667 = vrot.lane.b32.xlu0 %v6466_v34, %s4564_s26 }
 0x3be   : > { %v2155_v51 = vadd.f32 %v6255_v54, %v2154_v33 }
 0x3bf   : > { %v2127_v52 = vpop.f32.mrf.mxu0 }
 0x3c0   : > { %vm2216_vm14 = vcmp.gt.f32.partialorder %v2155_v51, 0.0  ;;  %v2252_v32 = vmul.f32 %v6268_v5, %v2155_v51  ;;  %v2128_v15 = vadd.f32 %v6255_v54, %v2127_v52 }
 0x3c2   : > { %v2284_v45 = vsel %vm2216_vm14, %v2155_v51, %v2252_v32  ;;  %vm2207_vm15 = vcmp.gt.f32.partialorder %v2128_v15, 0.0  ;;  %v2243_v27 = vmul.f32 %v6268_v5, %v2128_v15 }
 0x3c3   : > { %2316 = vst.msk [vmem:[#allocation2 + $0xe1] sm:$0xff] %vm279_vm0, %v2284_v45 }
 0x3c4   : > { %v2275_v16 = vsel %vm2207_vm15, %v2128_v15, %v2243_v27  ;;  %v6476_v39 = vld [vmem:[#allocation2 + $0x69] sm:$0xff] }
 0x3c5   : > { %2307 = vst.msk [vmem:[#allocation2 + $0x79] sm:$0xff] %vm279_vm0, %v2275_v16  ;;  %v2157_v48 = vpop.f32.mrf.mxu2  ;;  %2669 = vrot.lane.b32.xlu1 %v6476_v39, %s4564_s26 }
 0x3c6   : > { %v2158_v63 = vadd.f32 %v6255_v54, %v2157_v48 }
 0x3c7   : > { %v2130_v24 = vpop.f32.mrf.mxu0 }
 0x3c8   : > { %vm2217_vm1 = vcmp.gt.f32.partialorder %v2158_v63, 0.0  ;;  %v2253_v17 = vmul.f32 %v6268_v5, %v2158_v63  ;;  %v2131_v18 = vadd.f32 %v6255_v54, %v2130_v24 }
 0x3ca   : > { %v2285_v60 = vsel %vm2217_vm1, %v2158_v63, %v2253_v17  ;;  %vm2208_vm11 = vcmp.gt.f32.partialorder %v2131_v18, 0.0  ;;  %v2244_v22 = vmul.f32 %v6268_v5, %v2131_v18 }
 0x3cb   : > { %2317 = vst.msk [vmem:[#allocation2 + $0xf1] sm:$0xff] %vm279_vm0, %v2285_v60 }
 0x3cc   : > { %v2276_v49 = vsel %vm2208_vm11, %v2131_v18, %v2244_v22  ;;  %v6486_v55 = vld [vmem:[#allocation2 + $0x79] sm:$0xff] }
 0x3cd   : > { %2308 = vst.msk [vmem:[#allocation2 + $0x81] sm:$0xff] %vm279_vm0, %v2276_v49  ;;  %v2160_v4 = vpop.f32.mrf.mxu2  ;;  %2671 = vrot.lane.b32.xlu2 %v6486_v55, %s4564_s26  ;;  %v6546_v22 = vld [vmem:[#allocation2 + $0xd9] sm:$0xff] }
 0x3ce   : > { %v2161_v43 = vadd.f32 %v6255_v54, %v2160_v4 }
 0x3cf   : > { %v2133_v2 = vpop.f32.mrf.mxu0 }
 0x3d0   : > { %vm2218_vm12 = vcmp.gt.f32.partialorder %v2161_v43, 0.0  ;;  %v2254_v1 = vmul.f32 %v6268_v5, %v2161_v43  ;;  %v2134_v41 = vadd.f32 %v6255_v54, %v2133_v2 }
 0x3d2   : > { %v2286_v57 = vsel %vm2218_vm12, %v2161_v43, %v2254_v1  ;;  %vm2209_vm13 = vcmp.gt.f32.partialorder %v2134_v41, 0.0  ;;  %v2245_v42 = vmul.f32 %v6268_v5, %v2134_v41 }
 0x3d3   : > { %2318 = vst.msk [vmem:[#allocation2 + $0xf9] sm:$0xff] %vm279_vm0, %v2286_v57 }
 0x3d4   : > { %v2277_v25 = vsel %vm2209_vm13, %v2134_v41, %v2245_v42  ;;  %v6496_v61 = vld [vmem:[#allocation2 + $0x81] sm:$0xff] }
 0x3d5   : > { %2309 = vst.msk [vmem:[#allocation2 + $0x91] sm:$0xff] %vm279_vm0, %v2277_v25  ;;  %v2163_v46 = vpop.f32.mrf.mxu2  ;;  %2673 = vrot.lane.b32.xlu0 %v6496_v61, %s4564_s26  ;;  %v6566_v25 = vld [vmem:[#allocation2 + $0xe1] sm:$0xff] }
 0x3d6   : > { %v2164_v9 = vadd.f32 %v6255_v54, %v2163_v46 }
 0x3d7   : > { %v2136_v59 = vpop.f32.mrf.mxu0 }
 0x3d8   : > { %vm2219_vm14 = vcmp.gt.f32.partialorder %v2164_v9, 0.0  ;;  %v2255_v20 = vmul.f32 %v6268_v5, %v2164_v9  ;;  %v2137_v12 = vadd.f32 %v6255_v54, %v2136_v59 }
 0x3da   : > { %v2287_v14 = vsel %vm2219_vm14, %v2164_v9, %v2255_v20  ;;  %vm2210_vm15 = vcmp.gt.f32.partialorder %v2137_v12, 0.0  ;;  %v2246_v28 = vmul.f32 %v6268_v5, %v2137_v12  ;;  %v6558_v41 = vld [vmem:[#allocation2 + $0xf9] sm:$0xff] }
 0x3db   : > { %2319 = vst.msk [vmem:[#allocation2 + $0x109] sm:$0xff] %vm279_vm0, %v2287_v14 }
 0x3dc   : > { %v2278_v0 = vsel %vm2210_vm15, %v2137_v12, %v2246_v28  ;;  %v6506_v3 = vld [vmem:[#allocation2 + $0x91] sm:$0xff] }
 0x3dd   : > { %2310 = vst.msk [vmem:[#allocation2 + $0x99] sm:$0xff] %vm279_vm0, %v2278_v0  ;;  %v2166_v58 = vpop.f32.mrf.mxu2  ;;  %2675 = vrot.lane.b32.xlu1 %v6506_v3, %s4564_s26  ;;  %v6575_v12 = vld [vmem:[#allocation2 + $0xf1] sm:$0xff] }
 0x3de   : > { %v2167_v23 = vadd.f32 %v6255_v54, %v2166_v58 }
 0x3df   : > { %v2139_v35 = vpop.f32.mrf.mxu0 }
 0x3e0   : > { %vm2220_vm1 = vcmp.gt.f32.partialorder %v2167_v23, 0.0  ;;  %v2256_v62 = vmul.f32 %v6268_v5, %v2167_v23  ;;  %v2140_v44 = vadd.f32 %v6255_v54, %v2139_v35 }
 0x3e2   : > { %v2288_v37 = vsel %vm2220_vm1, %v2167_v23, %v2256_v62  ;;  %vm2211_vm11 = vcmp.gt.f32.partialorder %v2140_v44, 0.0  ;;  %v2247_v31 = vmul.f32 %v6268_v5, %v2140_v44  ;;  %v6581_v28 = vld [vmem:[#allocation2 + $0x109] sm:$0xff] }
 0x3e3   : > { %2320 = vst.msk [vmem:[#allocation2 + $0x111] sm:$0xff] %vm279_vm0, %v2288_v37 }
 0x3e4   : > { %v2279_v53 = vsel %vm2211_vm11, %v2140_v44, %v2247_v31  ;;  %v6516_v30 = vld [vmem:[#allocation2 + $0x99] sm:$0xff] }
 0x3e5   : > { %2311 = vst.msk [vmem:[#allocation2 + $0xa9] sm:$0xff] %vm279_vm0, %v2279_v53  ;;  %v2169_v50 = vpop.f32.mrf.mxu2  ;;  %2677 = vrot.lane.b32.xlu2 %v6516_v30, %s4564_s26 }
 0x3e6   : > { %v2170_v7 = vadd.f32 %v6255_v54, %v2169_v50 }
 0x3e7   : > { %v2142_v40 = vpop.f32.mrf.mxu0 }
 0x3e8   : > { %vm2221_vm12 = vcmp.gt.f32.partialorder %v2170_v7, 0.0  ;;  %v2257_v11 = vmul.f32 %v6268_v5, %v2170_v7  ;;  %v2143_v13 = vadd.f32 %v6255_v54, %v2142_v40 }
 0x3ea   : > { %v2289_v19 = vsel %vm2221_vm12, %v2170_v7, %v2257_v11  ;;  %vm2212_vm13 = vcmp.gt.f32.partialorder %v2143_v13, 0.0  ;;  %v2248_v56 = vmul.f32 %v6268_v5, %v2143_v13  ;;  %v6590_v62 = vld [vmem:[#allocation2 + $0x111] sm:$0xff] }
 0x3eb   : > { %2321 = vst.msk [vmem:[#allocation2 + $0x121] sm:$0xff] %vm279_vm0, %v2289_v19 }
 0x3ec   : > { %v2280_v8 = vsel %vm2212_vm13, %v2143_v13, %v2248_v56  ;;  %v6526_v47 = vld [vmem:[#allocation2 + $0xa9] sm:$0xff] }
 0x3ed   : > { %2312 = vst.msk [vmem:[#allocation2 + $0xb1] sm:$0xff] %vm279_vm0, %v2280_v8  ;;  %v2172_v38 = vpop.f32.mrf.mxu2  ;;  %2679 = vrot.lane.b32.xlu0 %v6526_v47, %s4564_s26 }
 0x3ee   : > { %v2173_v29 = vadd.f32 %v6255_v54, %v2172_v38 }
 0x3ef   : > { %v2145_v21 = vpop.f32.mrf.mxu0 }
 0x3f0   : > { %vm2222_vm14 = vcmp.gt.f32.partialorder %v2173_v29, 0.0  ;;  %v2258_v33 = vmul.f32 %v6268_v5, %v2173_v29  ;;  %v2146_v51 = vadd.f32 %v6255_v54, %v2145_v21 }
 0x3f2   : > { %v2290_v52 = vsel %vm2222_vm14, %v2173_v29, %v2258_v33  ;;  %vm2213_vm15 = vcmp.gt.f32.partialorder %v2146_v51, 0.0  ;;  %v2249_v32 = vmul.f32 %v6268_v5, %v2146_v51  ;;  %v6573_v20 = vld [vmem:[#allocation2 + $0x121] sm:$0xff] }
 0x3f3   : > { %2322 = vst.msk [vmem:[#allocation2 + $0x129] sm:$0xff] %vm279_vm0, %v2290_v52 }
 0x3f4   : > { %v2281_v15 = vsel %vm2213_vm15, %v2146_v51, %v2249_v32  ;;  %v6536_v45 = vld [vmem:[#allocation2 + $0xb1] sm:$0xff] }
 0x3f5   : > { %2313 = vst.msk [vmem:[#allocation2 + $0xc1] sm:$0xff] %vm279_vm0, %v2281_v15  ;;  %v2175_v27 = vpop.f32.mrf.mxu2  ;;  %2681 = vrot.lane.b32.xlu1 %v6536_v45, %s4564_s26  ;;  %v2396_v51 = vld [vmem:[#allocation2 + $0xa] sm:$0xff]  ;;  %v2395_v15 = vld [vmem:[#allocation2 + $0x2] sm:$0xff] }
 0x3f6   : > { %v2176_v16 = vadd.f32 %v6255_v54, %v2175_v27  ;;  %v6630_v27 = vpop.permute.xlu2 %2653 }
 0x3f7   : > { %v2148_v48 = vpop.f32.mrf.mxu0  ;;  %8473 = vst [vmem:[#allocation9_spill] sm:$0xff] %v6630_v27 }
 0x3f8   : > { %vm2223_vm1 = vcmp.gt.f32.partialorder %v2176_v16, 0.0  ;;  %v2259_v63 = vmul.f32 %v6268_v5, %v2176_v16  ;;  %v2149_v24 = vadd.f32 %v6255_v54, %v2148_v48 }
 0x3fa   : > { %v2291_v17 = vsel %vm2223_vm1, %v2176_v16, %v2259_v63  ;;  %vm2214_vm11 = vcmp.gt.f32.partialorder %v2149_v24, 0.0  ;;  %v2250_v18 = vmul.f32 %v6268_v5, %v2149_v24  ;;  %v6596_v37 = vld [vmem:[#allocation2 + $0x129] sm:$0xff] }
 0x3fb   : > { %2323 = vst.msk [vmem:[#allocation2 + $0x139] sm:$0xff] %vm279_vm0, %v2291_v17  ;;  %v6635_v17 = vld [vmem:[#allocation2 + $0x32] sm:$0xff] }
 0x3fc   : > { %v2282_v60 = vsel %vm2214_vm11, %v2149_v24, %v2250_v18  ;;  %v6548_v49 = vld [vmem:[#allocation2 + $0xc1] sm:$0xff] }
 0x3fd   : > { %2314 = vst.msk [vmem:[#allocation2 + $0xc9] sm:$0xff] %vm279_vm0, %v2282_v60  ;;  %v2178_v4 = vpop.f32.mrf.mxu2  ;;  %2687 = vrot.lane.b32.xlu1 %v6546_v22, %s4564_s26  ;;  %2683 = vrot.lane.b32.xlu2 %v6548_v49, %s4564_s26  ;;  %v6637_v18 = vld [vmem:[#allocation2 + $0x1a] sm:$0xff]  ;;  %v6644_v60 = vld [vmem:[#allocation2 + $0x22] sm:$0xff] }
 0x3fe   : > { %v2179_v43 = vadd.f32 %v6255_v54, %v2178_v4  ;;  %v6652_v4 = vld [vmem:[#allocation2 + $0x3a] sm:$0xff] }
 0x400   : > { %vm2224_vm12 = vcmp.gt.f32.partialorder %v2179_v43, 0.0  ;;  %v2260_v2 = vmul.f32 %v6268_v5, %v2179_v43 }
 0x402   : > { %v2292_v1 = vsel %vm2224_vm12, %v2179_v43, %v2260_v2  ;;  %v6603_v7 = vld [vmem:[#allocation2 + $0x139] sm:$0xff]  ;;  %v6658_v43 = vld [vmem:[#allocation2 + $0x4a] sm:$0xff]  ;;  %v6660_v2 = vpop.permute.xlu1 %2651 }
 0x403   : > { %2324 = vst.msk [vmem:[#allocation2 + $0x141] sm:$0xff] %vm279_vm0, %v2292_v1 }
 0x404   : > { %v6560_v57 = vld [vmem:[#allocation2 + $0xc9] sm:$0xff]  ;;  %8475 = vst [vmem:[#allocation7_spill] sm:$0xff] %v6660_v2 }
 0x405   : > { %v2181_v42 = vpop.f32.mrf.mxu2  ;;  %2693 = vrot.lane.b32.xlu1 %v6558_v41, %s4564_s26  ;;  %2685 = vrot.lane.b32.xlu0 %v6560_v57, %s4564_s26 }
 0x406   : > { %v2182_v46 = vadd.f32 %v6255_v54, %v2181_v42  ;;  %2689 = vrot.lane.b32.xlu2 %v6566_v25, %s4564_s26  ;;  %v6666_v42 = vld [vmem:[#allocation2 + $0x7a] sm:$0xff] }
 0x408   : > { %vm2225_vm13 = vcmp.gt.f32.partialorder %v2182_v46, 0.0  ;;  %v2261_v9 = vmul.f32 %v6268_v5, %v2182_v46 }
 0x40a   : > { %v2293_v59 = vsel %vm2225_vm13, %v2182_v46, %v2261_v9  ;;  %v6588_v35 = vld [vmem:[#allocation2 + $0x141] sm:$0xff]  ;;  %v6674_v9 = vld [vmem:[#allocation2 + $0x6a] sm:$0xff] }
 0x40b   : > { %2325 = vst.msk [vmem:[#allocation2 + $0x151] sm:$0xff] %vm279_vm0, %v2293_v59  ;;  %v6668_v46 = vld [vmem:[#allocation2 + $0x62] sm:$0xff]  ;;  %v6678_v59 = vpop.permute.xlu1 %2657 }
 0x40c   : > { %8477 = vst [vmem:[#allocation11_spill] sm:$0xff] %v6678_v59  ;;  %v6772_v59 = vld [vmem:[#allocation2 + $0x13a] sm:$0xff]  ;;  %v6780_v27 = vld [vmem:[#allocation2 + $0x142] sm:$0xff] }
 0x40d   : > { %v2184_v14 = vpop.f32.mrf.mxu2  ;;  %2699 = vrot.lane.b32.xlu1 %v6573_v20, %s4564_s26  ;;  %2691 = vrot.lane.b32.xlu0 %v6575_v12, %s4564_s26  ;;  %8493 = vst [vmem:[#allocation62_spill] sm:$0xff] %v6772_v59 }
 0x40e   : > { %v2185_v0 = vadd.f32 %v6255_v54, %v2184_v14  ;;  %2695 = vrot.lane.b32.xlu2 %v6581_v28, %s4564_s26 }
 0x410   : > { %vm2226_vm14 = vcmp.gt.f32.partialorder %v2185_v0, 0.0  ;;  %v2262_v58 = vmul.f32 %v6268_v5, %v2185_v0 }
 0x412   : > { %v2294_v23 = vsel %vm2226_vm14, %v2185_v0, %v2262_v58  ;;  %v6607_v11 = vld [vmem:[#allocation2 + $0x151] sm:$0xff]  ;;  %v6682_v0 = vld [vmem:[#allocation2 + $0x9a] sm:$0xff]  ;;  %v6684_v58 = vld [vmem:[#allocation2 + $0x82] sm:$0xff] }
 0x413   : > { %2326 = vst.msk [vmem:[#allocation2 + $0x159] sm:$0xff] %vm279_vm0, %v2294_v23  ;;  %v6690_v23 = vld [vmem:[#allocation2 + $0x92] sm:$0xff] }
 0x415   : > { %v2187_v44 = vpop.f32.mrf.mxu2  ;;  %2705 = vrot.lane.b32.xlu1 %v6588_v35, %s4564_s26  ;;  %2697 = vrot.lane.b32.xlu0 %v6590_v62, %s4564_s26 }
 0x416   : > { %v2188_v31 = vadd.f32 %v6255_v54, %v2187_v44  ;;  %2701 = vrot.lane.b32.xlu2 %v6596_v37, %s4564_s26  ;;  %v6694_v44 = vpop.permute.xlu0 %2655 }
 0x417   : > { %8479 = vst [vmem:[#allocation3_spill] sm:$0xff] %v6694_v44 }
 0x418   : > { %vm2227_vm15 = vcmp.gt.f32.partialorder %v2188_v31, 0.0  ;;  %v2263_v53 = vmul.f32 %v6268_v5, %v2188_v31 }
 0x41a   : > { %v2295_v50 = vsel %vm2227_vm15, %v2188_v31, %v2263_v53  ;;  %v6618_v38 = vld [vmem:[#allocation2 + $0x159] sm:$0xff] }
 0x41b   : > { %2327 = vst.msk [vmem:[#allocation2 + $0x169] sm:$0xff] %vm279_vm0, %v2295_v50  ;;  %v6700_v50 = vld [vmem:[#allocation2 + $0xc2] sm:$0xff] }
 0x41d   : > { %v2190_v40 = vpop.f32.mrf.mxu2  ;;  %2703 = vrot.lane.b32.xlu0 %v6603_v7, %s4564_s26 }
 0x41e   : > { %v2191_v13 = vadd.f32 %v6255_v54, %v2190_v40  ;;  %2707 = vrot.lane.b32.xlu2 %v6607_v11, %s4564_s26  ;;  %v6702_v40 = vld [vmem:[#allocation2 + $0xaa] sm:$0xff] }
 0x41f   : > { %v6696_v31 = vpop.permute.xlu1 %2663 }
 0x420   : > { %vm2228_vm1 = vcmp.gt.f32.partialorder %v2191_v13, 0.0  ;;  %v2264_v19 = vmul.f32 %v6268_v5, %v2191_v13  ;;  %8480 = vst [vmem:[#allocation55_spill] sm:$0xff] %v6696_v31  ;;  %v6762_v31 = vld [vmem:[#allocation2 + $0x122] sm:$0xff] }
 0x422   : > { %v2296_v56 = vsel %vm2228_vm1, %v2191_v13, %v2264_v19  ;;  %v6613_v8 = vld [vmem:[#allocation2 + $0x169] sm:$0xff]  ;;  %v6708_v13 = vld [vmem:[#allocation2 + $0xb2] sm:$0xff]  ;;  %v6712_v19 = vpop.permute.xlu0 %2661 }
 0x423   : > { %2328 = vst.msk [vmem:[#allocation2 + $0x171] sm:$0xff] %vm279_vm0, %v2296_v56  ;;  %2711 = vrot.lane.b32.xlu1 %v6613_v8, %s4564_s26 }
 0x424   : > { %8482 = vst [vmem:[#allocation58_spill] sm:$0xff] %v6712_v19 }
 0x425   : > { %v2193_v29 = vpop.f32.mrf.mxu2  ;;  %2709 = vrot.lane.b32.xlu0 %v6618_v38, %s4564_s26 }
 0x426   : > { %v2194_v21 = vadd.f32 %v6255_v54, %v2193_v29 }
 0x428   : > { %vm2229_vm11 = vcmp.gt.f32.partialorder %v2194_v21, 0.0  ;;  %v2265_v33 = vmul.f32 %v6268_v5, %v2194_v21 }
 0x42a   : > { %v2297_v52 = vsel %vm2229_vm11, %v2194_v21, %v2265_v33  ;;  %v6624_v32 = vld [vmem:[#allocation2 + $0x171] sm:$0xff]  ;;  %v6718_v21 = vld [vmem:[#allocation2 + $0xe2] sm:$0xff] }
 0x42b   : > { %2329 = vst.msk [vmem:[#allocation2 + $0x181] sm:$0xff] %vm279_vm0, %v2297_v52  ;;  %2781 = vrot.lane.b32.xlu1 %v2396_v51, %s4565_s8  ;;  %2713 = vrot.lane.b32.xlu2 %v6624_v32, %s4564_s26  ;;  %v6720_v33 = vld [vmem:[#allocation2 + $0xca] sm:$0xff]  ;;  %v6726_v51 = vld [vmem:[#allocation2 + $0xda] sm:$0xff]  ;;  %s7745_s26 = scalar_lea.vmem %s8047_s7, %s4480_s27 }
 0x42d   : > { %v2196_v16 = vpop.f32.mrf.mxu2  ;;  %2779 = vrot.lane.b32.xlu0 %v2395_v15, %s4565_s8 }
 0x42e   : > { %v2197_v48 = vadd.f32 %v6255_v54, %v2196_v16  ;;  %v6648_v54 = vpop.permute.xlu2 %2659 }
 0x42f   : > { %8474 = vst [vmem:[#allocation51_spill] sm:$0xff] %v6648_v54  ;;  %v6730_v52 = vpop.permute.xlu0 %2667  ;;  %v6770_v54 = vld [vmem:[#allocation2 + $0x152] sm:$0xff] }
 0x430   : > { %vm2230_vm12 = vcmp.gt.f32.partialorder %v2197_v48, 0.0  ;;  %v2266_v63 = vmul.f32 %v6268_v5, %v2197_v48  ;;  %v6650_v5 = vld [vmem:[#allocation2 + $0x52] sm:$0xff]  ;;  %8485 = vst [vmem:[#allocation44_spill] sm:$0xff] %v6730_v52  ;;  %v6754_v52 = vld [vmem:[#allocation2 + $0x12a] sm:$0xff] }
 0x431   : > { %8492 = vst [vmem:[#allocation27_spill] sm:$0xff] %v6770_v54 }
 0x432   : > { %v2298_v24 = vsel %vm2230_vm12, %v2197_v48, %v2266_v63  ;;  %v6736_v48 = vld [vmem:[#allocation2 + $0x10a] sm:$0xff]  ;;  %v6738_v63 = vld [vmem:[#allocation2 + $0xf2] sm:$0xff] }
 0x433   : > { %2330 = vst.msk [vmem:[#allocation2 + $0x189] sm:$0xff] %vm279_vm0, %v2298_v24  ;;  %2787 = vrot.lane.b32.xlu1 %v6635_v17, %s4565_s8  ;;  %2783 = vrot.lane.b32.xlu2 %v6637_v18, %s4565_s8  ;;  %v6744_v24 = vld [vmem:[#allocation2 + $0xfa] sm:$0xff] }
 0x435   : > { %2785 = vrot.lane.b32.xlu0 %v6644_v60, %s4565_s8 }
 0x436   : > { %v6664_v1 = vpop.permute.xlu2 %2665 }
 0x437   : > { %8476 = vst [vmem:[#allocation54_spill] sm:$0xff] %v6664_v1  ;;  %v6714_v56 = vpop.permute.xlu1 %2669  ;;  %v6756_v1 = vld [vmem:[#allocation2 + $0x112] sm:$0xff] }
 0x438   : > { %8483 = vst [vmem:[#allocation12_spill] sm:$0xff] %v6714_v56 }
 0x43b   : > { %2793 = vrot.lane.b32.xlu1 %v6650_v5, %s4565_s8  ;;  %2789 = vrot.lane.b32.xlu2 %v6652_v4, %s4565_s8 }
 0x43d   : > { %2791 = vrot.lane.b32.xlu0 %v6658_v43, %s4565_s8 }
 0x43e   : > { %v6680_v14 = vpop.permute.xlu2 %2671 }
 0x43f   : > { %8478 = vst [vmem:[#allocation39_spill] sm:$0xff] %v6680_v14 }
 0x443   : > { %2799 = vrot.lane.b32.xlu1 %v6666_v42, %s4565_s8  ;;  %2795 = vrot.lane.b32.xlu2 %v6668_v46, %s4565_s8 }
 0x445   : > { %2797 = vrot.lane.b32.xlu0 %v6674_v9, %s4565_s8 }
 0x446   : > { %v6698_v53 = vpop.permute.xlu2 %2677 }
 0x447   : > { %8481 = vst [vmem:[#allocation4_spill] sm:$0xff] %v6698_v53  ;;  %v6748_v14 = vpop.permute.xlu0 %2673 }
 0x448   : > { %8488 = vst [vmem:[#allocation14_spill] sm:$0xff] %v6748_v14 }
 0x44b   : > { %2805 = vrot.lane.b32.xlu1 %v6682_v0, %s4565_s8  ;;  %2801 = vrot.lane.b32.xlu2 %v6684_v58, %s4565_s8 }
 0x44d   : > { %2803 = vrot.lane.b32.xlu0 %v6690_v23, %s4565_s8 }
 0x44f   : > { %v6732_v15 = vpop.permute.xlu1 %2675 }
 0x450   : > { %8486 = vst [vmem:[#allocation75_spill] sm:$0xff] %v6732_v15 }
 0x453   : > { %2811 = vrot.lane.b32.xlu1 %v6700_v50, %s4565_s8  ;;  %2807 = vrot.lane.b32.xlu2 %v6702_v40, %s4565_s8 }
 0x455   : > { %2809 = vrot.lane.b32.xlu0 %v6708_v13, %s4565_s8 }
 0x457   : > { %v6716_v29 = vpop.permute.xlu2 %2683 }
 0x458   : > { %8484 = vst [vmem:[#allocation26_spill] sm:$0xff] %v6716_v29 }
 0x45b   : > { %2817 = vrot.lane.b32.xlu1 %v6718_v21, %s4565_s8  ;;  %2813 = vrot.lane.b32.xlu2 %v6720_v33, %s4565_s8 }
 0x45d   : > { %2815 = vrot.lane.b32.xlu0 %v6726_v51, %s4565_s8 }
 0x45f   : > { %v6766_v14 = vpop.permute.xlu0 %2679 }
 0x460   : > { %v6734_v16 = vpop.permute.xlu2 %2689  ;;  %8490 = vst [vmem:[#allocation78_spill] sm:$0xff] %v6766_v14 }
 0x461   : > { %8487 = vst [vmem:[#allocation13_spill] sm:$0xff] %v6734_v16  ;;  %v2424_v16 = vld [vmem:[#allocation2 + $0x15a] sm:$0xff] }
 0x463   : > { %2823 = vrot.lane.b32.xlu1 %v6736_v48, %s4565_s8  ;;  %2819 = vrot.lane.b32.xlu2 %v6738_v63, %s4565_s8 }
 0x465   : > { %2821 = vrot.lane.b32.xlu0 %v6744_v24, %s4565_s8 }
 0x467   : > { %v6750_v15 = vpop.permute.xlu1 %2681 }
 0x468   : > { %v6752_v56 = vpop.permute.xlu2 %2695 }
 0x469   : > { %8489 = vst [vmem:[#allocation59_spill] sm:$0xff] %v6752_v56  ;;  %v2426_v56 = vld [vmem:[#allocation2 + $0x172] sm:$0xff] }
 0x46b   : > { %2829 = vrot.lane.b32.xlu1 %v6754_v52, %s4565_s8  ;;  %2825 = vrot.lane.b32.xlu2 %v6756_v1, %s4565_s8 }
 0x46d   : > { %2827 = vrot.lane.b32.xlu0 %v6762_v31, %s4565_s8 }
 0x46f   : > { %v6768_v19 = vpop.permute.xlu1 %2687 }
 0x470   : > { %8491 = vst [vmem:[#allocation6_spill] sm:$0xff] %v6768_v19  ;;  %v6774_v44 = vpop.permute.xlu2 %2701  ;;  %v2335_v19 = vld [vmem:[#allocation2 + $0x30] sm:$0xff] }
 0x471   : > { %8494 = vst [vmem:[#allocation63_spill] sm:$0xff] %v6774_v44  ;;  %v2425_v44 = vld [vmem:[#allocation2 + $0x16a] sm:$0xff] }
 0x473   : > { %2835 = vrot.lane.b32.xlu1 %v6770_v54, %s4565_s8  ;;  %2831 = vrot.lane.b32.xlu2 %v6772_v59, %s4565_s8  ;;  %v6795_v54 = vld [vmem:[#allocation2 + $0x18] sm:$0xff] }
 0x474   : > { %8499 = vst [vmem:[#allocation142_spill] sm:$0xff] %v6795_v54 }
 0x475   : > { %2833 = vrot.lane.b32.xlu0 %v6780_v27, %s4565_s8 }
 0x477   : > { %v6784_v2 = vpop.permute.xlu0 %2685  ;;  %v6786_v29 = vpop.permute.xlu1 %2693 }
 0x478   : > { %8495 = vst [vmem:[#allocation24_spill] sm:$0xff] %v6784_v2  ;;  %v6790_v53 = vpop.permute.xlu2 %2707  ;;  %v2339_v2 = vld [vmem:[#allocation2 + $0x60] sm:$0xff] }
 0x479   : > { %8496 = vst [vmem:[#allocation61_spill] sm:$0xff] %v6786_v29  ;;  %v2336_v29 = vld [vmem:[#allocation2 + $0x38] sm:$0xff] }
 0x47a   : > { %8497 = vst [vmem:[#allocation65_spill] sm:$0xff] %v6790_v53 }
 0x47b   : > { %2841 = vrot.lane.b32.xlu1 %v2426_v56, %s4565_s8  ;;  %2837 = vrot.lane.b32.xlu2 %v2424_v16, %s4565_s8  ;;  %v2334_v56 = vld [vmem:[#allocation2 + $0x20] sm:$0xff] }
 0x47d   : > { %2839 = vrot.lane.b32.xlu0 %v2425_v44, %s4565_s8  ;;  %v2338_v44 = vld [vmem:[#allocation2 + $0x50] sm:$0xff] }
 0x47f   : > { %v6793_v14 = vpop.permute.xlu0 %2691  ;;  %v6797_v59 = vpop.permute.xlu1 %2699 }
 0x480   : > { %8498 = vst [vmem:[#allocation132_spill] sm:$0xff] %v6793_v14  ;;  %v2337_v14 = vld [vmem:[#allocation2 + $0x48] sm:$0xff] }
 0x481   : > { %8500 = vst [vmem:[#allocation151_spill] sm:$0xff] %v6797_v59 }
 0x483   : > { %2911 = vrot.lane.b32.xlu1 %v2335_v19, %s4566_s9  ;;  %2907 = vrot.lane.b32.xlu2 %v6795_v54, %s4566_s9 }
 0x485   : > { %2909 = vrot.lane.b32.xlu0 %v2334_v56, %s4566_s9  ;;  %v6803_v16 = vpop.permute.xlu2 %2713  ;;  %v2341_v56 = vld [vmem:[#allocation2 + $0x78] sm:$0xff] }
 0x486   : > { %8501 = vst [vmem:[#allocation163_spill] sm:$0xff] %v6803_v16  ;;  %v2340_v16 = vld [vmem:[#allocation2 + $0x68] sm:$0xff] }
 0x487   : > { %v6805_v53 = vpop.permute.xlu0 %2697  ;;  %v6809_v59 = vpop.permute.xlu1 %2705 }
 0x488   : > { %8502 = vst [vmem:[#allocation15_spill] sm:$0xff] %v6805_v53 }
 0x489   : > { %8503 = vst [vmem:[#allocation32_spill] sm:$0xff] %v6809_v59  ;;  %v6891_v59 = vld [vmem:[#allocation2 + $0x128] sm:$0xff] }
 0x48a   : > { %8530 = vst [vmem:[#allocation33_spill] sm:$0xff] %v6891_v59 }
 0x48b   : > { %2917 = vrot.lane.b32.xlu1 %v2338_v44, %s4566_s9  ;;  %2913 = vrot.lane.b32.xlu2 %v2336_v29, %s4566_s9 }
 0x48d   : > { %2915 = vrot.lane.b32.xlu0 %v2337_v14, %s4566_s9  ;;  %v6812_v19 = vpop.permute.xlu2 %2783  ;;  %v6825_v14 = vld [vmem:[#allocation2 + $0x98] sm:$0xff] }
 0x48e   : > { %8504 = vst [vmem:[#allocation49_spill] sm:$0xff] %v6812_v19  ;;  %v2342_v19 = vld [vmem:[#allocation2 + $0x80] sm:$0xff] }
 0x48f   : > { %v6814_v54 = vpop.permute.xlu0 %2703  ;;  %8509 = vst [vmem:[#allocation30_spill] sm:$0xff] %v6825_v14 }
 0x490   : > { %8505 = vst [vmem:[#allocation79_spill] sm:$0xff] %v6814_v54 }
 0x493   : > { %2923 = vrot.lane.b32.xlu1 %v2341_v56, %s4566_s9  ;;  %2919 = vrot.lane.b32.xlu2 %v2339_v2, %s4566_s9  ;;  %v2343_v56 = vld [vmem:[#allocation2 + $0x90] sm:$0xff] }
 0x495   : > { %v6818_v53 = vpop.permute.xlu1 %2711  ;;  %2921 = vrot.lane.b32.xlu0 %v2340_v16, %s4566_s9  ;;  %v6821_v29 = vpop.permute.xlu2 %2789 }
 0x496   : > { %8506 = vst [vmem:[#allocation92_spill] sm:$0xff] %v6818_v53  ;;  %v6875_v53 = vld [vmem:[#allocation2 + $0xf0] sm:$0xff] }
 0x497   : > { %8507 = vst [vmem:[#allocation93_spill] sm:$0xff] %v6821_v29  ;;  %v6823_v44 = vpop.permute.xlu0 %2709  ;;  %v6837_v29 = vld [vmem:[#allocation2 + $0xc0] sm:$0xff] }
 0x498   : > { %8508 = vst [vmem:[#allocation112_spill] sm:$0xff] %v6823_v44  ;;  %v6839_v44 = vld [vmem:[#allocation2 + $0xa8] sm:$0xff] }
 0x499   : > { %8513 = vst [vmem:[#allocation134_spill] sm:$0xff] %v6837_v29 }
 0x49a   : > { %8514 = vst [vmem:[#allocation155_spill] sm:$0xff] %v6839_v44 }
 0x49b   : > { %2929 = vrot.lane.b32.xlu1 %v6825_v14, %s4566_s9  ;;  %2925 = vrot.lane.b32.xlu2 %v2342_v19, %s4566_s9  ;;  %v6845_v19 = vld [vmem:[#allocation2 + $0xb0] sm:$0xff]  ;;  %v6857_v14 = vld [vmem:[#allocation2 + $0xc8] sm:$0xff]  ;;  %8525 = vst [vmem:[#allocation130_spill] sm:$0xff] %v6875_v53 }
 0x49c   : > { %8519 = vst [vmem:[#allocation90_spill] sm:$0xff] %v6857_v14 }
 0x49d   : > { %v6830_v54 = vpop.permute.xlu1 %2781  ;;  %2927 = vrot.lane.b32.xlu0 %v2343_v56, %s4566_s9  ;;  %v6833_v2 = vpop.permute.xlu2 %2795 }
 0x49e   : > { %8510 = vst [vmem:[#allocation48_spill] sm:$0xff] %v6830_v54 }
 0x49f   : > { %8511 = vst [vmem:[#allocation120_spill] sm:$0xff] %v6833_v2  ;;  %v6835_v16 = vpop.permute.xlu0 %2779 }
 0x4a0   : > { %8512 = vst [vmem:[#allocation133_spill] sm:$0xff] %v6835_v16  ;;  %v6855_v16 = vld [vmem:[#allocation2 + $0xe0] sm:$0xff] }
 0x4a1   : > { %8518 = vst [vmem:[#allocation82_spill] sm:$0xff] %v6855_v16 }
 0x4a3   : > { %2935 = vrot.lane.b32.xlu1 %v6837_v29, %s4566_s9  ;;  %2931 = vrot.lane.b32.xlu2 %v6839_v44, %s4566_s9  ;;  %v6863_v29 = vld [vmem:[#allocation2 + $0xd8] sm:$0xff]  ;;  %v6873_v44 = vld [vmem:[#allocation2 + $0x108] sm:$0xff] }
 0x4a4   : > { %8520 = vst [vmem:[#allocation101_spill] sm:$0xff] %v6863_v29 }
 0x4a5   : > { %2933 = vrot.lane.b32.xlu0 %v6845_v19, %s4566_s9  ;;  %v6849_v56 = vpop.permute.xlu1 %2787  ;;  %v6851_v2 = vpop.permute.xlu2 %2801  ;;  %8524 = vst [vmem:[#allocation122_spill] sm:$0xff] %v6873_v44 }
 0x4a6   : > { %8515 = vst [vmem:[#allocation16_spill] sm:$0xff] %v6849_v56 }
 0x4a7   : > { %8516 = vst [vmem:[#allocation17_spill] sm:$0xff] %v6851_v2  ;;  %v6853_v54 = vpop.permute.xlu0 %2785 }
 0x4a8   : > { %8517 = vst [vmem:[#allocation64_spill] sm:$0xff] %v6853_v54 }
 0x4ab   : > { %2941 = vrot.lane.b32.xlu1 %v6855_v16, %s4566_s9  ;;  %2937 = vrot.lane.b32.xlu2 %v6857_v14, %s4566_s9  ;;  %v6881_v16 = vld [vmem:[#allocation2 + $0xf8] sm:$0xff]  ;;  %v6893_v14 = vld [vmem:[#allocation2 + $0x110] sm:$0xff] }
 0x4ac   : > { %8526 = vst [vmem:[#allocation143_spill] sm:$0xff] %v6881_v16 }
 0x4ad   : > { %2939 = vrot.lane.b32.xlu0 %v6863_v29, %s4566_s9  ;;  %v6867_v56 = vpop.permute.xlu1 %2793  ;;  %v6869_v2 = vpop.permute.xlu2 %2807  ;;  %8531 = vst [vmem:[#allocation67_spill] sm:$0xff] %v6893_v14  ;;  %v2457_v29 = vld [vmem:[#allocation2 + $0x180] sm:$0xff] }
 0x4ae   : > { %8521 = vst [vmem:[#allocation113_spill] sm:$0xff] %v6867_v56 }
 0x4af   : > { %8522 = vst [vmem:[#allocation114_spill] sm:$0xff] %v6869_v2  ;;  %v6871_v54 = vpop.permute.xlu0 %2791 }
 0x4b0   : > { %8523 = vst [vmem:[#allocation119_spill] sm:$0xff] %v6871_v54 }
 0x4b3   : > { %2947 = vrot.lane.b32.xlu1 %v6873_v44, %s4566_s9  ;;  %2943 = vrot.lane.b32.xlu2 %v6875_v53, %s4566_s9  ;;  %v6899_v44 = vld [vmem:[#allocation2 + $0x120] sm:$0xff]  ;;  %v6909_v53 = vld [vmem:[#allocation2 + $0x138] sm:$0xff] }
 0x4b4   : > { %8532 = vst [vmem:[#allocation68_spill] sm:$0xff] %v6899_v44 }
 0x4b5   : > { %2945 = vrot.lane.b32.xlu0 %v6881_v16, %s4566_s9  ;;  %v6885_v56 = vpop.permute.xlu1 %2799  ;;  %v6887_v2 = vpop.permute.xlu2 %2813  ;;  %8536 = vst [vmem:[#allocation117_spill] sm:$0xff] %v6909_v53 }
 0x4b6   : > { %8527 = vst [vmem:[#allocation156_spill] sm:$0xff] %v6885_v56 }
 0x4b7   : > { %8528 = vst [vmem:[#allocation157_spill] sm:$0xff] %v6887_v2  ;;  %v6889_v54 = vpop.permute.xlu0 %2797  ;;  %v2359_v2 = vld [vmem:[#allocation2 + $0x150] sm:$0xff] }
 0x4b8   : > { %8529 = vst [vmem:[#allocation8_spill] sm:$0xff] %v6889_v54 }
 0x4bb   : > { %2953 = vrot.lane.b32.xlu1 %v6891_v59, %s4566_s9  ;;  %2949 = vrot.lane.b32.xlu2 %v6893_v14, %s4566_s9  ;;  %v6914_v59 = vld [vmem:[#allocation2 + $0x140] sm:$0xff]  ;;  %v6924_v14 = vld [vmem:[#allocation2 + $0x158] sm:$0xff] }
 0x4bc   : > { %8537 = vst [vmem:[#allocation71_spill] sm:$0xff] %v6914_v59 }
 0x4bd   : > { %2951 = vrot.lane.b32.xlu0 %v6899_v44, %s4566_s9  ;;  %v6903_v56 = vpop.permute.xlu1 %2805  ;;  %v6905_v16 = vpop.permute.xlu2 %2819  ;;  %8541 = vst [vmem:[#allocation153_spill] sm:$0xff] %v6924_v14 }
 0x4be   : > { %8533 = vst [vmem:[#allocation94_spill] sm:$0xff] %v6903_v56 }
 0x4bf   : > { %8534 = vst [vmem:[#allocation103_spill] sm:$0xff] %v6905_v16  ;;  %v6907_v54 = vpop.permute.xlu0 %2803 }
 0x4c0   : > { %8535 = vst [vmem:[#allocation110_spill] sm:$0xff] %v6907_v54  ;;  %v2362_v54 = vld [vmem:[#allocation2 + $0x170] sm:$0xff] }
 0x4c3   : > { %2959 = vrot.lane.b32.xlu1 %v2359_v2, %s4566_s9  ;;  %2955 = vrot.lane.b32.xlu2 %v6909_v53, %s4566_s9  ;;  %v6929_v2 = vld [vmem:[#allocation2 + $0x168] sm:$0xff] }
 0x4c4   : > { %8542 = vst [vmem:[#allocation18_spill] sm:$0xff] %v6929_v2 }
 0x4c5   : > { %2957 = vrot.lane.b32.xlu0 %v6914_v59, %s4566_s9  ;;  %v6918_v44 = vpop.permute.xlu1 %2811  ;;  %v6920_v56 = vpop.permute.xlu2 %2825  ;;  %v2459_v59 = vld [vmem:[#allocation2 + $0x19] sm:$0xff] }
 0x4c6   : > { %8538 = vst [vmem:[#allocation66_spill] sm:$0xff] %v6918_v44 }
 0x4c7   : > { %8539 = vst [vmem:[#allocation135_spill] sm:$0xff] %v6920_v56  ;;  %v6922_v16 = vpop.permute.xlu0 %2809 }
 0x4c8   : > { %8540 = vst [vmem:[#allocation145_spill] sm:$0xff] %v6922_v16 }
 0x4cb   : > { %2965 = vrot.lane.b32.xlu1 %v2362_v54, %s4566_s9  ;;  %2961 = vrot.lane.b32.xlu2 %v6924_v14, %s4566_s9  ;;  %v2458_v54 = vld [vmem:[#allocation2 + $0x188] sm:$0xff] }
 0x4cd   : > { %2963 = vrot.lane.b32.xlu0 %v6929_v2, %s4566_s9  ;;  %v6933_v53 = vpop.permute.xlu1 %2817  ;;  %v6935_v44 = vpop.permute.xlu2 %2831 }
 0x4ce   : > { %8543 = vst [vmem:[#allocation35_spill] sm:$0xff] %v6933_v53  ;;  %v2460_v53 = vld [vmem:[#allocation2 + $0x21] sm:$0xff] }
 0x4cf   : > { %v6937_v56 = vpop.permute.xlu0 %2815 }
 0x4d3   : > { %3035 = vrot.lane.b32.xlu1 %v2459_v59, %s4567_s10  ;;  %2967 = vrot.lane.b32.xlu2 %v2457_v29, %s4566_s9 }
 0x4d5   : > { %2969 = vrot.lane.b32.xlu0 %v2458_v54, %s4566_s9  ;;  %v6942_v14 = vpop.permute.xlu1 %2823  ;;  %v6944_v16 = vpop.permute.xlu2 %2837 }
 0x4d7   : > { %v6946_v2 = vpop.permute.xlu0 %2821 }
 0x4db   : > { %3041 = vrot.lane.b32.xlu1 %v6432_v26, %s4567_s10  ;;  %3037 = vrot.lane.b32.xlu2 %v2460_v53, %s4567_s10 }
 0x4dd   : > { %3039 = vrot.lane.b32.xlu0 %v6409_v6, %s4567_s10  ;;  %v6953_v59 = vpop.permute.xlu1 %2829  ;;  %v6955_v29 = vpop.permute.xlu2 %2907 }
 0x4df   : > { %v6957_v54 = vpop.permute.xlu0 %2827 }
 0x4e3   : > { %3047 = vrot.lane.b32.xlu1 %v6466_v34, %s4567_s10  ;;  %3043 = vrot.lane.b32.xlu2 %v6449_v10, %s4567_s10 }
 0x4e5   : > { %3045 = vrot.lane.b32.xlu0 %v6456_v36, %s4567_s10  ;;  %v6965_v26 = vpop.permute.xlu1 %2835  ;;  %v6967_v53 = vpop.permute.xlu2 %2913 }
 0x4e6   : > { %8544 = vst [vmem:[#allocation53_spill] sm:$0xff] %v6965_v26 }
 0x4e7   : > { %v6969_v6 = vpop.permute.xlu0 %2833 }
 0x4eb   : > { %3053 = vrot.lane.b32.xlu1 %v6496_v61, %s4567_s10  ;;  %3049 = vrot.lane.b32.xlu2 %v6476_v39, %s4567_s10 }
 0x4ed   : > { %3051 = vrot.lane.b32.xlu0 %v6486_v55, %s4567_s10  ;;  %v6977_v34 = vpop.permute.xlu1 %2841  ;;  %v6979_v10 = vpop.permute.xlu2 %2919 }
 0x4ee   : > { %8545 = vst [vmem:[#allocation83_spill] sm:$0xff] %v6977_v34  ;;  %v7055_v34 = vld [vmem:[#allocation2 + $0x181] sm:$0xff] }
 0x4ef   : > { %8546 = vst [vmem:[#allocation95_spill] sm:$0xff] %v6979_v10  ;;  %v6981_v36 = vpop.permute.xlu0 %2839 }
 0x4f3   : > { %3059 = vrot.lane.b32.xlu1 %v6526_v47, %s4567_s10  ;;  %3055 = vrot.lane.b32.xlu2 %v6506_v3, %s4567_s10 }
 0x4f5   : > { %3057 = vrot.lane.b32.xlu0 %v6516_v30, %s4567_s10  ;;  %v6989_v61 = vpop.permute.xlu1 %2911  ;;  %v6991_v39 = vpop.permute.xlu2 %2925 }
 0x4f6   : > { %8547 = vst [vmem:[#allocation96_spill] sm:$0xff] %v6991_v39 }
 0x4f7   : > { %v6993_v55 = vpop.permute.xlu0 %2909 }
 0x4fb   : > { %3065 = vrot.lane.b32.xlu1 %v6560_v57, %s4567_s10  ;;  %3061 = vrot.lane.b32.xlu2 %v6536_v45, %s4567_s10 }
 0x4fd   : > { %3063 = vrot.lane.b32.xlu0 %v6548_v49, %s4567_s10  ;;  %v7001_v47 = vpop.permute.xlu1 %2917  ;;  %v7003_v3 = vpop.permute.xlu2 %2931 }
 0x4fe   : > { %8548 = vst [vmem:[#allocation115_spill] sm:$0xff] %v7003_v3  ;;  %v7069_v3 = vld [vmem:[#allocation2 + $0x189] sm:$0xff] }
 0x4ff   : > { %v7005_v30 = vpop.permute.xlu0 %2915  ;;  %8553 = vst [vmem:[#allocation137_spill] sm:$0xff] %v7069_v3 }
 0x503   : > { %3071 = vrot.lane.b32.xlu1 %v6575_v12, %s4567_s10  ;;  %3067 = vrot.lane.b32.xlu2 %v6546_v22, %s4567_s10 }
 0x505   : > { %3069 = vrot.lane.b32.xlu0 %v6566_v25, %s4567_s10  ;;  %v7013_v57 = vpop.permute.xlu1 %2923  ;;  %v7015_v45 = vpop.permute.xlu2 %2937 }
 0x506   : > { %8549 = vst [vmem:[#allocation37_spill] sm:$0xff] %v7013_v57 }
 0x507   : > { %v7017_v49 = vpop.permute.xlu0 %2921 }
 0x508   : > { %8550 = vst [vmem:[#allocation56_spill] sm:$0xff] %v7017_v49 }
 0x50b   : > { %3077 = vrot.lane.b32.xlu1 %v6590_v62, %s4567_s10  ;;  %3073 = vrot.lane.b32.xlu2 %v6558_v41, %s4567_s10 }
 0x50d   : > { %3075 = vrot.lane.b32.xlu0 %v6581_v28, %s4567_s10  ;;  %v7025_v12 = vpop.permute.xlu1 %2929  ;;  %v7027_v22 = vpop.permute.xlu2 %2943 }
 0x50e   : > { %8551 = vst [vmem:[#allocation123_spill] sm:$0xff] %v7025_v12 }
 0x50f   : > { %v7029_v25 = vpop.permute.xlu0 %2927 }
 0x510   : > { %8552 = vst [vmem:[#allocation136_spill] sm:$0xff] %v7029_v25 }
 0x513   : > { %3083 = vrot.lane.b32.xlu1 %v6603_v7, %s4567_s10  ;;  %3079 = vrot.lane.b32.xlu2 %v6573_v20, %s4567_s10 }
 0x515   : > { %3081 = vrot.lane.b32.xlu0 %v6596_v37, %s4567_s10  ;;  %v7037_v62 = vpop.permute.xlu1 %2935  ;;  %v7039_v41 = vpop.permute.xlu2 %2949 }
 0x517   : > { %v7041_v28 = vpop.permute.xlu0 %2933 }
 0x51b   : > { %3089 = vrot.lane.b32.xlu1 %v6618_v38, %s4567_s10  ;;  %3085 = vrot.lane.b32.xlu2 %v6588_v35, %s4567_s10 }
 0x51d   : > { %3087 = vrot.lane.b32.xlu0 %v6607_v11, %s4567_s10  ;;  %v7049_v7 = vpop.permute.xlu1 %2941  ;;  %v7051_v20 = vpop.permute.xlu2 %2955 }
 0x51f   : > { %v7053_v37 = vpop.permute.xlu0 %2939 }
 0x523   : > { %3095 = vrot.lane.b32.xlu1 %v7055_v34, %s4567_s10  ;;  %3091 = vrot.lane.b32.xlu2 %v6613_v8, %s4567_s10 }
 0x525   : > { %3093 = vrot.lane.b32.xlu0 %v6624_v32, %s4567_s10  ;;  %v7063_v35 = vpop.permute.xlu1 %2947  ;;  %v7065_v11 = vpop.permute.xlu2 %2961 }
 0x527   : > { %v7067_v38 = vpop.permute.xlu0 %2945 }
 0x52b   : > { %3165 = vrot.lane.b32.xlu1 %v6644_v60, %s4568_s11  ;;  %3097 = vrot.lane.b32.xlu2 %v7069_v3, %s4567_s10 }
 0x52d   : > { %3163 = vrot.lane.b32.xlu0 %v6637_v18, %s4568_s11  ;;  %v7077_v8 = vpop.permute.xlu1 %2953  ;;  %v7079_v32 = vpop.permute.xlu2 %2967 }
 0x52f   : > { %v7081_v26 = vpop.permute.xlu0 %2951 }
 0x533   : > { %3171 = vrot.lane.b32.xlu1 %v6658_v43, %s4568_s11  ;;  %3167 = vrot.lane.b32.xlu2 %v6635_v17, %s4568_s11 }
 0x535   : > { %3169 = vrot.lane.b32.xlu0 %v6652_v4, %s4568_s11  ;;  %v7089_v60 = vpop.permute.xlu1 %2959  ;;  %v7091_v12 = vpop.permute.xlu2 %3037 }
 0x537   : > { %v7093_v18 = vpop.permute.xlu0 %2957 }
 0x53b   : > { %3177 = vrot.lane.b32.xlu1 %v6674_v9, %s4568_s11  ;;  %3173 = vrot.lane.b32.xlu2 %v6650_v5, %s4568_s11 }
 0x53d   : > { %3175 = vrot.lane.b32.xlu0 %v6668_v46, %s4568_s11  ;;  %v7101_v43 = vpop.permute.xlu1 %2965  ;;  %v7103_v25 = vpop.permute.xlu2 %3043 }
 0x53f   : > { %v7105_v4 = vpop.permute.xlu0 %2963 }
 0x540   : > { %8554 = vst [vmem:[#allocation158_spill] sm:$0xff] %v7105_v4 }
 0x543   : > { %3183 = vrot.lane.b32.xlu1 %v6690_v23, %s4568_s11  ;;  %3179 = vrot.lane.b32.xlu2 %v6666_v42, %s4568_s11 }
 0x545   : > { %3181 = vrot.lane.b32.xlu0 %v6684_v58, %s4568_s11  ;;  %v7113_v9 = vpop.permute.xlu1 %3035  ;;  %v7115_v5 = vpop.permute.xlu2 %3049 }
 0x546   : > { %8555 = vst [vmem:[#allocation20_spill] sm:$0xff] %v7115_v5  ;;  %v8566_v5 = vld [vmem:[#allocation6_spill] sm:$0xff] }
 0x547   : > { %v7117_v46 = vpop.permute.xlu0 %2969 }
 0x548   : > { %8556 = vst [vmem:[#allocation21_spill] sm:$0xff] %v7117_v46 }
 0x54b   : > { %3189 = vrot.lane.b32.xlu1 %v6708_v13, %s4568_s11  ;;  %3185 = vrot.lane.b32.xlu2 %v6682_v0, %s4568_s11 }
 0x54d   : > { %3187 = vrot.lane.b32.xlu0 %v6702_v40, %s4568_s11  ;;  %v7125_v23 = vpop.permute.xlu1 %3041  ;;  %v7127_v42 = vpop.permute.xlu2 %3055 }
 0x54e   : > { %8557 = vst [vmem:[#allocation69_spill] sm:$0xff] %v7127_v42  ;;  %v3658_v42 = vsel %vm279_vm0, %v6845_v19, %v6750_v15 }
 0x54f   : > { %v7129_v58 = vpop.permute.xlu0 %3039 }
 0x553   : > { %3195 = vrot.lane.b32.xlu1 %v6726_v51, %s4568_s11  ;;  %3191 = vrot.lane.b32.xlu2 %v6700_v50, %s4568_s11 }
 0x555   : > { %3193 = vrot.lane.b32.xlu0 %v6720_v33, %s4568_s11  ;;  %v7137_v13 = vpop.permute.xlu1 %3047  ;;  %v7139_v0 = vpop.permute.xlu2 %3061 }
 0x556   : > { %8558 = vst [vmem:[#allocation84_spill] sm:$0xff] %v7137_v13 }
 0x557   : > { %v7141_v40 = vpop.permute.xlu0 %3045 }
 0x558   : > { %8559 = vst [vmem:[#allocation91_spill] sm:$0xff] %v7141_v40 }
 0x55b   : > { %3201 = vrot.lane.b32.xlu1 %v6744_v24, %s4568_s11  ;;  %3197 = vrot.lane.b32.xlu2 %v6718_v21, %s4568_s11 }
 0x55d   : > { %3199 = vrot.lane.b32.xlu0 %v6738_v63, %s4568_s11  ;;  %v7149_v51 = vpop.permute.xlu1 %3053  ;;  %v7151_v50 = vpop.permute.xlu2 %3067 }
 0x55e   : > { %8560 = vst [vmem:[#allocation104_spill] sm:$0xff] %v7149_v51  ;;  %v8564_v51 = vld [vmem:[#allocation145_spill] sm:$0xff] }
 0x55f   : > { %v7153_v33 = vpop.permute.xlu0 %3051  ;;  %v3690_v39 = vsel %vm1745_vm3, %v3658_v42, %v8564_v51  ;;  %v8569_v42 = vld [vmem:[#allocation24_spill] sm:$0xff]  ;;  %v8570_v51 = vld [vmem:[#allocation90_spill] sm:$0xff] }
 0x560   : > { %8561 = vst [vmem:[#allocation19_spill] sm:$0xff] %v7153_v33  ;;  %v8565_v33 = vld [vmem:[#allocation62_spill] sm:$0xff] }
 0x563   : > { %3207 = vrot.lane.b32.xlu1 %v6762_v31, %s4568_s11  ;;  %3203 = vrot.lane.b32.xlu2 %v6736_v48, %s4568_s11 }
 0x565   : > { %3205 = vrot.lane.b32.xlu0 %v6756_v1, %s4568_s11  ;;  %v7161_v46 = vpop.permute.xlu1 %3059  ;;  %v7163_v21 = vpop.permute.xlu2 %3073 }
 0x566   : > { %8562 = vst [vmem:[#allocation23_spill] sm:$0xff] %v7161_v46  ;;  %v3722_v46 = vsel %vm1778_vm4, %v3690_v39, %v7015_v45  ;;  %v8568_v39 = vld [vmem:[#allocation27_spill] sm:$0xff] }
 0x567   : > { %v7165_v4 = vpop.permute.xlu0 %3057 }
 0x568   : > { %8563 = vst [vmem:[#allocation70_spill] sm:$0xff] %v7165_v4 }
 0x56b   : > { %3213 = vrot.lane.b32.xlu1 %v6780_v27, %s4568_s11  ;;  %3209 = vrot.lane.b32.xlu2 %v6754_v52, %s4568_s11  ;;  %v2571_v27 = vld [vmem:[#allocation2 + $0xf1] sm:$0xff]  ;;  %v8567_v52 = vld [vmem:[#allocation101_spill] sm:$0xff] }
 0x56c   : > { %v3661_v49 = vsel %vm279_vm0, %v8567_v52, %v8566_v5 }
 0x56d   : > { %3211 = vrot.lane.b32.xlu0 %v8565_v33, %s4568_s11  ;;  %v3066_v4 = vpop.permute.xlu1 %3065  ;;  %v7180_v57 = vpop.permute.xlu2 %3079  ;;  %v3693_v45 = vsel %vm1745_vm3, %v3661_v49, %v6937_v56  ;;  %v8571_v33 = vld [vmem:[#allocation130_spill] sm:$0xff] }
 0x56e   : > { %v7183_v15 = vsel %vm1811_vm6, %v3722_v46, %v3066_v4  ;;  %v3660_v4 = vsel %vm279_vm0, %v8570_v51, %v8569_v42  ;;  %v3725_v46 = vsel %vm1778_vm4, %v3693_v45, %v7027_v22  ;;  %v2555_v22 = vld [vmem:[#allocation2 + $0x31] sm:$0xff] }
 0x56f   : > { %v7185_v19 = vpop.permute.xlu0 %3063  ;;  %v2523_v45 = vld [vmem:[#allocation2 + $0x30] sm:$0xff] }
 0x573   : > { %3451 = vrot.lane.b32.xlu1 %v2571_v27, %s4570_s13  ;;  %3215 = vrot.lane.b32.xlu2 %v8568_v39, %s4568_s11  ;;  %v8572_v27 = vld [vmem:[#allocation157_spill] sm:$0xff] }
 0x574   : > { %v3692_v52 = vsel %vm1745_vm3, %v3660_v4, %v8572_v27 }
 0x575   : > { %3323 = vrot.lane.b32.xlu0 %v8571_v33, %s4569_s12  ;;  %v3072_v13 = vpop.permute.xlu1 %3071  ;;  %v7202_v5 = vpop.permute.xlu2 %3085  ;;  %v3724_v56 = vsel %vm1778_vm4, %v3692_v52, %v7049_v7  ;;  %v2572_v7 = vld [vmem:[#allocation2 + $0xf9] sm:$0xff] }
 0x576   : > { %v7207_v39 = vsel %vm1811_vm6, %v3725_v46, %v3072_v13  ;;  %v8574_v46 = vld [vmem:[#allocation143_spill] sm:$0xff] }
 0x577   : > { %v3070_v49 = vpop.permute.xlu0 %3069 }
 0x578   : > { %v7212_v42 = vsel %vm1811_vm6, %v3724_v56, %v3070_v49  ;;  %v2556_v56 = vld [vmem:[#allocation2 + $0x39] sm:$0xff] }
 0x579   : > { %v8576_v49 = vld [vmem:[#allocation32_spill] sm:$0xff] }
 0x57b   : > { %3419 = vrot.lane.b32.xlu1 %v2555_v22, %s4570_s13  ;;  %3579 = vrot.lane.b32.xlu2 %v6738_v63, %s4571_s14  ;;  %v8577_v22 = vld [vmem:[#allocation71_spill] sm:$0xff] }
 0x57d   : > { %3291 = vrot.lane.b32.xlu0 %v2523_v45, %s4569_s12  ;;  %v7218_v51 = vpop.permute.xlu1 %3077  ;;  %v7220_v13 = vpop.permute.xlu2 %3091  ;;  %v3670_v45 = vsel %vm279_vm0, %v8577_v22, %v8576_v49  ;;  %v8579_v22 = vld [vmem:[#allocation92_spill] sm:$0xff] }
 0x57e   : > { %8573 = vst [vmem:[#allocation124_spill] sm:$0xff] %v7220_v13 }
 0x57f   : > { %v7222_v4 = vpop.permute.xlu0 %3075 }
 0x583   : > { %3453 = vrot.lane.b32.xlu1 %v2572_v7, %s4570_s13  ;;  %3325 = vrot.lane.b32.xlu2 %v8574_v46, %s4569_s12  ;;  %v3702_v7 = vsel %vm1745_vm3, %v3670_v45, %v6969_v6  ;;  %v8581_v6 = vld [vmem:[#allocation122_spill] sm:$0xff]  ;;  %v2588_v45 = vld [vmem:[#allocation2 + $0x3a] sm:$0xff] }
 0x584   : > { %v3734_v13 = vsel %vm1778_vm4, %v3702_v7, %v7065_v11  ;;  %v8582_v7 = vld [vmem:[#allocation112_spill] sm:$0xff] }
 0x585   : > { %3547 = vrot.lane.b32.xlu0 %v6635_v17, %s4571_s14  ;;  %v7229_v27 = vpop.permute.xlu1 %3083  ;;  %v7231_v63 = vpop.permute.xlu2 %3097  ;;  %v2524_v17 = vld [vmem:[#allocation2 + $0x38] sm:$0xff] }
 0x586   : > { %8575 = vst [vmem:[#allocation131_spill] sm:$0xff] %v7231_v63 }
 0x587   : > { %v7233_v52 = vpop.permute.xlu0 %3081 }
 0x58b   : > { %3421 = vrot.lane.b32.xlu1 %v2556_v56, %s4570_s13  ;;  %3581 = vrot.lane.b32.xlu2 %v6744_v24, %s4571_s14  ;;  %v2573_v56 = vld [vmem:[#allocation2 + $0x109] sm:$0xff] }
 0x58c   : > { %v8580_v24 = vld [vmem:[#allocation18_spill] sm:$0xff] }
 0x58d   : > { %3293 = vrot.lane.b32.xlu0 %v2524_v17, %s4569_s12  ;;  %v3090_v63 = vpop.permute.xlu1 %3089  ;;  %v7246_v10 = vpop.permute.xlu2 %3167  ;;  %v3673_v40 = vsel %vm279_vm0, %v8580_v24, %v8579_v22  ;;  %v8583_v17 = vld [vmem:[#allocation153_spill] sm:$0xff] }
 0x58e   : > { %v7249_v3 = vsel %vm1811_vm6, %v3734_v13, %v3090_v63  ;;  %v3705_v11 = vsel %vm1745_vm3, %v3673_v40, %v6981_v36  ;;  %v3672_v13 = vsel %vm279_vm0, %v8583_v17, %v8582_v7  ;;  %v2557_v17 = vld [vmem:[#allocation2 + $0x49] sm:$0xff] }
 0x58f   : > { %8578 = vst [vmem:[#allocation146_spill] sm:$0xff] %v7249_v3  ;;  %v7251_v49 = vpop.permute.xlu0 %3087  ;;  %v3737_v63 = vsel %vm1778_vm4, %v3705_v11, %v7079_v32  ;;  %v2525_v32 = vld [vmem:[#allocation2 + $0x48] sm:$0xff] }
 0x593   : > { %3455 = vrot.lane.b32.xlu1 %v2573_v56, %s4570_s13  ;;  %3327 = vrot.lane.b32.xlu2 %v8581_v6, %s4569_s12  ;;  %v3704_v56 = vsel %vm1745_vm3, %v3672_v13, %v6944_v16  ;;  %v2589_v13 = vld [vmem:[#allocation2 + $0x4a] sm:$0xff] }
 0x594   : > { %v3736_v36 = vsel %vm1778_vm4, %v3704_v56, %v7101_v43  ;;  %v2574_v43 = vld [vmem:[#allocation2 + $0x111] sm:$0xff] }
 0x595   : > { %3549 = vrot.lane.b32.xlu0 %v2588_v45, %s4571_s14  ;;  %v3096_v3 = vpop.permute.xlu1 %3095  ;;  %v7267_v22 = vpop.permute.xlu2 %3173  ;;  %v8588_v45 = vld [vmem:[#allocation67_spill] sm:$0xff] }
 0x596   : > { %8584 = vst [vmem:[#allocation159_spill] sm:$0xff] %v7267_v22  ;;  %v7272_v24 = vsel %vm1811_vm6, %v3737_v63, %v3096_v3  ;;  %v8602_v22 = vld [vmem:[#allocation103_spill] sm:$0xff] }
 0x597   : > { %8585 = vst [vmem:[#allocation160_spill] sm:$0xff] %v7272_v24  ;;  %v3094_v40 = vpop.permute.xlu0 %3093  ;;  %v8592_v24 = vld [vmem:[#allocation114_spill] sm:$0xff] }
 0x598   : > { %v7277_v7 = vsel %vm1811_vm6, %v3736_v36, %v3094_v40  ;;  %v8590_v36 = vld [vmem:[#allocation78_spill] sm:$0xff]  ;;  %v8591_v40 = vld [vmem:[#allocation155_spill] sm:$0xff] }
 0x599   : > { %8586 = vst [vmem:[#allocation10_spill] sm:$0xff] %v7277_v7  ;;  %v2526_v7 = vld [vmem:[#allocation2 + $0x50] sm:$0xff] }
 0x59b   : > { %3423 = vrot.lane.b32.xlu1 %v2557_v17, %s4570_s13  ;;  %3583 = vrot.lane.b32.xlu2 %v6736_v48, %s4571_s14  ;;  %v3657_v17 = vsel %vm279_vm0, %v8591_v40, %v8590_v36 }
 0x59d   : > { %3295 = vrot.lane.b32.xlu0 %v2525_v32, %s4569_s12  ;;  %v7283_v16 = vpop.permute.xlu1 %3165  ;;  %v7285_v3 = vpop.permute.xlu2 %3179  ;;  %v2558_v32 = vld [vmem:[#allocation2 + $0x51] sm:$0xff] }
 0x59e   : > { %8587 = vst [vmem:[#allocation36_spill] sm:$0xff] %v7285_v3 }
 0x59f   : > { %v7287_v11 = vpop.permute.xlu0 %3163 }
 0x5a3   : > { %3457 = vrot.lane.b32.xlu1 %v2574_v43, %s4570_s13  ;;  %3329 = vrot.lane.b32.xlu2 %v8588_v45, %s4569_s12  ;;  %v3689_v43 = vsel %vm1745_vm3, %v3657_v17, %v8592_v24  ;;  %v2575_v17 = vld [vmem:[#allocation2 + $0x121] sm:$0xff] }
 0x5a5   : > { %3551 = vrot.lane.b32.xlu0 %v2589_v13, %s4571_s14  ;;  %v7293_v63 = vpop.permute.xlu1 %3171  ;;  %v7295_v48 = vpop.permute.xlu2 %3185  ;;  %v3721_v13 = vsel %vm1778_vm4, %v3689_v43, %v7037_v62  ;;  %v2590_v62 = vld [vmem:[#allocation2 + $0x52] sm:$0xff] }
 0x5a6   : > { %8589 = vst [vmem:[#allocation73_spill] sm:$0xff] %v7295_v48  ;;  %v3753_v48 = vsel %vm1811_vm6, %v3721_v13, %v7185_v19  ;;  %v8598_v43 = vld [vmem:[#allocation4_spill] sm:$0xff] }
 0x5a7   : > { %v7297_v56 = vpop.permute.xlu0 %3169 }
 0x5ab   : > { %3425 = vrot.lane.b32.xlu1 %v2558_v32, %s4570_s13  ;;  %3585 = vrot.lane.b32.xlu2 %v6756_v1, %s4571_s14  ;;  %v8596_v1 = vld [vmem:[#allocation68_spill] sm:$0xff] }
 0x5ad   : > { %3297 = vrot.lane.b32.xlu0 %v2526_v7, %s4569_s12  ;;  %v7312_v3 = vpop.permute.xlu1 %3177  ;;  %v3192_v36 = vpop.permute.xlu2 %3191 }
 0x5ae   : > { %8593 = vst [vmem:[#allocation74_spill] sm:$0xff] %v7312_v3  ;;  %v7315_v40 = vsel %vm1844_vm5, %v3753_v48, %v3192_v36  ;;  %v8599_v48 = vld [vmem:[#allocation30_spill] sm:$0xff]  ;;  %v8600_v36 = vld [vmem:[#allocation132_spill] sm:$0xff] }
 0x5af   : > { %8594 = vst [vmem:[#allocation97_spill] sm:$0xff] %v7315_v40  ;;  %v7317_v24 = vpop.permute.xlu0 %3175  ;;  %v3656_v13 = vsel %vm279_vm0, %v8599_v48, %v8598_v43  ;;  %v2559_v40 = vld [vmem:[#allocation2 + $0x61] sm:$0xff] }
 0x5b0   : > { %8595 = vst [vmem:[#allocation105_spill] sm:$0xff] %v7317_v24  ;;  %v8601_v3 = vld [vmem:[#allocation94_spill] sm:$0xff]  ;;  %v2527_v48 = vld [vmem:[#allocation2 + $0x60] sm:$0xff] }
 0x5b1   : > { %v3688_v24 = vsel %vm1745_vm3, %v3656_v13, %v8601_v3 }
 0x5b3   : > { %3459 = vrot.lane.b32.xlu1 %v2575_v17, %s4570_s13  ;;  %3331 = vrot.lane.b32.xlu2 %v8596_v1, %s4569_s12  ;;  %v3663_v17 = vsel %vm279_vm0, %v8571_v33, %v8600_v36  ;;  %v8604_v36 = vld [vmem:[#allocation135_spill] sm:$0xff] }
 0x5b5   : > { %3553 = vrot.lane.b32.xlu0 %v2590_v62, %s4571_s14  ;;  %v7323_v19 = vpop.permute.xlu1 %3183  ;;  %v7325_v7 = vpop.permute.xlu2 %3197  ;;  %v3695_v62 = vsel %vm1745_vm3, %v3663_v17, %v8602_v22 }
 0x5b6   : > { %8597 = vst [vmem:[#allocation111_spill] sm:$0xff] %v7323_v19  ;;  %v3720_v19 = vsel %vm1778_vm4, %v3688_v24, %v7041_v28  ;;  %v3727_v43 = vsel %vm1778_vm4, %v3695_v62, %v7063_v35  ;;  %v3903_v35 = vld [vmem:[%s8044_s4 + $0x20] sm:$0xf]  ;;  %v2576_v24 = vld [vmem:[#allocation2 + $0x129] sm:$0xff]  ;;  %v3902_v62 = vld [vmem:[%s8044_s4 + $0x18] sm:$0xff] }
 0x5b7   : > { %v7327_v32 = vpop.permute.xlu0 %3181  ;;  %v3752_v33 = vsel %vm1811_vm6, %v3720_v19, %v7139_v0  ;;  %v3759_v3 = vsel %vm1811_vm6, %v3727_v43, %v7222_v4  ;;  %4487 = vmatpush.msk.msra.mxu3 %vm2082_vm2, %v3903_v35  ;;  %4445 = vmatpush.msk.msra.mxu1 %vm2082_vm2, %v3903_v35  ;;  %v8603_v0 = vld [vmem:[#allocation15_spill] sm:$0xff]  ;;  %v2544_v19 = vld [vmem:[#allocation2 + $0x128] sm:$0xff] }
 0x5b8   : > { %v3666_v4 = vsel %vm279_vm0, %v8588_v45, %v8603_v0  ;;  %v3899_v0 = vld [vmem:[%s8044_s4] sm:$0xff] }
 0x5b9   : > { %v3698_v17 = vsel %vm1745_vm3, %v3666_v4, %v8604_v36  ;;  %4488 = vmatpush.msra.mxu3 %v3902_v62  ;;  %4019 = vmatpush.msra.mxu1 %v3902_v62  ;;  %v8605_v4 = vld [vmem:[#allocation13_spill] sm:$0xff]  ;;  %v8607_v36 = vld [vmem:[#allocation79_spill] sm:$0xff] }
 0x5ba   : > { %v3730_v43 = vsel %vm1778_vm4, %v3698_v17, %v7077_v8  ;;  %v8608_v17 = vld [vmem:[#allocation117_spill] sm:$0xff] }
 0x5bb   : > { %3427 = vrot.lane.b32.xlu1 %v2559_v40, %s4570_s13  ;;  %3587 = vrot.lane.b32.xlu2 %v6762_v31, %s4571_s14  ;;  %v3762_v45 = vsel %vm1811_vm6, %v3730_v43, %v7233_v52  ;;  %v3900_v52 = vld [vmem:[%s8044_s4 + $0x8] sm:$0xff]  ;;  %v3669_v62 = vsel %vm279_vm0, %v8608_v17, %v8607_v36 }
 0x5bc   : > { %v2608_v43 = vld [vmem:[#allocation2 + $0x12a] sm:$0xff] }
 0x5bd   : > { %3299 = vrot.lane.b32.xlu0 %v2527_v48, %s4569_s12  ;;  %v3190_v22 = vpop.permute.xlu1 %3189  ;;  %v3204_v40 = vpop.permute.xlu2 %3203  ;;  %v2591_v48 = vld [vmem:[#allocation2 + $0x62] sm:$0xff] }
 0x5be   : > { %v7352_v13 = vsel %vm1844_vm5, %v3752_v33, %v3190_v22  ;;  %v7355_v31 = vsel %vm1844_vm5, %v3759_v3, %v3204_v40  ;;  %v3901_v22 = vld [vmem:[%s8044_s4 + $0x10] sm:$0xff] }
 0x5bf   : > { %v7357_v28 = vpop.permute.xlu0 %3187  ;;  %4489 = vmatpush.msra.mxu3 %v3901_v22  ;;  %4020 = vmatpush.msra.mxu1 %v3901_v22 }
 0x5c1   : > { %4490 = vmatpush.msra.mxu3 %v3900_v52  ;;  %4021 = vmatpush.msra.mxu1 %v3900_v52  ;;  %v2528_v52 = vld [vmem:[#allocation2 + $0x68] sm:$0xff] }
 0x5c3   : > { %3461 = vrot.lane.b32.xlu1 %v2576_v24, %s4570_s13  ;;  %3333 = vrot.lane.b32.xlu2 %v2544_v19, %s4569_s12  ;;  %v8606_v24 = vld [vmem:[#allocation82_spill] sm:$0xff] }
 0x5c4   : > { %v3662_v19 = vsel %vm279_vm0, %v8606_v24, %v8605_v4  ;;  %4491 = vmatpush.msra.mxu3 %v3899_v0  ;;  %4022 = vmatpush.msra.mxu1 %v3899_v0 }
 0x5c5   : > { %3555 = vrot.lane.b32.xlu0 %v2591_v48, %s4571_s14  ;;  %v7379_v33 = vpop.permute.xlu1 %3195  ;;  %v3210_v3 = vpop.permute.xlu2 %3209  ;;  %v8609_v48 = vld [vmem:[#allocation35_spill] sm:$0xff] }
 0x5c6   : > { %v7385_v40 = vsel %vm1844_vm5, %v3762_v45, %v3210_v3  ;;  %v3694_v45 = vsel %vm1745_vm3, %v3662_v19, %v8609_v48  ;;  %v3701_v3 = vsel %vm1745_vm3, %v3669_v62, %v6935_v44  ;;  %v8610_v62 = vld [vmem:[#allocation59_spill] sm:$0xff] }
 0x5c7   : > { %v3194_v8 = vpop.permute.xlu0 %3193  ;;  %v3726_v22 = vsel %vm1778_vm4, %v3694_v45, %v7067_v38  ;;  %v3665_v0 = vsel %vm279_vm0, %v8581_v6, %v8610_v62  ;;  %v2592_v45 = vld [vmem:[#allocation2 + $0x6a] sm:$0xff] }
 0x5c8   : > { %v7389_v35 = vsel %vm1844_vm5, %v7183_v15, %v3194_v8  ;;  %v2560_v15 = vld [vmem:[#allocation2 + $0x69] sm:$0xff]  ;;  %v3733_v8 = vsel %vm1778_vm4, %v3701_v3, %v7089_v60  ;;  %v3758_v4 = vsel %vm1811_vm6, %v3726_v22, %v7163_v21  ;;  %v2577_v21 = vld [vmem:[#allocation2 + $0x139] sm:$0xff] }
 0x5c9   : > { %v3765_v24 = vsel %vm1811_vm6, %v3733_v8, %v7251_v49  ;;  %v3697_v49 = vsel %vm1745_vm3, %v3665_v0, %v6942_v14  ;;  %v2529_v0 = vld [vmem:[#allocation2 + $0x78] sm:$0xff] }
 0x5ca   : > { %v3729_v48 = vsel %vm1778_vm4, %v3697_v49, %v7081_v26 }
 0x5cb   : > { %3429 = vrot.lane.b32.xlu1 %v2560_v15, %s4570_s13  ;;  %3589 = vrot.lane.b32.xlu2 %v2608_v43, %s4571_s14  ;;  %v8611_v15 = vld [vmem:[#allocation61_spill] sm:$0xff]  ;;  %v3761_v3 = vsel %vm1811_vm6, %v3729_v48, %v7180_v57 }
 0x5cc   : > { %v3664_v43 = vsel %vm279_vm0, %v8574_v46, %v8611_v15 }
 0x5cd   : > { %3301 = vrot.lane.b32.xlu0 %v2528_v52, %s4569_s12  ;;  %v3202_v44 = vpop.permute.xlu1 %3201  ;;  %v3216_v19 = vpop.permute.xlu2 %3215  ;;  %v3696_v6 = vsel %vm1745_vm3, %v3664_v43, %v6946_v2  ;;  %v8612_v2 = vld [vmem:[#allocation63_spill] sm:$0xff] }
 0x5ce   : > { %v7419_v36 = vsel %vm1844_vm5, %v3758_v4, %v3202_v44  ;;  %v7422_v38 = vsel %vm1844_vm5, %v3765_v24, %v3216_v19  ;;  %v8613_v4 = vld [vmem:[#allocation33_spill] sm:$0xff] }
 0x5cf   : > { %v7424_v60 = vpop.permute.xlu0 %3199  ;;  %v3668_v57 = vsel %vm279_vm0, %v8613_v4, %v8612_v2  ;;  %v2561_v24 = vld [vmem:[#allocation2 + $0x79] sm:$0xff] }
 0x5d0   : > { %v2609_v44 = vld [vmem:[#allocation2 + $0x13a] sm:$0xff]  ;;  %v3700_v19 = vsel %vm1745_vm3, %v3668_v57, %v6953_v59 }
 0x5d1   : > { %v3732_v62 = vsel %vm1778_vm4, %v3700_v19, %v7093_v18 }
 0x5d2   : > { %v3764_v49 = vsel %vm1811_vm6, %v3732_v62, %v7202_v5  ;;  %v8615_v5 = vld [vmem:[#allocation26_spill] sm:$0xff] }
 0x5d3   : > { %3463 = vrot.lane.b32.xlu1 %v2577_v21, %s4570_s13  ;;  %3335 = vrot.lane.b32.xlu2 %v8608_v17, %s4569_s12  ;;  %v3728_v17 = vsel %vm1778_vm4, %v3696_v6, %v7039_v41  ;;  %v8614_v41 = vld [vmem:[#allocation151_spill] sm:$0xff]  ;;  %v2546_v6 = vld [vmem:[#allocation2 + $0x140] sm:$0xff] }
 0x5d4   : > { %v3760_v26 = vsel %vm1811_vm6, %v3728_v17, %v7218_v51  ;;  %v3667_v51 = vsel %vm279_vm0, %v8596_v1, %v8614_v41  ;;  %v2562_v41 = vld [vmem:[#allocation2 + $0x81] sm:$0xff] }
 0x5d5   : > { %3557 = vrot.lane.b32.xlu0 %v2592_v45, %s4571_s14  ;;  %v3208_v14 = vpop.permute.xlu1 %3207  ;;  %v3580_v22 = vpop.permute.xlu2 %3579  ;;  %v3699_v21 = vsel %vm1745_vm3, %v3667_v51, %v6957_v54  ;;  %v2578_v54 = vld [vmem:[#allocation2 + $0x141] sm:$0xff] }
 0x5d6   : > { %v7447_v8 = vsel %vm1844_vm5, %v3761_v3, %v3208_v14  ;;  %v3731_v43 = vsel %vm1778_vm4, %v3699_v21, %v7051_v20  ;;  %v8616_v3 = vld [vmem:[#allocation134_spill] sm:$0xff]  ;;  %v8618_v21 = vld [vmem:[#allocation7_spill] sm:$0xff] }
 0x5d7   : > { %v3206_v46 = vpop.permute.xlu0 %3205  ;;  %v3763_v18 = vsel %vm1811_vm6, %v3731_v43, %v7229_v27  ;;  %v3659_v14 = vsel %vm279_vm0, %v8616_v3, %v8615_v5  ;;  %v8617_v20 = vld [vmem:[#allocation66_spill] sm:$0xff]  ;;  %v8619_v43 = vld [vmem:[#allocation133_spill] sm:$0xff]  ;;  %v3788_v3 = vsel %vm1844_vm5, %v7212_v42, %v7325_v7  ;;  %v2563_v7 = vld [vmem:[#allocation2 + $0x91] sm:$0xff] }
 0x5d8   : > { %v7452_v52 = vsel %vm1844_vm5, %v3760_v26, %v3206_v46  ;;  %v3691_v17 = vsel %vm1745_vm3, %v3659_v14, %v8617_v20  ;;  %v2593_v26 = vld [vmem:[#allocation2 + $0x7a] sm:$0xff]  ;;  %v2610_v51 = vld [vmem:[#allocation2 + $0x142] sm:$0xff] }
 0x5d9   : > { %v3723_v27 = vsel %vm1778_vm4, %v3691_v17, %v7053_v37  ;;  %v2331_v37 = vld [vmem:[#allocation2] sm:$0xff] }
 0x5da   : > { %v3755_v4 = vsel %vm1811_vm6, %v3723_v27, %v7151_v50  ;;  %v2530_v50 = vld [vmem:[#allocation2 + $0x80] sm:$0xff] }
 0x5db   : > { %3431 = vrot.lane.b32.xlu1 %v2561_v24, %s4570_s13  ;;  %3591 = vrot.lane.b32.xlu2 %v2609_v44, %s4571_s14  ;;  %v3787_v57 = vsel %vm1844_vm5, %v3755_v4, %v7379_v33  ;;  %v2594_v20 = vld [vmem:[#allocation2 + $0x82] sm:$0xff]  ;;  %v2611_v4 = vld [vmem:[#allocation2 + $0x152] sm:$0xff] }
 0x5dd   : > { %3303 = vrot.lane.b32.xlu0 %v2529_v0, %s4569_s12  ;;  %v3214_v59 = vpop.permute.xlu1 %3213  ;;  %v3326_v15 = vpop.permute.xlu2 %3325 }
 0x5de   : > { %v7474_v48 = vsel %vm1844_vm5, %v3764_v49, %v3214_v59  ;;  %v3643_v49 = vsel %vm279_vm0, %v2331_v37, %v8618_v21  ;;  %v2548_v21 = vld [vmem:[#allocation2 + $0x158] sm:$0xff] }
 0x5df   : > { %v3212_v1 = vpop.permute.xlu0 %3211 }
 0x5e0   : > { %v7479_v45 = vsel %vm1844_vm5, %v3763_v18, %v3212_v1  ;;  %v3675_v18 = vsel %vm1745_vm3, %v3643_v49, %v8619_v43 }
 0x5e3   : > { %3465 = vrot.lane.b32.xlu1 %v2578_v54, %s4570_s13  ;;  %3337 = vrot.lane.b32.xlu2 %v2546_v6, %s4569_s12  ;;  %v2579_v54 = vld [vmem:[#allocation2 + $0x151] sm:$0xff] }
 0x5e4   : > { %v2547_v6 = vld [vmem:[#allocation2 + $0x150] sm:$0xff] }
 0x5e5   : > { %3559 = vrot.lane.b32.xlu0 %v2593_v26, %s4571_s14  ;;  %v3452_v46 = vpop.permute.xlu1 %3451  ;;  %v3582_v2 = vpop.permute.xlu2 %3581 }
 0x5e7   : > { %v3324_v24 = vpop.permute.xlu0 %3323 }
 0x5e8   : > { %v3819_v44 = vsel %vm1877_vm7, %v3787_v57, %v3324_v24  ;;  %v2531_v57 = vld [vmem:[#allocation2 + $0x90] sm:$0xff] }
 0x5e9   : > { %v3851_v19 = vsel %vm1910_vm9, %v3819_v44, %v3452_v46  ;;  %v8620_v44 = vld [vmem:[#allocation9_spill] sm:$0xff] }
 0x5ea   : > { %v3883_v62 = vsel %vm1943_vm8, %v3851_v19, %v3580_v22  ;;  %v3707_v22 = vsel %vm1778_vm4, %v3675_v18, %v6955_v29  ;;  %v3820_v29 = vsel %vm1877_vm7, %v3788_v3, %v3326_v15  ;;  %v2332_v15 = vld [vmem:[#allocation2 + $0x8] sm:$0xff]  ;;  %v2595_v18 = vld [vmem:[#allocation2 + $0x92] sm:$0xff] }
 0x5eb   : > { %3433 = vrot.lane.b32.xlu1 %v2562_v41, %s4570_s13  ;;  %3593 = vrot.lane.b32.xlu2 %v2610_v51, %s4571_s14  ;;  %v3739_v1 = vsel %vm1811_vm6, %v3707_v22, %v7113_v9  ;;  %v3644_v19 = vsel %vm279_vm0, %v2332_v15, %v8620_v44  ;;  %v8621_v51 = vld [vmem:[#allocation48_spill] sm:$0xff] }
 0x5ec   : > { %4462 = vmatmul.msk.f32.vlgmr.msra.gmra.mxu3 %vm1985_vm10, %v3883_v62  ;;  %v3771_v5 = vsel %vm1844_vm5, %v3739_v1, %v7287_v11  ;;  %v3676_v62 = vsel %vm1745_vm3, %v3644_v19, %v8621_v51 }
 0x5ed   : > { %3305 = vrot.lane.b32.xlu0 %v2530_v50, %s4569_s12  ;;  %v3420_v33 = vpop.permute.xlu1 %3419  ;;  %v3328_v0 = vpop.permute.xlu2 %3327  ;;  %v3708_v37 = vsel %vm1778_vm4, %v3676_v62, %v6993_v55  ;;  %v2613_v62 = vld [vmem:[#allocation2 + $0x16a] sm:$0xff] }
 0x5ee   : > { %v3740_v50 = vsel %vm1811_vm6, %v3708_v37, %v7091_v12 }
 0x5ef   : > { %v3292_v59 = vpop.permute.xlu0 %3291  ;;  %v3772_v49 = vsel %vm1844_vm5, %v3740_v50, %v7283_v16  ;;  %v4543_v50 = vld [vmem:[#allocation2 + $0x20] sm:$0xff] }
 0x5f0   : > { %v3803_v14 = vsel %vm1877_vm7, %v3771_v5, %v3292_v59  ;;  %v3789_v59 = vsel %vm1844_vm5, %v7207_v39, %v7424_v60  ;;  %v2564_v60 = vld [vmem:[#allocation2 + $0x99] sm:$0xff] }
 0x5f1   : > { %v3835_v46 = vsel %vm1910_vm9, %v3803_v14, %v3420_v33  ;;  %v2580_v33 = vld [vmem:[#allocation2 + $0x159] sm:$0xff]  ;;  %v3821_v55 = vsel %vm1877_vm7, %v3789_v59, %v3328_v0 }
 0x5f2   : > { %v2612_v5 = vld [vmem:[#allocation2 + $0x15a] sm:$0xff] }
 0x5f3   : > { %3467 = vrot.lane.b32.xlu1 %v2579_v54, %s4570_s13  ;;  %3339 = vrot.lane.b32.xlu2 %v2547_v6, %s4569_s12  ;;  %v2532_v0 = vld [vmem:[#allocation2 + $0x98] sm:$0xff] }
 0x5f4   : > { %v8626_v59 = vld [vmem:[#allocation64_spill] sm:$0xff] }
 0x5f5   : > { %3561 = vrot.lane.b32.xlu0 %v2594_v20, %s4571_s14  ;;  %v3454_v9 = vpop.permute.xlu1 %3453  ;;  %v3584_v17 = vpop.permute.xlu2 %3583  ;;  %v8622_v20 = vld [vmem:[#allocation3_spill] sm:$0xff] }
 0x5f6   : > { %v3852_v26 = vsel %vm1910_vm9, %v3820_v29, %v3454_v9  ;;  %v8623_v29 = vld [vmem:[#allocation142_spill] sm:$0xff] }
 0x5f7   : > { %v3548_v11 = vpop.permute.xlu0 %3547  ;;  %v3884_v27 = vsel %vm1943_vm8, %v3852_v26, %v3582_v2  ;;  %v3645_v9 = vsel %vm279_vm0, %v8623_v29, %v8622_v20  ;;  %v8624_v26 = vld [vmem:[#allocation49_spill] sm:$0xff]  ;;  %v2582_v20 = vld [vmem:[#allocation2 + $0x171] sm:$0xff] }
 0x5f8   : > { %4463 = vmatmul.msk.f32.gmra.mxu3 %vm1985_vm10, %v3884_v27  ;;  %v3867_v42 = vsel %vm1943_vm8, %v3835_v46, %v3548_v11  ;;  %v3677_v11 = vsel %vm1745_vm3, %v3645_v9, %v8624_v26  ;;  %v4544_v9 = vld [vmem:[#allocation2 + $0x30] sm:$0xff] }
 0x5f9   : > { %4446 = vmatmul.msk.f32.vlgmr.msra.gmra.mxu1 %vm1985_vm10, %v3867_v42  ;;  %v3709_v27 = vsel %vm1778_vm4, %v3677_v11, %v6989_v61  ;;  %v2581_v42 = vld [vmem:[#allocation2 + $0x169] sm:$0xff] }
 0x5fa   : > { %v3741_v46 = vsel %vm1811_vm6, %v3709_v27, %v7129_v58  ;;  %v8628_v27 = vld [vmem:[#allocation16_spill] sm:$0xff] }
 0x5fb   : > { %3435 = vrot.lane.b32.xlu1 %v2563_v7, %s4570_s13  ;;  %3595 = vrot.lane.b32.xlu2 %v2611_v4, %s4571_s14  ;;  %v2549_v7 = vld [vmem:[#allocation2 + $0x168] sm:$0xff]  ;;  %v3773_v4 = vsel %vm1844_vm5, %v3741_v46, %v7246_v10 }
 0x5fd   : > { %3307 = vrot.lane.b32.xlu0 %v2531_v57, %s4569_s12  ;;  %v3422_v24 = vpop.permute.xlu1 %3421  ;;  %v3330_v2 = vpop.permute.xlu2 %3329  ;;  %v2596_v57 = vld [vmem:[#allocation2 + $0x9a] sm:$0xff] }
 0x5ff   : > { %v3294_v41 = vpop.permute.xlu0 %3293 }
 0x600   : > { %v3804_v43 = vsel %vm1877_vm7, %v3772_v49, %v3294_v41 }
 0x601   : > { %v3836_v6 = vsel %vm1910_vm9, %v3804_v43, %v3422_v24  ;;  %v3822_v24 = vsel %vm1877_vm7, %v7419_v36, %v3330_v2  ;;  %v2533_v36 = vld [vmem:[#allocation2 + $0xa8] sm:$0xff] }
 0x603   : > { %3469 = vrot.lane.b32.xlu1 %v2580_v33, %s4570_s13  ;;  %3341 = vrot.lane.b32.xlu2 %v2548_v21, %s4569_s12  ;;  %v8625_v33 = vld [vmem:[#allocation11_spill] sm:$0xff] }
 0x604   : > { %v3646_v21 = vsel %vm279_vm0, %v4543_v50, %v8625_v33  ;;  %v8630_v33 = vld [vmem:[#allocation93_spill] sm:$0xff] }
 0x605   : > { %3563 = vrot.lane.b32.xlu0 %v2595_v18, %s4571_s14  ;;  %v3456_v12 = vpop.permute.xlu1 %3455  ;;  %v3586_v22 = vpop.permute.xlu2 %3585  ;;  %v3678_v43 = vsel %vm1745_vm3, %v3646_v21, %v8626_v59  ;;  %v8631_v59 = vld [vmem:[#allocation91_spill] sm:$0xff] }
 0x606   : > { %v3853_v1 = vsel %vm1910_vm9, %v3821_v55, %v3456_v12  ;;  %v3710_v18 = vsel %vm1778_vm4, %v3678_v43, %v6967_v53  ;;  %v2597_v12 = vld [vmem:[#allocation2 + $0xaa] sm:$0xff] }
 0x607   : > { %v3550_v16 = vpop.permute.xlu0 %3549  ;;  %v3885_v54 = vsel %vm1943_vm8, %v3853_v1, %v3584_v17  ;;  %v3742_v55 = vsel %vm1811_vm6, %v3710_v18, %v7125_v23  ;;  %v2567_v18 = vld [vmem:[#allocation2 + $0xc1] sm:$0xff] }
 0x608   : > { %4464 = vmatmul.msk.f32.gmra.mxu3 %vm1985_vm10, %v3885_v54  ;;  %v3868_v39 = vsel %vm1943_vm8, %v3836_v6, %v3550_v16  ;;  %v3774_v1 = vsel %vm1844_vm5, %v3742_v55, %v7297_v56  ;;  %v2550_v54 = vld [vmem:[#allocation2 + $0x170] sm:$0xff]  ;;  %v2535_v55 = vld [vmem:[#allocation2 + $0xc0] sm:$0xff] }
 0x609   : > { %4447 = vmatmul.msk.f32.gmra.mxu1 %vm1985_vm10, %v3868_v39 }
 0x60b   : > { %3437 = vrot.lane.b32.xlu1 %v2564_v60, %s4570_s13  ;;  %3597 = vrot.lane.b32.xlu2 %v2612_v5, %s4571_s14 }
 0x60d   : > { %3309 = vrot.lane.b32.xlu0 %v2532_v0, %s4569_s12  ;;  %v3424_v3 = vpop.permute.xlu1 %3423  ;;  %v3332_v14 = vpop.permute.xlu2 %3331 }
 0x60e   : > { %v3823_v6 = vsel %vm1877_vm7, %v7355_v31, %v3332_v14  ;;  %v2614_v31 = vld [vmem:[#allocation2 + $0x172] sm:$0xff] }
 0x60f   : > { %v3296_v17 = vpop.permute.xlu0 %3295 }
 0x610   : > { %v3805_v15 = vsel %vm1877_vm7, %v3773_v4, %v3296_v17  ;;  %v8627_v17 = vld [vmem:[#allocation51_spill] sm:$0xff]  ;;  %v2551_v4 = vld [vmem:[#allocation2 + $0x180] sm:$0xff] }
 0x611   : > { %v3837_v10 = vsel %vm1910_vm9, %v3805_v15, %v3424_v3  ;;  %v2534_v3 = vld [vmem:[#allocation2 + $0xb0] sm:$0xff]  ;;  %v3647_v26 = vsel %vm279_vm0, %v4544_v9, %v8627_v17 }
 0x612   : > { %v3679_v46 = vsel %vm1745_vm3, %v3647_v26, %v8628_v27  ;;  %v8636_v17 = vld [vmem:[#allocation95_spill] sm:$0xff] }
 0x613   : > { %3471 = vrot.lane.b32.xlu1 %v2581_v42, %s4570_s13  ;;  %3343 = vrot.lane.b32.xlu2 %v2549_v7, %s4569_s12  ;;  %v3711_v42 = vsel %vm1778_vm4, %v3679_v46, %v7005_v30  ;;  %v2616_v46 = vld [vmem:[#allocation2 + $0x18a] sm:$0xff] }
 0x614   : > { %v3743_v7 = vsel %vm1811_vm6, %v3711_v42, %v7103_v25  ;;  %v8638_v42 = vld [vmem:[#allocation105_spill] sm:$0xff] }
 0x615   : > { %3565 = vrot.lane.b32.xlu0 %v2596_v57, %s4571_s14  ;;  %v3458_v61 = vpop.permute.xlu1 %3457  ;;  %v3588_v44 = vpop.permute.xlu2 %3587  ;;  %v3775_v15 = vsel %vm1844_vm5, %v3743_v7, %v7293_v63 }
 0x616   : > { %v3854_v58 = vsel %vm1910_vm9, %v3822_v24, %v3458_v61  ;;  %v2566_v24 = vld [vmem:[#allocation2 + $0xb1] sm:$0xff] }
 0x617   : > { %v3552_v19 = vpop.permute.xlu0 %3551  ;;  %v3886_v41 = vsel %vm1943_vm8, %v3854_v58, %v3586_v22  ;;  %v2565_v22 = vld [vmem:[#allocation2 + $0xa9] sm:$0xff] }
 0x618   : > { %4465 = vmatmul.msk.f32.gmra.mxu3 %vm1985_vm10, %v3886_v41  ;;  %v3869_v51 = vsel %vm1943_vm8, %v3837_v10, %v3552_v19  ;;  %v2615_v10 = vld [vmem:[#allocation2 + $0x182] sm:$0xff] }
 0x619   : > { %4448 = vmatmul.msk.f32.gmra.mxu1 %vm1985_vm10, %v3869_v51  ;;  %v2598_v51 = vld [vmem:[#allocation2 + $0xb2] sm:$0xff] }
 0x61b   : > { %3217 = vrot.lane.b32.xlu1 %v2612_v5, %s4568_s11  ;;  %3599 = vrot.lane.b32.xlu2 %v2613_v62, %s4571_s14 }
 0x61d   : > { %3311 = vrot.lane.b32.xlu0 %v2533_v36, %s4569_s12  ;;  %v3426_v2 = vpop.permute.xlu1 %3425  ;;  %v3334_v37 = vpop.permute.xlu2 %3333  ;;  %v4545_v36 = vld [vmem:[#allocation2 + $0x38] sm:$0xff] }
 0x61e   : > { %v3824_v61 = vsel %vm1877_vm7, %v7452_v52, %v3334_v37 }
 0x61f   : > { %v3298_v49 = vpop.permute.xlu0 %3297 }
 0x620   : > { %v3806_v16 = vsel %vm1877_vm7, %v3774_v1, %v3298_v49 }
 0x621   : > { %v3838_v56 = vsel %vm1910_vm9, %v3806_v16, %v3426_v2  ;;  %v8629_v2 = vld [vmem:[#allocation58_spill] sm:$0xff] }
 0x622   : > { %v3648_v37 = vsel %vm279_vm0, %v4545_v36, %v8629_v2 }
 0x623   : > { %3567 = vrot.lane.b32.xlu1 %v2597_v12, %s4571_s14  ;;  %3439 = vrot.lane.b32.xlu2 %v2565_v22, %s4570_s13  ;;  %v3680_v21 = vsel %vm1745_vm3, %v3648_v37, %v8630_v33  ;;  %v8632_v12 = vld [vmem:[#allocation159_spill] sm:$0xff]  ;;  %v8640_v37 = vld [vmem:[#allocation113_spill] sm:$0xff] }
 0x624   : > { %v3712_v49 = vsel %vm1778_vm4, %v3680_v21, %v7001_v47  ;;  %v2585_v33 = vld [vmem:[#allocation2 + $0x199] sm:$0xff] }
 0x625   : > { %3345 = vrot.lane.b32.xlu0 %v2550_v54, %s4569_s12  ;;  %v3460_v53 = vpop.permute.xlu1 %3459  ;;  %v3590_v39 = vpop.permute.xlu2 %3589  ;;  %v3744_v43 = vsel %vm1811_vm6, %v3712_v49, %v8631_v59  ;;  %v8641_v21 = vld [vmem:[#allocation56_spill] sm:$0xff] }
 0x626   : > { %v3855_v23 = vsel %vm1910_vm9, %v3823_v6, %v3460_v53  ;;  %v8642_v59 = vld [vmem:[#allocation20_spill] sm:$0xff] }
 0x627   : > { %v3554_v60 = vpop.permute.xlu0 %3553  ;;  %v3887_v5 = vsel %vm1943_vm8, %v3855_v23, %v3588_v44 }
 0x628   : > { %4466 = vmatmul.msk.f32.gmra.mxu3 %vm1985_vm10, %v3887_v5  ;;  %v3870_v0 = vsel %vm1943_vm8, %v3838_v56, %v3554_v60  ;;  %v2552_v60 = vld [vmem:[#allocation2 + $0x188] sm:$0xff] }
 0x629   : > { %4449 = vmatmul.msk.f32.gmra.mxu1 %vm1985_vm10, %v3870_v0  ;;  %v2599_v5 = vld [vmem:[#allocation2 + $0xc2] sm:$0xff] }
 0x62b   : > { %3313 = vrot.lane.b32.xlu1 %v2534_v3, %s4569_s12  ;;  %3473 = vrot.lane.b32.xlu2 %v2582_v20, %s4570_s13  ;;  %v4546_v3 = vld [vmem:[#allocation2 + $0x48] sm:$0xff]  ;;  %v8634_v20 = vld [vmem:[#allocation55_spill] sm:$0xff] }
 0x62d   : > { %3601 = vrot.lane.b32.xlu0 %v2614_v31, %s4571_s14  ;;  %v3428_v14 = vpop.permute.xlu1 %3427  ;;  %v3336_v29 = vpop.permute.xlu2 %3335 }
 0x62e   : > { %v3825_v1 = vsel %vm1877_vm7, %v7447_v8, %v3336_v29  ;;  %v8633_v8 = vld [vmem:[#allocation137_spill] sm:$0xff]  ;;  %v8635_v29 = vld [vmem:[#allocation119_spill] sm:$0xff] }
 0x62f   : > { %v3300_v11 = vpop.permute.xlu0 %3299 }
 0x630   : > { %v3807_v57 = vsel %vm1877_vm7, %v3775_v15, %v3300_v11  ;;  %v8637_v11 = vld [vmem:[#allocation84_spill] sm:$0xff]  ;;  %v2536_v15 = vld [vmem:[#allocation2 + $0xc8] sm:$0xff] }
 0x631   : > { %v3839_v63 = vsel %vm1910_vm9, %v3807_v57, %v3428_v14 }
 0x633   : > { %3347 = vrot.lane.b32.xlu1 %v2551_v4, %s4569_s12  ;;  %3219 = vrot.lane.b32.xlu2 %v2613_v62, %s4568_s11 }
 0x635   : > { %3441 = vrot.lane.b32.xlu0 %v2566_v24, %s4570_s13  ;;  %v3462_v30 = vpop.permute.xlu1 %3461  ;;  %v3592_v44 = vpop.permute.xlu2 %3591 }
 0x636   : > { %v3856_v25 = vsel %vm1910_vm9, %v3824_v61, %v3462_v30 }
 0x637   : > { %v3556_v58 = vpop.permute.xlu0 %3555  ;;  %v3888_v19 = vsel %vm1943_vm8, %v3856_v25, %v3590_v39 }
 0x638   : > { %4467 = vmatmul.msk.f32.gmra.mxu3 %vm1985_vm10, %v3888_v19  ;;  %v3871_v41 = vsel %vm1943_vm8, %v3839_v63, %v3556_v58  ;;  %v2600_v63 = vld [vmem:[#allocation2 + $0xca] sm:$0xff] }
 0x639   : > { %4450 = vmatmul.msk.f32.gmra.mxu1 %vm1985_vm10, %v3871_v41  ;;  %v2568_v41 = vld [vmem:[#allocation2 + $0xc9] sm:$0xff] }
 0x63b   : > { %3603 = vrot.lane.b32.xlu1 %v2615_v10, %s4571_s14  ;;  %3569 = vrot.lane.b32.xlu2 %v2598_v51, %s4571_s14 }
 0x63d   : > { %3475 = vrot.lane.b32.xlu0 %v7055_v34, %s4570_s13  ;;  %v3430_v52 = vpop.permute.xlu1 %3429  ;;  %v3338_v62 = vpop.permute.xlu2 %3337  ;;  %v3776_v34 = vsel %vm1844_vm5, %v3744_v43, %v8632_v12  ;;  %v8643_v12 = vld [vmem:[#allocation74_spill] sm:$0xff] }
 0x63e   : > { %v3826_v57 = vsel %vm1877_vm7, %v7385_v40, %v3338_v62  ;;  %v2553_v40 = vld [vmem:[#allocation2 + $0x198] sm:$0xff]  ;;  %v8639_v62 = vld [vmem:[#allocation54_spill] sm:$0xff] }
 0x63f   : > { %v3302_v50 = vpop.permute.xlu0 %3301 }
 0x640   : > { %v3808_v22 = vsel %vm1877_vm7, %v3776_v34, %v3302_v50 }
 0x641   : > { %v3840_v39 = vsel %vm1910_vm9, %v3808_v22, %v3430_v52  ;;  %v4547_v52 = vld [vmem:[#allocation2 + $0x50] sm:$0xff] }
 0x642   : > { %v3650_v36 = vsel %vm279_vm0, %v4547_v52, %v8639_v62 }
 0x643   : > { %3443 = vrot.lane.b32.xlu1 %v2567_v18, %s4570_s13  ;;  %3315 = vrot.lane.b32.xlu2 %v2535_v55, %s4569_s12  ;;  %v3682_v50 = vsel %vm1745_vm3, %v3650_v36, %v8640_v37  ;;  %v2537_v18 = vld [vmem:[#allocation2 + $0xd8] sm:$0xff] }
 0x644   : > { %v3714_v49 = vsel %vm1778_vm4, %v3682_v50, %v8641_v21  ;;  %v2617_v55 = vld [vmem:[#allocation2 + $0x19a] sm:$0xff] }
 0x645   : > { %3221 = vrot.lane.b32.xlu0 %v2614_v31, %s4568_s11  ;;  %v3464_v47 = vpop.permute.xlu1 %3463  ;;  %v3594_v16 = vpop.permute.xlu2 %3593  ;;  %v3649_v31 = vsel %vm279_vm0, %v4546_v3, %v8634_v20  ;;  %v3746_v43 = vsel %vm1811_vm6, %v3714_v49, %v8642_v59  ;;  %v4548_v3 = vld [vmem:[#allocation2 + $0x60] sm:$0xff]  ;;  %v8644_v20 = vld [vmem:[#allocation44_spill] sm:$0xff] }
 0x646   : > { %v3857_v54 = vsel %vm1910_vm9, %v3825_v1, %v3464_v47  ;;  %v3681_v9 = vsel %vm1745_vm3, %v3649_v31, %v8635_v29  ;;  %v3778_v34 = vsel %vm1844_vm5, %v3746_v43, %v8643_v12  ;;  %v3651_v31 = vsel %vm279_vm0, %v4548_v3, %v8644_v20  ;;  %v4220_v50 = vld [vmem:[%s4695_s30] sm:$0xff]  ;;  %v8652_v20 = vld [vmem:[#allocation104_spill] sm:$0xff] }
 0x647   : > { %v3558_v6 = vpop.permute.xlu0 %3557  ;;  %v3889_v53 = vsel %vm1943_vm8, %v3857_v54, %v3592_v44  ;;  %v3713_v26 = vsel %vm1778_vm4, %v3681_v9, %v8636_v17  ;;  %v8645_v9 = vld [vmem:[#allocation120_spill] sm:$0xff]  ;;  %v2538_v21 = vld [vmem:[#allocation2 + $0xe0] sm:$0xff] }
 0x648   : > { %4468 = vmatmul.msk.f32.gmra.mxu3 %vm1985_vm10, %v3889_v53  ;;  %v3872_v23 = vsel %vm1943_vm8, %v3840_v39, %v3558_v6  ;;  %v3745_v27 = vsel %vm1811_vm6, %v3713_v26, %v8637_v11  ;;  %v3683_v17 = vsel %vm1745_vm3, %v3651_v31, %v8645_v9  ;;  %v2618_v11 = vld [vmem:[#allocation2 + $0x1a2] sm:$0xff] }
 0x649   : > { %4451 = vmatmul.msk.f32.gmra.mxu1 %vm1985_vm10, %v3872_v23  ;;  %v3777_v7 = vsel %vm1844_vm5, %v3745_v27, %v8638_v42  ;;  %v8646_v27 = vld [vmem:[#allocation37_spill] sm:$0xff]  ;;  %v8647_v42 = vld [vmem:[#allocation19_spill] sm:$0xff] }
 0x64b   : > { %3477 = vrot.lane.b32.xlu1 %v8633_v8, %s4570_s13  ;;  %3349 = vrot.lane.b32.xlu2 %v2552_v60, %s4569_s12  ;;  %v2554_v60 = vld [vmem:[#allocation2 + $0x1a0] sm:$0xff] }
 0x64c   : > { %v7711_v8 = vld [vmem:[%s8045_s5] ss:$0 sm:$0xff] }
 0x64d   : > { %3571 = vrot.lane.b32.xlu0 %v2599_v5, %s4571_s14  ;;  %v3432_v56 = vpop.permute.xlu1 %3431  ;;  %v3340_v0 = vpop.permute.xlu2 %3339 }
 0x64e   : > { %v3827_v1 = vsel %vm1877_vm7, %v7479_v45, %v3340_v0  ;;  %v2569_v45 = vld [vmem:[#allocation2 + $0xd9] sm:$0xff] }
 0x64f   : > { %v3304_v14 = vpop.permute.xlu0 %3303  ;;  %v7719_v0 = vld [vmem:[%s8046_s6] ss:$0 sm:$0xff] }
 0x650   : > { %v3809_v4 = vsel %vm1877_vm7, %v3777_v7, %v3304_v14 }
 0x651   : > { %v3841_v58 = vsel %vm1910_vm9, %v3809_v4, %v3432_v56 }
 0x653   : > { %3223 = vrot.lane.b32.xlu1 %v2615_v10, %s4568_s11  ;;  %3605 = vrot.lane.b32.xlu2 %v2616_v46, %s4571_s14 }
 0x655   : > { %3317 = vrot.lane.b32.xlu0 %v2536_v15, %s4569_s12  ;;  %v3466_v24 = vpop.permute.xlu1 %3465  ;;  %v3596_v61 = vpop.permute.xlu2 %3595  ;;  %v4236_v15 = vld [vmem:[%s4695_s30 + $0x80] sm:$0xff] }
 0x656   : > { %v3858_v30 = vsel %vm1910_vm9, %v3826_v57, %v3466_v24  ;;  %v2601_v57 = vld [vmem:[#allocation2 + $0xda] sm:$0xff] }
 0x657   : > { %v3560_v44 = vpop.permute.xlu0 %3559  ;;  %v3890_v25 = vsel %vm1943_vm8, %v3858_v30, %v3594_v16  ;;  %v2586_v24 = vld [vmem:[#allocation2 + $0x1a1] sm:$0xff] }
 0x658   : > { %4469 = vmatmul.msk.f32.gmra.mxu3 %vm1985_vm10, %v3890_v25  ;;  %v3873_v19 = vsel %vm1943_vm8, %v3841_v58, %v3560_v44 }
 0x659   : > { %4452 = vmatmul.msk.f32.gmra.mxu1 %vm1985_vm10, %v3873_v19 }
 0x65b   : > { %3573 = vrot.lane.b32.xlu1 %v2600_v63, %s4571_s14  ;;  %3445 = vrot.lane.b32.xlu2 %v2568_v41, %s4570_s13 }
 0x65d   : > { %3351 = vrot.lane.b32.xlu0 %v2553_v40, %s4569_s12  ;;  %v3434_v10 = vpop.permute.xlu1 %3433  ;;  %v3342_v51 = vpop.permute.xlu2 %3341 }
 0x65e   : > { %v3828_v58 = vsel %vm1877_vm7, %v7474_v48, %v3342_v51 }
 0x65f   : > { %v3306_v2 = vpop.permute.xlu0 %3305 }
 0x660   : > { %v3810_v22 = vsel %vm1877_vm7, %v3778_v34, %v3306_v2 }
 0x661   : > { %v3842_v39 = vsel %vm1910_vm9, %v3810_v22, %v3434_v10 }
 0x663   : > { %3319 = vrot.lane.b32.xlu1 %v2537_v18, %s4569_s12  ;;  %3479 = vrot.lane.b32.xlu2 %v2585_v33, %s4570_s13  ;;  %v2602_v33 = vld [vmem:[#allocation2 + $0xe2] sm:$0xff] }
 0x665   : > { %3607 = vrot.lane.b32.xlu0 %v2617_v55, %s4571_s14  ;;  %v3468_v47 = vpop.permute.xlu1 %3467  ;;  %v3598_v16 = vpop.permute.xlu2 %3597  ;;  %v2570_v55 = vld [vmem:[#allocation2 + $0xe1] sm:$0xff] }
 0x666   : > { %v3859_v54 = vsel %vm1910_vm9, %v3827_v1, %v3468_v47  ;;  %v4237_v47 = vld [vmem:[%s4695_s30 + $0x88] sm:$0xff] }
 0x667   : > { %v3562_v6 = vpop.permute.xlu0 %3561  ;;  %v3891_v53 = vsel %vm1943_vm8, %v3859_v54, %v3596_v61  ;;  %v8648_v61 = vld [vmem:[#allocation36_spill] sm:$0xff] }
 0x668   : > { %4470 = vmatmul.msk.f32.gmra.mxu3 %vm1985_vm10, %v3891_v53  ;;  %v3874_v23 = vsel %vm1943_vm8, %v3842_v39, %v3562_v6  ;;  %v8649_v54 = vld [vmem:[#allocation12_spill] sm:$0xff] }
 0x669   : > { %4453 = vmatmul.msk.f32.gmra.mxu1 %vm1985_vm10, %v3874_v23  ;;  %v8650_v39 = vld [vmem:[#allocation8_spill] sm:$0xff] }
 0x66b   : > { %3353 = vrot.lane.b32.xlu1 %v2554_v60, %s4569_s12  ;;  %3225 = vrot.lane.b32.xlu2 %v2616_v46, %s4568_s11  ;;  %v3715_v46 = vsel %vm1778_vm4, %v3683_v17, %v8646_v27 }
 0x66c   : > { %v3747_v7 = vsel %vm1811_vm6, %v3715_v46, %v8647_v42 }
 0x66d   : > { %3447 = vrot.lane.b32.xlu0 %v2569_v45, %s4570_s13  ;;  %v3436_v5 = vpop.permute.xlu1 %3435  ;;  %v7714_v56 = vpop.permute.xlu2 %3343  ;;  %v3779_v30 = vsel %vm1844_vm5, %v3747_v7, %v8648_v61  ;;  %v8651_v45 = vld [vmem:[#allocation96_spill] sm:$0xff] }
 0x66e   : > { %v3829_v17 = vsel %vm1877_vm7, %v7422_v38, %v7714_v56  ;;  %v4221_v56 = vld [vmem:[%s4695_s30 + $0x8] sm:$0xff] }
 0x66f   : > { %v4072_v14 = vpop.f32.mrf.mxu3  ;;  %v3308_v29 = vpop.permute.xlu0 %3307 }
 0x670   : > { %v4073_v26 = vadd.f32 %v7711_v8, %v4072_v14  ;;  %v3811_v25 = vsel %vm1877_vm7, %v3779_v30, %v3308_v29 }
 0x671   : > { %v3843_v36 = vsel %vm1910_vm9, %v3811_v25, %v3436_v5  ;;  %v8653_v25 = vld [vmem:[#allocation39_spill] sm:$0xff] }
 0x672   : > { %vm4136_vm2 = vcmp.gt.f32.partialorder %v4073_v26, 0.0  ;;  %v4172_v4 = vmul.f32 %v7719_v0, %v4073_v26 }
 0x673   : > { %3609 = vrot.lane.b32.xlu1 %v2618_v11, %s4571_s14  ;;  %3575 = vrot.lane.b32.xlu2 %v2601_v57, %s4571_s14 }
 0x674   : > { %v4204_v44 = vsel %vm4136_vm2, %v4073_v26, %v4172_v4 }
 0x675   : > { %v4268_v19 = vadd.f32 %v4236_v15, %v4204_v44  ;;  %3481 = vrot.lane.b32.xlu0 %v2586_v24, %s4570_s13  ;;  %v3470_v63 = vpop.permute.xlu1 %3469  ;;  %v3600_v41 = vpop.permute.xlu2 %3599  ;;  %v4550_v44 = vld [vmem:[#allocation2 + $0x78] sm:$0xff] }
 0x676   : > { %v3860_v40 = vsel %vm1910_vm9, %v3828_v58, %v3470_v63  ;;  %v4024_v10 = vpop.f32.mrf.mxu1  ;;  %v3653_v58 = vsel %vm279_vm0, %v4550_v44, %v8653_v25  ;;  %v8654_v63 = vld [vmem:[#allocation156_spill] sm:$0xff] }
 0x677   : > { %v4300_v52 = vmax.f32 %v4268_v19, 0.0  ;;  %v4025_v62 = vadd.f32 %v7711_v8, %v4024_v10  ;;  %v3564_v48 = vpop.permute.xlu0 %3563  ;;  %v3892_v51 = vsel %vm1943_vm8, %v3860_v40, %v3598_v16  ;;  %v4549_v16 = vld [vmem:[#allocation2 + $0x68] sm:$0xff] }
 0x678   : > { %4471 = vmatmul.msk.f32.gmra.mxu3 %vm1985_vm10, %v3892_v51  ;;  %v3875_v2 = vsel %vm1943_vm8, %v3843_v36, %v3564_v48  ;;  %v3652_v6 = vsel %vm279_vm0, %v4549_v16, %v8649_v54  ;;  %v8656_v36 = vld [vmem:[#allocation69_spill] sm:$0xff]  ;;  %v4222_v54 = vld [vmem:[%s4695_s30 + $0x10] sm:$0xff] }
 0x679   : > { %4332 = vst.msk [vmem:[%s7745_s26 + $0x80] sm:$0xff] %vm279_vm0, %v4300_v52  ;;  %vm4120_vm13 = vcmp.gt.f32.partialorder %v4025_v62, 0.0  ;;  %v4156_v37 = vmul.f32 %v7719_v0, %v4025_v62  ;;  %4454 = vmatmul.msk.f32.gmra.mxu1 %vm1985_vm10, %v3875_v2  ;;  %v3684_v23 = vsel %vm1745_vm3, %v3652_v6, %v8650_v39  ;;  %v4238_v52 = vld [vmem:[%s4695_s30 + $0x90] sm:$0xff] }
 0x67a   : > { %v3716_v5 = vsel %vm1778_vm4, %v3684_v23, %v8651_v45 }
 0x67b   : > { %v4188_v49 = vsel %vm4120_vm13, %v4025_v62, %v4156_v37  ;;  %3577 = vrot.lane.b32.xlu1 %v2602_v33, %s4571_s14  ;;  %3321 = vrot.lane.b32.xlu2 %v2538_v21, %s4569_s12  ;;  %v4075_v59 = vpop.f32.mrf.mxu3  ;;  %v3748_v31 = vsel %vm1811_vm6, %v3716_v5, %v8652_v20  ;;  %v8655_v62 = vld [vmem:[#allocation136_spill] sm:$0xff]  ;;  %v8657_v33 = vld [vmem:[#allocation111_spill] sm:$0xff] }
 0x67c   : > { %v4252_v43 = vadd.f32 %v4220_v50, %v4188_v49  ;;  %v4076_v18 = vadd.f32 %v7711_v8, %v4075_v59  ;;  %v3780_v14 = vsel %vm1844_vm5, %v3748_v31, %v7327_v32 }
 0x67d   : > { %3449 = vrot.lane.b32.xlu0 %v2570_v55, %s4570_s13  ;;  %v3438_v12 = vpop.permute.xlu1 %3437  ;;  %v3440_v34 = vpop.permute.xlu2 %3439 }
 0x67e   : > { %v4284_v22 = vmax.f32 %v4252_v43, 0.0  ;;  %vm4137_vm14 = vcmp.gt.f32.partialorder %v4076_v18, 0.0  ;;  %v4173_v1 = vmul.f32 %v7719_v0, %v4076_v18 }
 0x67f   : > { %v3310_v53 = vpop.permute.xlu0 %3309 }
 0x680   : > { %4316 = vst.msk [vmem:[%s7745_s26] sm:$0xff] %vm279_vm0, %v4284_v22  ;;  %v4205_v60 = vsel %vm4137_vm14, %v4076_v18, %v4173_v1  ;;  %v3812_v9 = vsel %vm1877_vm7, %v3780_v14, %v3310_v53  ;;  %v8658_v53 = vld [vmem:[#allocation146_spill] sm:$0xff]  ;;  %v4239_v14 = vld [vmem:[%s4695_s30 + $0x98] sm:$0xff] }
 0x681   : > { %v4269_v3 = vadd.f32 %v4237_v47, %v4205_v60  ;;  %v3844_v4 = vsel %vm1910_vm9, %v3812_v9, %v3438_v12 }
 0x683   : > { %v4301_v29 = vmax.f32 %v4269_v3, 0.0 }
 0x685   : > { %4333 = vst.msk [vmem:[%s7745_s26 + $0x88] sm:$0xff] %vm279_vm0, %v4301_v29  ;;  %v3472_v26 = vpop.permute.xlu1 %3471  ;;  %v3474_v27 = vpop.permute.xlu2 %3473 }
 0x686   : > { %v3861_v11 = vsel %vm1910_vm9, %v3829_v17, %v3472_v26  ;;  %v4027_v46 = vpop.f32.mrf.mxu1 }
 0x687   : > { %v4028_v42 = vadd.f32 %v7711_v8, %v4027_v46  ;;  %v3566_v7 = vpop.permute.xlu0 %3565  ;;  %v3893_v32 = vsel %vm1943_vm8, %v3861_v11, %v3600_v41  ;;  %v3685_v41 = vsel %vm1745_vm3, %v3653_v58, %v8654_v63  ;;  %v4551_v46 = vld [vmem:[#allocation2 + $0x80] sm:$0xff] }
 0x688   : > { %4472 = vmatmul.msk.f32.gmra.mxu3 %vm1985_vm10, %v3893_v32  ;;  %v3876_v15 = vsel %vm1943_vm8, %v3844_v4, %v3566_v7  ;;  %v3717_v48 = vsel %vm1778_vm4, %v3685_v41, %v8655_v62  ;;  %v8660_v32 = vld [vmem:[#allocation17_spill] sm:$0xff]  ;;  %v4552_v62 = vld [vmem:[#allocation2 + $0x150] sm:$0xff] }
 0x689   : > { %vm4121_vm15 = vcmp.gt.f32.partialorder %v4028_v42, 0.0  ;;  %v4157_v38 = vmul.f32 %v7719_v0, %v4028_v42  ;;  %4455 = vmatmul.msk.f32.gmra.mxu1 %vm1985_vm10, %v3876_v15  ;;  %v3749_v2 = vsel %vm1811_vm6, %v3717_v48, %v8656_v36  ;;  %v8664_v48 = vld [vmem:[#allocation65_spill] sm:$0xff] }
 0x68a   : > { %v3781_v21 = vsel %vm1844_vm5, %v3749_v2, %v8657_v33  ;;  %v8665_v36 = vld [vmem:[#allocation53_spill] sm:$0xff] }
 0x68b   : > { %v4189_v57 = vsel %vm4121_vm15, %v4028_v42, %v4157_v38  ;;  %v4078_v24 = vpop.f32.mrf.mxu3  ;;  %v8659_v42 = vld [vmem:[#allocation14_spill] sm:$0xff]  ;;  %v8661_v38 = vld [vmem:[#allocation123_spill] sm:$0xff] }
 0x68c   : > { %v4253_v61 = vadd.f32 %v4221_v56, %v4189_v57  ;;  %v4079_v30 = vadd.f32 %v7711_v8, %v4078_v24  ;;  %v3654_v7 = vsel %vm279_vm0, %v4551_v46, %v8659_v42  ;;  %v8662_v57 = vld [vmem:[#allocation70_spill] sm:$0xff]  ;;  %v4224_v46 = vld [vmem:[%s4695_s30 + $0x20] sm:$0xff]  ;;  %v8670_v42 = vld [vmem:[#allocation115_spill] sm:$0xff] }
 0x68d   : > { %v3218_v19 = vpop.permute.xlu1 %3217  ;;  %v7804_v50 = vpop.permute.xlu2 %3219  ;;  %v3686_v4 = vsel %vm1745_vm3, %v3654_v7, %v8660_v32  ;;  %v8671_v32 = vld [vmem:[#allocation10_spill] sm:$0xff] }
 0x68e   : > { %v4285_v40 = vmax.f32 %v4253_v61, 0.0  ;;  %vm4138_vm1 = vcmp.gt.f32.partialorder %v4079_v30, 0.0  ;;  %v4174_v10 = vmul.f32 %v7719_v0, %v4079_v30  ;;  %v3798_v39 = vsel %vm1844_vm5, %v8658_v53, %v3218_v19 }
 0x68f   : > { %v3312_v51 = vpop.permute.xlu0 %3311 }
 0x690   : > { %4317 = vst.msk [vmem:[%s7745_s26 + $0x8] sm:$0xff] %vm279_vm0, %v4285_v40  ;;  %v4206_v37 = vsel %vm4138_vm1, %v4079_v30, %v4174_v10  ;;  %v3813_v59 = vsel %vm1877_vm7, %v3781_v21, %v3312_v51  ;;  %v8663_v30 = vld [vmem:[#allocation73_spill] sm:$0xff]  ;;  %v4223_v10 = vld [vmem:[%s4695_s30 + $0x18] sm:$0xff]  ;;  %v3671_v51 = vsel %vm279_vm0, %v4552_v62, %v8664_v48  ;;  %v8666_v21 = vld [vmem:[#allocation158_spill] sm:$0xff] }
 0x691   : > { %v4270_v49 = vadd.f32 %v4238_v52, %v4206_v37  ;;  %v3845_v55 = vsel %vm1910_vm9, %v3813_v59, %v3440_v34  ;;  %v3703_v2 = vsel %vm1745_vm3, %v3671_v51, %v8665_v36 }
 0x693   : > { %v4302_v43 = vmax.f32 %v4270_v49, 0.0  ;;  %v3735_v49 = vsel %vm1778_vm4, %v3703_v2, %v8666_v21 }
 0x695   : > { %4334 = vst.msk [vmem:[%s7745_s26 + $0x90] sm:$0xff] %vm279_vm0, %v4302_v43  ;;  %v3568_v18 = vpop.permute.xlu1 %3567  ;;  %v3570_v6 = vpop.permute.xlu2 %3569 }
 0x696   : > { %v4030_v12 = vpop.f32.mrf.mxu1  ;;  %v3877_v22 = vsel %vm1943_vm8, %v3845_v55, %v3568_v18  ;;  %v8667_v18 = vld [vmem:[#allocation124_spill] sm:$0xff] }
 0x697   : > { %v4031_v1 = vadd.f32 %v7711_v8, %v4030_v12  ;;  %v3346_v47 = vpop.permute.xlu0 %3345  ;;  %4456 = vmatmul.msk.f32.gmra.mxu1 %vm1985_vm10, %v3877_v22  ;;  %v3767_v55 = vsel %vm1811_vm6, %v3735_v49, %v8667_v18 }
 0x698   : > { %v3830_v45 = vsel %vm1877_vm7, %v3798_v39, %v3346_v47  ;;  %v3799_v22 = vsel %vm1844_vm5, %v3767_v55, %v7804_v50 }
 0x699   : > { %vm4122_vm11 = vcmp.gt.f32.partialorder %v4031_v1, 0.0  ;;  %v4158_v16 = vmul.f32 %v7719_v0, %v4031_v1  ;;  %v3862_v9 = vsel %vm1910_vm9, %v3830_v45, %v3474_v27  ;;  %v3718_v27 = vsel %vm1778_vm4, %v3686_v4, %v8661_v38 }
 0x69a   : > { %v3750_v24 = vsel %vm1811_vm6, %v3718_v27, %v8662_v57 }
 0x69b   : > { %v4190_v23 = vsel %vm4122_vm11, %v4031_v1, %v4158_v16  ;;  %v4081_v34 = vpop.f32.mrf.mxu3  ;;  %v3782_v44 = vsel %vm1844_vm5, %v3750_v24, %v8663_v30 }
 0x69c   : > { %v4254_v60 = vadd.f32 %v4222_v54, %v4190_v23  ;;  %v4082_v5 = vadd.f32 %v7711_v8, %v4081_v34  ;;  %v4240_v54 = vld [vmem:[%s4695_s30 + $0xa0] sm:$0xff] }
 0x69d   : > { %v3314_v3 = vpop.permute.xlu1 %3313  ;;  %v3316_v56 = vpop.permute.xlu2 %3315 }
 0x69e   : > { %v4286_v20 = vmax.f32 %v4254_v60, 0.0  ;;  %vm4139_vm12 = vcmp.gt.f32.partialorder %v4082_v5, 0.0  ;;  %v4175_v31 = vmul.f32 %v7719_v0, %v4082_v5  ;;  %v3814_v58 = vsel %vm1877_vm7, %v3782_v44, %v3314_v3 }
 0x69f   : > { %v3602_v29 = vpop.permute.xlu0 %3601 }
 0x6a0   : > { %4318 = vst.msk [vmem:[%s7745_s26 + $0x10] sm:$0xff] %vm279_vm0, %v4286_v20  ;;  %v4207_v17 = vsel %vm4139_vm12, %v4082_v5, %v4175_v31  ;;  %v3894_v26 = vsel %vm1943_vm8, %v3862_v9, %v3602_v29  ;;  %v4553_v31 = vld [vmem:[#allocation2 + $0x90] sm:$0xff] }
 0x6a1   : > { %v4271_v11 = vadd.f32 %v4239_v14, %v4207_v17  ;;  %4473 = vmatmul.msk.f32.gmra.mxu3 %vm1985_vm10, %v3894_v26  ;;  %v8668_v14 = vld [vmem:[#allocation75_spill] sm:$0xff]  ;;  %v8669_v17 = vld [vmem:[#allocation110_spill] sm:$0xff] }
 0x6a2   : > { %v3655_v29 = vsel %vm279_vm0, %v4553_v31, %v8668_v14 }
 0x6a3   : > { %v4303_v15 = vmax.f32 %v4271_v11, 0.0  ;;  %v3687_v26 = vsel %vm1745_vm3, %v3655_v29, %v8669_v17 }
 0x6a4   : > { %v3719_v7 = vsel %vm1778_vm4, %v3687_v26, %v8670_v42 }
 0x6a5   : > { %4335 = vst.msk [vmem:[%s7745_s26 + $0x98] sm:$0xff] %vm279_vm0, %v4303_v15  ;;  %v3348_v61 = vpop.permute.xlu1 %3347  ;;  %v3350_v1 = vpop.permute.xlu2 %3349  ;;  %v8672_v15 = vld [vmem:[#allocation23_spill] sm:$0xff] }
 0x6a6   : > { %v4033_v25 = vpop.f32.mrf.mxu1  ;;  %v3751_v38 = vsel %vm1811_vm6, %v3719_v7, %v8672_v15 }
 0x6a7   : > { %v4034_v19 = vadd.f32 %v7711_v8, %v4033_v25  ;;  %v3442_v63 = vpop.permute.xlu0 %3441  ;;  %v3783_v24 = vsel %vm1844_vm5, %v3751_v38, %v7357_v28 }
 0x6a8   : > { %v3846_v41 = vsel %vm1910_vm9, %v3814_v58, %v3442_v63  ;;  %v3815_v44 = vsel %vm1877_vm7, %v3783_v24, %v3316_v56 }
 0x6a9   : > { %vm4123_vm2 = vcmp.gt.f32.partialorder %v4034_v19, 0.0  ;;  %v4159_v40 = vmul.f32 %v7719_v0, %v4034_v19  ;;  %v3878_v52 = vsel %vm1943_vm8, %v3846_v41, %v3570_v6  ;;  %v3831_v6 = vsel %vm1877_vm7, %v3799_v22, %v3348_v61  ;;  %v4241_v41 = vld [vmem:[%s4695_s30 + $0xa8] sm:$0xff] }
 0x6aa   : > { %4457 = vmatmul.msk.f32.gmra.mxu1 %vm1985_vm10, %v3878_v52 }
 0x6ab   : > { %v4191_v37 = vsel %vm4123_vm2, %v4034_v19, %v4159_v40  ;;  %v4084_v33 = vpop.f32.mrf.mxu3 }
 0x6ac   : > { %v4255_v59 = vadd.f32 %v4223_v10, %v4191_v37  ;;  %v4085_v43 = vadd.f32 %v7711_v8, %v4084_v33 }
 0x6ad   : > { %v3604_v12 = vpop.permute.xlu1 %3603  ;;  %v3606_v9 = vpop.permute.xlu2 %3605 }
 0x6ae   : > { %v4287_v47 = vmax.f32 %v4255_v59, 0.0  ;;  %vm4140_vm13 = vcmp.gt.f32.partialorder %v4085_v43, 0.0  ;;  %v4176_v16 = vmul.f32 %v7719_v0, %v4085_v43  ;;  %v4225_v59 = vld [vmem:[%s4695_s30 + $0x28] sm:$0xff] }
 0x6af   : > { %v3476_v53 = vpop.permute.xlu0 %3475 }
 0x6b0   : > { %4319 = vst.msk [vmem:[%s7745_s26 + $0x18] sm:$0xff] %vm279_vm0, %v4287_v47  ;;  %v4208_v39 = vsel %vm4140_vm13, %v4085_v43, %v4176_v16  ;;  %v3863_v23 = vsel %vm1910_vm9, %v3831_v6, %v3476_v53  ;;  %v4242_v53 = vld [vmem:[%s4695_s30 + $0xb0] sm:$0xff] }
 0x6b1   : > { %v4272_v34 = vadd.f32 %v4240_v54, %v4208_v39  ;;  %v3895_v60 = vsel %vm1943_vm8, %v3863_v23, %v3604_v12 }
 0x6b2   : > { %4474 = vmatmul.msk.f32.gmra.mxu3 %vm1985_vm10, %v3895_v60  ;;  %v8673_v60 = vld [vmem:[#allocation160_spill] sm:$0xff] }
 0x6b3   : > { %v4304_v50 = vmax.f32 %v4272_v34, 0.0 }
 0x6b5   : > { %4336 = vst.msk [vmem:[%s7745_s26 + $0xa0] sm:$0xff] %vm279_vm0, %v4304_v50  ;;  %v3444_v45 = vpop.permute.xlu1 %3443  ;;  %v3446_v51 = vpop.permute.xlu2 %3445 }
 0x6b6   : > { %v4036_v5 = vpop.f32.mrf.mxu1  ;;  %v3847_v10 = vsel %vm1910_vm9, %v3815_v44, %v3444_v45 }
 0x6b7   : > { %v4037_v3 = vadd.f32 %v7711_v8, %v4036_v5  ;;  %v3222_v20 = vpop.permute.xlu0 %3221 }
 0x6b8   : > { %v3800_v4 = vsel %vm1844_vm5, %v8671_v32, %v3222_v20 }
 0x6b9   : > { %vm4124_vm14 = vcmp.gt.f32.partialorder %v4037_v3, 0.0  ;;  %v4160_v11 = vmul.f32 %v7719_v0, %v4037_v3  ;;  %v3832_v58 = vsel %vm1877_vm7, %v3800_v4, %v3350_v1 }
 0x6bb   : > { %v4192_v27 = vsel %vm4124_vm14, %v4037_v3, %v4160_v11  ;;  %v4087_v57 = vpop.f32.mrf.mxu3  ;;  %v4226_v11 = vld [vmem:[%s4695_s30 + $0x30] sm:$0xff] }
 0x6bc   : > { %v4256_v61 = vadd.f32 %v4224_v46, %v4192_v27  ;;  %v4088_v30 = vadd.f32 %v7711_v8, %v4087_v57  ;;  %v4243_v27 = vld [vmem:[%s4695_s30 + $0xb8] sm:$0xff]  ;;  %v8674_v57 = vld [vmem:[#allocation97_spill] sm:$0xff] }
 0x6bd   : > { %v3478_v25 = vpop.permute.xlu1 %3477  ;;  %v3480_v12 = vpop.permute.xlu2 %3479 }
 0x6be   : > { %v4288_v19 = vmax.f32 %v4256_v61, 0.0  ;;  %vm4141_vm15 = vcmp.gt.f32.partialorder %v4088_v30, 0.0  ;;  %v4177_v63 = vmul.f32 %v7719_v0, %v4088_v30  ;;  %v3864_v40 = vsel %vm1910_vm9, %v3832_v58, %v3478_v25 }
 0x6bf   : > { %v3572_v52 = vpop.permute.xlu0 %3571  ;;  %v3896_v28 = vsel %vm1943_vm8, %v3864_v40, %v3606_v9 }
 0x6c0   : > { %4320 = vst.msk [vmem:[%s7745_s26 + $0x20] sm:$0xff] %vm279_vm0, %v4288_v19  ;;  %v4209_v56 = vsel %vm4141_vm15, %v4088_v30, %v4177_v63  ;;  %4475 = vmatmul.msk.f32.gmra.mxu3 %vm1985_vm10, %v3896_v28  ;;  %v3879_v62 = vsel %vm1943_vm8, %v3847_v10, %v3572_v52  ;;  %v4554_v63 = vld [vmem:[#allocation2 + $0x170] sm:$0xff] }
 0x6c1   : > { %v4273_v48 = vadd.f32 %v4241_v41, %v4209_v56  ;;  %4458 = vmatmul.msk.f32.gmra.mxu1 %vm1985_vm10, %v3879_v62  ;;  %v8675_v41 = vld [vmem:[#allocation163_spill] sm:$0xff]  ;;  %v8677_v56 = vld [vmem:[#allocation21_spill] sm:$0xff] }
 0x6c2   : > { %v3674_v40 = vsel %vm279_vm0, %v4554_v63, %v8675_v41  ;;  %v8676_v10 = vld [vmem:[#allocation83_spill] sm:$0xff] }
 0x6c3   : > { %v4305_v36 = vmax.f32 %v4273_v48, 0.0  ;;  %v3706_v52 = vsel %vm1745_vm3, %v3674_v40, %v8676_v10  ;;  %v8678_v48 = vld [vmem:[#allocation131_spill] sm:$0xff] }
 0x6c4   : > { %v3738_v62 = vsel %vm1778_vm4, %v3706_v52, %v8677_v56 }
 0x6c5   : > { %4337 = vst.msk [vmem:[%s7745_s26 + $0xa8] sm:$0xff] %vm279_vm0, %v4305_v36  ;;  %v3224_v2 = vpop.permute.xlu1 %3223  ;;  %v3226_v20 = vpop.permute.xlu2 %3225 }
 0x6c6   : > { %v4039_v37 = vpop.f32.mrf.mxu1  ;;  %v3801_v50 = vsel %vm1844_vm5, %v8673_v60, %v3224_v2 }
 0x6c7   : > { %v4040_v33 = vadd.f32 %v7711_v8, %v4039_v37  ;;  %v3318_v21 = vpop.permute.xlu0 %3317 }
 0x6c8   : > { %v3816_v43 = vsel %vm1877_vm7, %v7352_v13, %v3318_v21 }
 0x6c9   : > { %vm4125_vm1 = vcmp.gt.f32.partialorder %v4040_v33, 0.0  ;;  %v4161_v49 = vmul.f32 %v7719_v0, %v4040_v33  ;;  %v3848_v16 = vsel %vm1910_vm9, %v3816_v43, %v3446_v51  ;;  %v3770_v51 = vsel %vm1811_vm6, %v3738_v62, %v8678_v48 }
 0x6ca   : > { %v3802_v36 = vsel %vm1844_vm5, %v3770_v51, %v3226_v20 }
 0x6cb   : > { %v4193_v18 = vsel %vm4125_vm1, %v4040_v33, %v4161_v49  ;;  %v4090_v55 = vpop.f32.mrf.mxu3 }
 0x6cc   : > { %v4257_v22 = vadd.f32 %v4225_v59, %v4193_v18  ;;  %v4091_v1 = vadd.f32 %v7711_v8, %v4090_v55  ;;  %v4227_v18 = vld [vmem:[%s4695_s30 + $0x38] sm:$0xff] }
 0x6cd   : > { %v3574_v47 = vpop.permute.xlu1 %3573  ;;  %v3576_v30 = vpop.permute.xlu2 %3575 }
 0x6ce   : > { %v4289_v54 = vmax.f32 %v4257_v22, 0.0  ;;  %vm4142_vm11 = vcmp.gt.f32.partialorder %v4091_v1, 0.0  ;;  %v4178_v6 = vmul.f32 %v7719_v0, %v4091_v1  ;;  %v3880_v39 = vsel %vm1943_vm8, %v3848_v16, %v3574_v47 }
 0x6cf   : > { %v3352_v23 = vpop.permute.xlu0 %3351  ;;  %4459 = vmatmul.msk.f32.gmra.mxu1 %vm1985_vm10, %v3880_v39 }
 0x6d0   : > { %4321 = vst.msk [vmem:[%s7745_s26 + $0x28] sm:$0xff] %vm279_vm0, %v4289_v54  ;;  %v4210_v13 = vsel %vm4142_vm11, %v4091_v1, %v4178_v6  ;;  %v3833_v5 = vsel %vm1877_vm7, %v3801_v50, %v3352_v23 }
 0x6d1   : > { %v4274_v34 = vadd.f32 %v4242_v53, %v4210_v13  ;;  %v3865_v9 = vsel %vm1910_vm9, %v3833_v5, %v3480_v12  ;;  %v4244_v53 = vld [vmem:[%s4695_s30 + $0xc0] sm:$0xff] }
 0x6d3   : > { %v4306_v45 = vmax.f32 %v4274_v34, 0.0 }
 0x6d5   : > { %4338 = vst.msk [vmem:[%s7745_s26 + $0xb0] sm:$0xff] %vm279_vm0, %v4306_v45  ;;  %v3320_v3 = vpop.permute.xlu1 %3319  ;;  %v3322_v1 = vpop.permute.xlu2 %3321 }
 0x6d6   : > { %v4042_v31 = vpop.f32.mrf.mxu1  ;;  %v3817_v24 = vsel %vm1877_vm7, %v8674_v57, %v3320_v3  ;;  %v3818_v39 = vsel %vm1877_vm7, %v7389_v35, %v3322_v1 }
 0x6d7   : > { %v4043_v14 = vadd.f32 %v7711_v8, %v4042_v31  ;;  %v3608_v29 = vpop.permute.xlu0 %3607  ;;  %v4228_v31 = vld [vmem:[%s4695_s30 + $0x40] sm:$0xff] }
 0x6d8   : > { %v3897_v17 = vsel %vm1943_vm8, %v3865_v9, %v3608_v29 }
 0x6d9   : > { %vm4126_vm12 = vcmp.gt.f32.partialorder %v4043_v14, 0.0  ;;  %v4162_v26 = vmul.f32 %v7719_v0, %v4043_v14  ;;  %4476 = vmatmul.msk.f32.gmra.mxu3 %vm1985_vm10, %v3897_v17 }
 0x6db   : > { %v4194_v46 = vsel %vm4126_vm12, %v4043_v14, %v4162_v26  ;;  %v4093_v42 = vpop.f32.mrf.mxu3 }
 0x6dc   : > { %v4258_v7 = vadd.f32 %v4226_v11, %v4194_v46  ;;  %v4094_v32 = vadd.f32 %v7711_v8, %v4093_v42  ;;  %v4245_v46 = vld [vmem:[%s4695_s30 + $0xc8] sm:$0xff] }
 0x6dd   : > { %v3354_v4 = vpop.permute.xlu1 %3353 }
 0x6de   : > { %v4290_v15 = vmax.f32 %v4258_v7, 0.0  ;;  %vm4143_vm2 = vcmp.gt.f32.partialorder %v4094_v32, 0.0  ;;  %v4179_v38 = vmul.f32 %v7719_v0, %v4094_v32  ;;  %v3834_v33 = vsel %vm1877_vm7, %v3802_v36, %v3354_v4 }
 0x6df   : > { %v3448_v61 = vpop.permute.xlu0 %3447 }
 0x6e0   : > { %4322 = vst.msk [vmem:[%s7745_s26 + $0x30] sm:$0xff] %vm279_vm0, %v4290_v15  ;;  %v4211_v44 = vsel %vm4143_vm2, %v4094_v32, %v4179_v38  ;;  %v3849_v25 = vsel %vm1910_vm9, %v3817_v24, %v3448_v61 }
 0x6e1   : > { %v4275_v58 = vadd.f32 %v4243_v27, %v4211_v44  ;;  %v3881_v19 = vsel %vm1943_vm8, %v3849_v25, %v3576_v30  ;;  %v4229_v27 = vld [vmem:[%s4695_s30 + $0x48] sm:$0xff] }
 0x6e2   : > { %4460 = vmatmul.msk.f32.gmra.mxu1 %vm1985_vm10, %v3881_v19 }
 0x6e3   : > { %v4307_v28 = vmax.f32 %v4275_v58, 0.0  ;;  %v4246_v58 = vld [vmem:[%s4695_s30 + $0xd0] sm:$0xff] }
 0x6e5   : > { %4339 = vst.msk [vmem:[%s7745_s26 + $0xb8] sm:$0xff] %vm279_vm0, %v4307_v28  ;;  %v3610_v2 = vpop.permute.xlu1 %3609  ;;  %v4230_v28 = vld [vmem:[%s4695_s30 + $0x50] sm:$0xff] }
 0x6e6   : > { %v4045_v37 = vpop.f32.mrf.mxu1 }
 0x6e7   : > { %v4046_v21 = vadd.f32 %v7711_v8, %v4045_v37  ;;  %v3482_v49 = vpop.permute.xlu0 %3481  ;;  %v4247_v37 = vld [vmem:[%s4695_s30 + $0xd8] sm:$0xff] }
 0x6e8   : > { %v3866_v59 = vsel %vm1910_vm9, %v3834_v33, %v3482_v49 }
 0x6e9   : > { %vm4127_vm3 = vcmp.gt.f32.partialorder %v4046_v21, 0.0  ;;  %v4163_v43 = vmul.f32 %v7719_v0, %v4046_v21  ;;  %v3898_v55 = vsel %vm1943_vm8, %v3866_v59, %v3610_v2 }
 0x6ea   : > { %4477 = vmatmul.msk.f32.gmra.mxu3 %vm1985_vm10, %v3898_v55 }
 0x6eb   : > { %v4195_v12 = vsel %vm4127_vm3, %v4046_v21, %v4163_v43  ;;  %v4096_v22 = vpop.f32.mrf.mxu3 }
 0x6ec   : > { %v4259_v47 = vadd.f32 %v4227_v18, %v4195_v12  ;;  %v4097_v16 = vadd.f32 %v7711_v8, %v4096_v22  ;;  %v4231_v18 = vld [vmem:[%s4695_s30 + $0x58] sm:$0xff] }
 0x6ed   : > { %v3578_v34 = vpop.permute.xlu1 %3577 }
 0x6ee   : > { %v4291_v54 = vmax.f32 %v4259_v47, 0.0  ;;  %vm4144_vm4 = vcmp.gt.f32.partialorder %v4097_v16, 0.0  ;;  %v4180_v6 = vmul.f32 %v7719_v0, %v4097_v16 }
 0x6ef   : > { %v3450_v23 = vpop.permute.xlu0 %3449 }
 0x6f0   : > { %4323 = vst.msk [vmem:[%s7745_s26 + $0x38] sm:$0xff] %vm279_vm0, %v4291_v54  ;;  %v4212_v13 = vsel %vm4144_vm4, %v4097_v16, %v4180_v6  ;;  %v3850_v60 = vsel %vm1910_vm9, %v3818_v39, %v3450_v23  ;;  %v4248_v6 = vld [vmem:[%s4695_s30 + $0xe0] sm:$0xff] }
 0x6f1   : > { %v4276_v50 = vadd.f32 %v4244_v53, %v4212_v13  ;;  %v3882_v45 = vsel %vm1943_vm8, %v3850_v60, %v3578_v34 }
 0x6f2   : > { %4461 = vmatmul.msk.f32.gmra.mxu1 %vm1985_vm10, %v3882_v45 }
 0x6f3   : > { %v4308_v5 = vmax.f32 %v4276_v50, 0.0  ;;  %v4232_v50 = vld [vmem:[%s4695_s30 + $0x60] sm:$0xff] }
 0x6f5   : > { %4340 = vst.msk [vmem:[%s7745_s26 + $0xc0] sm:$0xff] %vm279_vm0, %v4308_v5 }
 0x6f6   : > { %v4048_v3 = vpop.f32.mrf.mxu1 }
 0x6f7   : > { %v4049_v35 = vadd.f32 %v7711_v8, %v4048_v3 }
 0x6f9   : > { %vm4128_vm5 = vcmp.gt.f32.partialorder %v4049_v35, 0.0  ;;  %v4164_v20 = vmul.f32 %v7719_v0, %v4049_v35 }
 0x6fb   : > { %v4196_v14 = vsel %vm4128_vm5, %v4049_v35, %v4164_v20  ;;  %v4099_v29 = vpop.f32.mrf.mxu3 }
 0x6fc   : > { %v4260_v9 = vadd.f32 %v4228_v31, %v4196_v14  ;;  %v4100_v17 = vadd.f32 %v7711_v8, %v4099_v29  ;;  %v4249_v14 = vld [vmem:[%s4695_s30 + $0xe8] sm:$0xff] }
 0x6fe   : > { %v4292_v26 = vmax.f32 %v4260_v9, 0.0  ;;  %vm4145_vm6 = vcmp.gt.f32.partialorder %v4100_v17, 0.0  ;;  %v4181_v11 = vmul.f32 %v7719_v0, %v4100_v17 }
 0x700   : > { %4324 = vst.msk [vmem:[%s7745_s26 + $0x40] sm:$0xff] %vm279_vm0, %v4292_v26  ;;  %v4213_v42 = vsel %vm4145_vm6, %v4100_v17, %v4181_v11 }
 0x701   : > { %v4277_v7 = vadd.f32 %v4245_v46, %v4213_v42  ;;  %v4233_v42 = vld [vmem:[%s4695_s30 + $0x68] sm:$0xff] }
 0x703   : > { %v4309_v32 = vmax.f32 %v4277_v7, 0.0 }
 0x705   : > { %4341 = vst.msk [vmem:[%s7745_s26 + $0xc8] sm:$0xff] %vm279_vm0, %v4309_v32 }
 0x706   : > { %v4051_v4 = vpop.f32.mrf.mxu1 }
 0x707   : > { %v4052_v15 = vadd.f32 %v7711_v8, %v4051_v4 }
 0x709   : > { %vm4129_vm7 = vcmp.gt.f32.partialorder %v4052_v15, 0.0  ;;  %v4165_v38 = vmul.f32 %v7719_v0, %v4052_v15 }
 0x70b   : > { %v4197_v57 = vsel %vm4129_vm7, %v4052_v15, %v4165_v38  ;;  %v4102_v24 = vpop.f32.mrf.mxu3 }
 0x70c   : > { %v4261_v61 = vadd.f32 %v4229_v27, %v4197_v57  ;;  %v4103_v30 = vadd.f32 %v7711_v8, %v4102_v24  ;;  %v4250_v57 = vld [vmem:[%s4695_s30 + $0xf0] sm:$0xff] }
 0x70e   : > { %v4293_v44 = vmax.f32 %v4261_v61, 0.0  ;;  %vm4146_vm8 = vcmp.gt.f32.partialorder %v4103_v30, 0.0  ;;  %v4182_v25 = vmul.f32 %v7719_v0, %v4103_v30 }
 0x710   : > { %4325 = vst.msk [vmem:[%s7745_s26 + $0x48] sm:$0xff] %vm279_vm0, %v4293_v44  ;;  %v4214_v19 = vsel %vm4146_vm8, %v4103_v30, %v4182_v25 }
 0x711   : > { %v4278_v63 = vadd.f32 %v4246_v58, %v4214_v19  ;;  %v4234_v58 = vld [vmem:[%s4695_s30 + $0x70] sm:$0xff] }
 0x713   : > { %v4310_v41 = vmax.f32 %v4278_v63, 0.0 }
 0x714   : > { %v4054_v40 = vpop.f32.mrf.mxu1 }
 0x715   : > { %4342 = vst.msk [vmem:[%s7745_s26 + $0xd0] sm:$0xff] %vm279_vm0, %v4310_v41  ;;  %v4055_v10 = vadd.f32 %v7711_v8, %v4054_v40 }
 0x717   : > { %vm4130_vm9 = vcmp.gt.f32.partialorder %v4055_v10, 0.0  ;;  %v4166_v52 = vmul.f32 %v7719_v0, %v4055_v10 }
 0x719   : > { %v4198_v56 = vsel %vm4130_vm9, %v4055_v10, %v4166_v52 }
 0x71a   : > { %v4262_v62 = vadd.f32 %v4230_v28, %v4198_v56 }
 0x71c   : > { %v4294_v48 = vmax.f32 %v4262_v62, 0.0  ;;  %v4251_v62 = vld [vmem:[%s4695_s30 + $0xf8] sm:$0xff] }
 0x71e   : > { %4326 = vst.msk [vmem:[%s7745_s26 + $0x50] sm:$0xff] %vm279_vm0, %v4294_v48 }
 0x724   : > { %v4105_v51 = vpop.f32.mrf.mxu3 }
 0x725   : > { %v4106_v36 = vadd.f32 %v7711_v8, %v4105_v51 }
 0x727   : > { %vm4147_vm10 = vcmp.gt.f32.partialorder %v4106_v36, 0.0  ;;  %v4183_v2 = vmul.f32 %v7719_v0, %v4106_v36  ;;  %v4057_v33 = vpop.f32.mrf.mxu1 }
 0x728   : > { %v4058_v21 = vadd.f32 %v7711_v8, %v4057_v33 }
 0x729   : > { %v4215_v49 = vsel %vm4147_vm10, %v4106_v36, %v4183_v2  ;;  %v4235_v2 = vld [vmem:[%s4695_s30 + $0x78] sm:$0xff] }
 0x72a   : > { %v4279_v59 = vadd.f32 %v4247_v37, %v4215_v49  ;;  %vm4131_vm13 = vcmp.gt.f32.partialorder %v4058_v21, 0.0  ;;  %v4167_v43 = vmul.f32 %v7719_v0, %v4058_v21 }
 0x72c   : > { %v4311_v55 = vmax.f32 %v4279_v59, 0.0  ;;  %v4199_v12 = vsel %vm4131_vm13, %v4058_v21, %v4167_v43 }
 0x72d   : > { %v4263_v22 = vadd.f32 %v4231_v18, %v4199_v12 }
 0x72e   : > { %4343 = vst.msk [vmem:[%s7745_s26 + $0xd8] sm:$0xff] %vm279_vm0, %v4311_v55 }
 0x72f   : > { %v4295_v1 = vmax.f32 %v4263_v22, 0.0 }
 0x731   : > { %4327 = vst.msk [vmem:[%s7745_s26 + $0x58] sm:$0xff] %vm279_vm0, %v4295_v1 }
 0x735   : > { %v4108_v47 = vpop.f32.mrf.mxu3 }
 0x736   : > { %v4109_v16 = vadd.f32 %v7711_v8, %v4108_v47 }
 0x738   : > { %vm4148_vm14 = vcmp.gt.f32.partialorder %v4109_v16, 0.0  ;;  %v4184_v54 = vmul.f32 %v7719_v0, %v4109_v16 }
 0x73a   : > { %v4216_v53 = vsel %vm4148_vm14, %v4109_v16, %v4184_v54 }
 0x73b   : > { %v4280_v39 = vadd.f32 %v4248_v6, %v4216_v53 }
 0x73d   : > { %v4312_v23 = vmax.f32 %v4280_v39, 0.0 }
 0x73e   : > { %v4060_v13 = vpop.f32.mrf.mxu1 }
 0x73f   : > { %4344 = vst.msk [vmem:[%s7745_s26 + $0xe0] sm:$0xff] %vm279_vm0, %v4312_v23  ;;  %v4061_v34 = vadd.f32 %v7711_v8, %v4060_v13 }
 0x741   : > { %vm4132_vm15 = vcmp.gt.f32.partialorder %v4061_v34, 0.0  ;;  %v4168_v60 = vmul.f32 %v7719_v0, %v4061_v34 }
 0x743   : > { %v4200_v45 = vsel %vm4132_vm15, %v4061_v34, %v4168_v60  ;;  %v4111_v5 = vpop.f32.mrf.mxu3 }
 0x744   : > { %v4264_v3 = vadd.f32 %v4232_v50, %v4200_v45  ;;  %v4112_v35 = vadd.f32 %v7711_v8, %v4111_v5 }
 0x746   : > { %v4296_v20 = vmax.f32 %v4264_v3, 0.0  ;;  %vm4149_vm1 = vcmp.gt.f32.partialorder %v4112_v35, 0.0  ;;  %v4185_v31 = vmul.f32 %v7719_v0, %v4112_v35 }
 0x748   : > { %4328 = vst.msk [vmem:[%s7745_s26 + $0x60] sm:$0xff] %vm279_vm0, %v4296_v20  ;;  %v4217_v29 = vsel %vm4149_vm1, %v4112_v35, %v4185_v31 }
 0x749   : > { %v4281_v9 = vadd.f32 %v4249_v14, %v4217_v29 }
 0x74b   : > { %v4313_v17 = vmax.f32 %v4281_v9, 0.0 }
 0x74c   : > { %v4063_v26 = vpop.f32.mrf.mxu1 }
 0x74d   : > { %4345 = vst.msk [vmem:[%s7745_s26 + $0xe8] sm:$0xff] %vm279_vm0, %v4313_v17  ;;  %v4064_v11 = vadd.f32 %v7711_v8, %v4063_v26 }
 0x74f   : > { %vm4133_vm11 = vcmp.gt.f32.partialorder %v4064_v11, 0.0  ;;  %v4169_v46 = vmul.f32 %v7719_v0, %v4064_v11 }
 0x751   : > { %v4201_v7 = vsel %vm4133_vm11, %v4064_v11, %v4169_v46 }
 0x752   : > { %v4265_v32 = vadd.f32 %v4233_v42, %v4201_v7 }
 0x754   : > { %v4297_v4 = vmax.f32 %v4265_v32, 0.0 }
 0x756   : > { %4329 = vst.msk [vmem:[%s7745_s26 + $0x68] sm:$0xff] %vm279_vm0, %v4297_v4 }
 0x75c   : > { %v4114_v15 = vpop.f32.mrf.mxu3 }
 0x75d   : > { %v4115_v38 = vadd.f32 %v7711_v8, %v4114_v15 }
 0x75f   : > { %vm4150_vm12 = vcmp.gt.f32.partialorder %v4115_v38, 0.0  ;;  %v4186_v27 = vmul.f32 %v7719_v0, %v4115_v38  ;;  %v4066_v24 = vpop.f32.mrf.mxu1 }
 0x760   : > { %v4067_v61 = vadd.f32 %v7711_v8, %v4066_v24 }
 0x761   : > { %v4218_v30 = vsel %vm4150_vm12, %v4115_v38, %v4186_v27 }
 0x762   : > { %v4282_v44 = vadd.f32 %v4250_v57, %v4218_v30  ;;  %vm4134_vm2 = vcmp.gt.f32.partialorder %v4067_v61, 0.0  ;;  %v4170_v25 = vmul.f32 %v7719_v0, %v4067_v61 }
 0x764   : > { %v4314_v19 = vmax.f32 %v4282_v44, 0.0  ;;  %v4202_v63 = vsel %vm4134_vm2, %v4067_v61, %v4170_v25 }
 0x765   : > { %v4266_v41 = vadd.f32 %v4234_v58, %v4202_v63 }
 0x766   : > { %4346 = vst.msk [vmem:[%s7745_s26 + $0xf0] sm:$0xff] %vm279_vm0, %v4314_v19 }
 0x767   : > { %v4298_v40 = vmax.f32 %v4266_v41, 0.0 }
 0x769   : > { %4330 = vst.msk [vmem:[%s7745_s26 + $0x70] sm:$0xff] %vm279_vm0, %v4298_v40 }
 0x76d   : > { %v4117_v10 = vpop.f32.mrf.mxu3 }
 0x76e   : > { %v4118_v52 = vadd.f32 %v7711_v8, %v4117_v10 }
 0x76f   : > { %v4069_v28 = vpop.f32.mrf.mxu1 }
 0x770   : > { %vm4151_vm3 = vcmp.gt.f32.partialorder %v4118_v52, 0.0  ;;  %v4187_v56 = vmul.f32 %v7719_v0, %v4118_v52  ;;  %v4070_v48 = vadd.f32 %v7711_v8, %v4069_v28 }
 0x772   : > { %v4219_v51 = vsel %vm4151_vm3, %v4118_v52, %v4187_v56  ;;  %vm4135_vm4 = vcmp.gt.f32.partialorder %v4070_v48, 0.0  ;;  %v4171_v36 = vmul.f32 %v7719_v0, %v4070_v48 }
 0x773   : > { %v4283_v37 = vadd.f32 %v4251_v62, %v4219_v51 }
 0x774   : > { %v4203_v33 = vsel %vm4135_vm4, %v4070_v48, %v4171_v36 }
 0x775   : > { %v4315_v21 = vmax.f32 %v4283_v37, 0.0  ;;  %v4267_v49 = vadd.f32 %v4235_v2, %v4203_v33 }
 0x777   : > { %4347 = vst.msk [vmem:[%s7745_s26 + $0xf8] sm:$0xff] %vm279_vm0, %v4315_v21  ;;  %v4299_v59 = vmax.f32 %v4267_v49, 0.0 }
 0x779   : > { %4331 = vst.msk [vmem:[%s7745_s26 + $0x78] sm:$0xff] %vm279_vm0, %v4299_v59 }
 0x77a PF: > { %s17_s24 = sadd.s32 1, %s4561_s24  }
 0x77b   : > { %p14_p4 = scmp.ge.s32.totalorder %s17_s24, 4  }
 0x77d   :  { %16 = sbr.rel (!%p14_p4) target bundleno = 1 (0x1), region = 80 }

</bundles_post_ra>
